<compile_context>
chip_gen: v7x
topology: tpu7x:2x2x1
jax: 0.10.0
libtpu: 0.0.40
codegen_flags: <defaults>
</compile_context>

<pallas_src>
import functools

import jax
import jax.numpy as jnp
from jax.experimental import pallas as pl
from jax.experimental.pallas import tpu as pltpu


def _round_up(x, m):
    return (x + m - 1) // m * m


def _leaky_relu(x, slope=0.2):
    # slope < 1  =>  max(x, slope * x) == leaky_relu(x, slope)  (2 VALU ops)
    return jnp.maximum(x, slope * x)


def _vmem_cap_bytes():
    try:
        return int(pltpu.get_tpu_info().vmem_capacity_bytes)
    except Exception:
        return 128 * 1024 * 1024


def _vmem_limit(estimate_bytes):
    cap = _vmem_cap_bytes()
    return int(min(max(2 * int(estimate_bytes), 32 * 1024 * 1024),
                   int(cap * 0.85)))


# ---------------------------------------------------------------------------
# Kernel 1: per-layer node projection  h = x @ W ,  att = h @ A
# ---------------------------------------------------------------------------
def _make_proj_kernel(mxu_dtype):
    def kernel(x_ref, w_ref, a_ref, h_ref, att_ref):
        h = jnp.dot(x_ref[...].astype(mxu_dtype), w_ref[...].astype(mxu_dtype),
                    preferred_element_type=jnp.float32)
        h_ref[...] = h
        att_ref[...] = jnp.dot(h.astype(mxu_dtype),
                               a_ref[...].astype(mxu_dtype),
                               preferred_element_type=jnp.float32)
    return kernel


def _proj_call(x, w, a_mat, *, tile, mxu_dtype):
    n_pad, f_cur = x.shape
    emb = w.shape[1]
    two_h = a_mat.shape[1]
    flops = 2 * n_pad * f_cur * emb + 2 * n_pad * emb * two_h
    bytes_acc = 4 * (n_pad * f_cur + f_cur * emb + emb * two_h
                     + n_pad * emb + n_pad * two_h)
    est = 4 * (2 * tile * f_cur + f_cur * emb + emb * two_h
               + 2 * tile * emb + 2 * tile * two_h) + 4 * tile * emb
    return pl.pallas_call(
        _make_proj_kernel(mxu_dtype),
        out_shape=(jax.ShapeDtypeStruct((n_pad, emb), jnp.float32),
                   jax.ShapeDtypeStruct((n_pad, two_h), jnp.float32)),
        grid=(n_pad // tile,),
        in_specs=[pl.BlockSpec((tile, f_cur), lambda i: (i, 0)),
                  pl.BlockSpec((f_cur, emb), lambda i: (0, 0)),
                  pl.BlockSpec((emb, two_h), lambda i: (0, 0))],
        out_specs=(pl.BlockSpec((tile, emb), lambda i: (i, 0)),
                   pl.BlockSpec((tile, two_h), lambda i: (i, 0))),
        compiler_params=pltpu.CompilerParams(
            dimension_semantics=("parallel",),
            vmem_limit_bytes=_vmem_limit(est)),
        cost_estimate=pl.CostEstimate(flops=int(flops), transcendentals=0,
                                      bytes_accessed=int(bytes_acc)),
    )(x, w, a_mat)


# ---------------------------------------------------------------------------
# Kernel 2: per-layer attention aggregation over a destination-row tile
# ---------------------------------------------------------------------------
def _make_agg_kernel(n_heads, mxu_dtype):
    def kernel(adj_ref, att_ref, asrc_ref, hbd_ref, b_ref, o_ref):
        # int8 adjacency row block -> additive mask: 0 on edges, -1e9 elsewhere
        neg_bias = (adj_ref[...].astype(jnp.float32) - 1.0) * jnp.float32(1e9)
        att = att_ref[...]        # [tile, 2H]  (cols H..2H-1 = a_dst terms)
        asrc = asrc_ref[...]      # [8, N]      (rows 0..H-1 = a_src terms)

        agg = None
        for h in range(n_heads):
            a_dst = att[:, n_heads + h:n_heads + h + 1]         # [tile, 1]
            a_src = asrc[h:h + 1, :]                            # [1, N]
            logits = _leaky_relu(a_dst + a_src) + neg_bias      # [tile, N]
            m = jnp.max(logits, axis=-1, keepdims=True)
            p = jnp.exp(logits - m)      # masked entries underflow to 0
            denom = jnp.sum(p, axis=-1, keepdims=True)
            alpha = p * pl.reciprocal(denom, approx=True)
            # Head-masked h (only this head's emb columns are nonzero), so the
            # matmul result is already placed at the right output columns.
            part = jnp.dot(alpha.astype(mxu_dtype), hbd_ref[h],
                           preferred_element_type=jnp.float32)  # [tile, emb]
            agg = part if agg is None else agg + part

        # + bias, then the module-level leaky_relu applied after every layer.
        o_ref[...] = _leaky_relu(agg + b_ref[...])
    return kernel


def _agg_call(adj_i8, att, asrc_t, hbd3, b, *, tile, mxu_dtype):
    n_pad = adj_i8.shape[0]
    n_heads, _, emb = hbd3.shape
    two_h = att.shape[1]
    flops = n_heads * (2 * n_pad * n_pad * emb + 8 * n_pad * n_pad)
    transc = n_heads * (n_pad * n_pad + n_pad)
    bytes_acc = (n_pad * n_pad                        # int8 adj
                 + 4 * n_pad * two_h + 4 * 8 * n_pad
                 + 2 * n_heads * n_pad * emb          # bf16 masked h
                 + 4 * emb + 4 * n_pad * emb)
    est = (2 * tile * n_pad                           # adj double buffer (i8)
           + 2 * n_heads * n_pad * emb                # resident bf16 masked h
           + 4 * 8 * n_pad                            # resident a_src^T
           + 4 * 2 * tile * two_h + 4 * 2 * tile * emb
           + 4 * 8 * tile * n_pad)                    # in-flight temporaries
    return pl.pallas_call(
        _make_agg_kernel(n_heads, mxu_dtype),
        out_shape=jax.ShapeDtypeStruct((n_pad, emb), jnp.float32),
        grid=(n_pad // tile,),
        in_specs=[pl.BlockSpec((tile, n_pad), lambda i: (i, 0)),
                  pl.BlockSpec((tile, two_h), lambda i: (i, 0)),
                  pl.BlockSpec((8, n_pad), lambda i: (0, 0)),
                  pl.BlockSpec((n_heads, n_pad, emb), lambda i: (0, 0, 0)),
                  pl.BlockSpec((1, emb), lambda i: (0, 0))],
        out_specs=pl.BlockSpec((tile, emb), lambda i: (i, 0)),
        compiler_params=pltpu.CompilerParams(
            dimension_semantics=("parallel",),
            vmem_limit_bytes=_vmem_limit(est)),
        cost_estimate=pl.CostEstimate(flops=int(flops),
                                      transcendentals=int(transc),
                                      bytes_accessed=int(bytes_acc)),
    )(adj_i8, att, asrc_t, hbd3, b)


# ---------------------------------------------------------------------------
# Kernel 3: output Linear
# ---------------------------------------------------------------------------
def _make_linear_kernel(mxu_dtype):
    def kernel(x_ref, w_ref, b_ref, o_ref):
        o_ref[...] = (jnp.dot(x_ref[...].astype(mxu_dtype),
                              w_ref[...].astype(mxu_dtype),
                              preferred_element_type=jnp.float32)
                      + b_ref[...])
    return kernel


def _linear_call(x, w, b, *, tile, mxu_dtype):
    n_pad, f_cur = x.shape
    o_pad = w.shape[1]
    flops = 2 * n_pad * f_cur * o_pad
    bytes_acc = 4 * (n_pad * f_cur + f_cur * o_pad + o_pad + n_pad * o_pad)
    est = 4 * (2 * tile * f_cur + f_cur * o_pad + o_pad + 4 * tile * o_pad)
    return pl.pallas_call(
        _make_linear_kernel(mxu_dtype),
        out_shape=jax.ShapeDtypeStruct((n_pad, o_pad), jnp.float32),
        grid=(n_pad // tile,),
        in_specs=[pl.BlockSpec((tile, f_cur), lambda i: (i, 0)),
                  pl.BlockSpec((f_cur, o_pad), lambda i: (0, 0)),
                  pl.BlockSpec((1, o_pad), lambda i: (0, 0))],
        out_specs=pl.BlockSpec((tile, o_pad), lambda i: (i, 0)),
        compiler_params=pltpu.CompilerParams(
            dimension_semantics=("parallel",),
            vmem_limit_bytes=_vmem_limit(est)),
        cost_estimate=pl.CostEstimate(flops=int(flops), transcendentals=0,
                                      bytes_accessed=int(bytes_acc)),
    )(x, w, b)


# ---------------------------------------------------------------------------
# Host-side helpers / forward pass
# ---------------------------------------------------------------------------
def _block_diag_attn(a_src, a_dst):
    """a_src/a_dst: [H, d] -> A: [H*d, 2H] block-diagonal attention matrix.

    Column h holds a_src[h] (source term), column H+h holds a_dst[h] (dest).
    """
    n_heads, head_dim = a_src.shape
    emb = n_heads * head_dim
    a = jnp.zeros((emb, 2 * n_heads), jnp.float32)
    for h in range(n_heads):
        a = a.at[h * head_dim:(h + 1) * head_dim, h].set(a_src[h])
        a = a.at[h * head_dim:(h + 1) * head_dim, n_heads + h].set(a_dst[h])
    return a


def sam_gat_forward(params, x, adj, *, n_heads, head_dim,
                    mxu_dtype=jnp.bfloat16):
    emb = n_heads * head_dim
    n, f_in = x.shape
    out_size = params["out_w"].shape[1]

    # Lane-dense zero padding.  Real destination rows never attend to padded
    # source columns (adj == 0 there -> -1e9 mask -> exp underflow), and padded
    # destination rows are sliced off at the end, so real-node outputs are
    # unchanged.  Keep this invariant if the padding scheme changes.
    n_pad = _round_up(max(n, 8), 128)
    f_pad = _round_up(f_in, 128)
    o_pad = _round_up(out_size, 128)
    tile = 256 if (n_pad % 256 == 0 and n_pad > 256) else 128

    x_p = jnp.zeros((n_pad, f_pad), jnp.float32).at[:n, :f_in].set(x)
    adj_i8 = jnp.zeros((n_pad, n_pad), jnp.int8).at[:n, :n].set(
        (adj > 0).astype(jnp.int8))

    # Per-head column mask: head h owns emb columns [h*d, (h+1)*d).
    col_mask = jnp.zeros((n_heads, emb), jnp.float32)
    for h in range(n_heads):
        col_mask = col_mask.at[h, h * head_dim:(h + 1) * head_dim].set(1.0)

    x_cur = x_p
    for li, (w, a_s, a_d, b) in enumerate(params["gat_layers"]):
        if li == 0:
            w = jnp.zeros((f_pad, emb), jnp.float32).at[:w.shape[0], :].set(w)
        a_mat = _block_diag_attn(a_s, a_d)

        # Row-tiled projection kernel: h = x @ W, att = h @ A.
        h_nodes, att = _proj_call(x_cur, w, a_mat, tile=tile,
                                  mxu_dtype=mxu_dtype)

        # Wrapper-side layout plumbing (O(N*emb), once per layer):
        #   * one a_src transpose ([N,H] -> [H,N]) instead of per-head
        #     column->row relayouts inside the kernel,
        #   * head-masked bf16 copies of h so the aggregation matmuls produce
        #     the full emb-wide result per MXU call.
        asrc_t = jnp.zeros((8, n_pad), jnp.float32).at[:n_heads, :].set(
            att[:, :n_heads].T)
        hbd3 = (h_nodes[None, :, :] * col_mask[:, None, :]).astype(mxu_dtype)

        # Row-tiled attention aggregation (+ bias + per-layer leaky_relu).
        x_cur = _agg_call(adj_i8, att, asrc_t, hbd3, b, tile=tile,
                          mxu_dtype=mxu_dtype)

    out_w = jnp.zeros((emb, o_pad), jnp.float32).at[:, :out_size].set(
        params["out_w"])
    out_b = jnp.zeros((1, o_pad), jnp.float32).at[:, :out_size].set(
        params["out_b"])
    out = _linear_call(x_cur, out_w, out_b, tile=tile, mxu_dtype=mxu_dtype)
    return out[:n, :out_size]


def init_params(key, in_size, emb_size, n_heads, out_size, num_layers):
    head_dim = emb_size // n_heads
    params = {"gat_layers": []}
    f_in = in_size
    for li in range(num_layers):
        k = jax.random.fold_in(key, li)
        kw, ks, kd, kb = jax.random.split(k, 4)
        w = jax.random.normal(kw, (f_in, emb_size), jnp.float32) * 0.1
        a_s = jax.random.normal(ks, (n_heads, head_dim), jnp.float32) * 0.1
        a_d = jax.random.normal(kd, (n_heads, head_dim), jnp.float32) * 0.1
        b = jax.random.normal(kb, (1, emb_size), jnp.float32) * 0.01
        params["gat_layers"].append((w, a_s, a_d, b))
        f_in = emb_size
    ko = jax.random.fold_in(key, 1000)
    kow, kob = jax.random.split(ko)
    params["out_w"] = jax.random.normal(kow, (emb_size, out_size),
                                        jnp.float32) * 0.1
    params["out_b"] = jax.random.normal(kob, (1, out_size), jnp.float32) * 0.01
    return params


def dense_adj_with_self_loops(edge_index, num_nodes):
    """edge_index: [2, E] (src, dst) -> adj[dst, src] with self loops."""
    src, dst = edge_index[0], edge_index[1]
    adj = jnp.zeros((num_nodes, num_nodes), jnp.float32)
    adj = adj.at[dst, src].set(1.0)
    adj = jnp.maximum(adj, jnp.eye(num_nodes, dtype=jnp.float32))
    return adj


if __name__ == "__main__":
    # Small, deterministic configuration.
    N = 16            # number of graph nodes
    IN_SIZE = 8
    EMB_SIZE = 32
    N_HEADS = 4
    OUT_SIZE = 4
    NUM_LAYERS = 2
    HEAD_DIM = EMB_SIZE // N_HEADS

    key = jax.random.PRNGKey(0)
    kx, ke, kp = jax.random.split(key, 3)

    x = jax.random.normal(kx, (N, IN_SIZE), jnp.float32)

    # Random directed edges (E = 32), then densified with self loops.
    E = 32
    edge_index = jax.random.randint(ke, (2, E), 0, N, dtype=jnp.int32)
    adj = dense_adj_with_self_loops(edge_index, N)

    params = init_params(kp, IN_SIZE, EMB_SIZE, N_HEADS, OUT_SIZE, NUM_LAYERS)

    fwd = jax.jit(functools.partial(sam_gat_forward,
                                    n_heads=N_HEADS, head_dim=HEAD_DIM))
    out = fwd(params, x, adj)
    jax.block_until_ready(out)

    assert out.shape == (N, OUT_SIZE), out.shape
    assert bool(jnp.all(jnp.isfinite(out)))
    print("KERNEL_OK")
</pallas_src>

<mosaic_0001>
module attributes {stable_mosaic.version = 11 : i64} {
  func.func @kernel(%arg0: i32, %arg1: memref<128x128xf32, #tpu.memory_space<vmem>>, %arg2: memref<128x32xf32, #tpu.memory_space<vmem>>, %arg3: memref<32x8xf32, #tpu.memory_space<vmem>>, %arg4: memref<128x32xf32, #tpu.memory_space<vmem>>, %arg5: memref<128x8xf32, #tpu.memory_space<vmem>>) attributes {dimension_semantics = [#tpu.dimension_semantics<parallel>], iteration_bounds = array<i64: 1>, scalar_prefetch = 0 : i64, scratch_operands = 0 : i64, tpu.core_type = #tpu.core_type<tc>, window_params = [{transform_indices = @transform_0, window_bounds = array<i64: 128, 128>}, {pipeline_mode = #tpu.pipeline_mode<synchronous>, transform_indices = @transform_1, window_bounds = array<i64: 128, 32>}, {pipeline_mode = #tpu.pipeline_mode<synchronous>, transform_indices = @transform_2, window_bounds = array<i64: 32, 8>}, {transform_indices = @transform_3, window_bounds = array<i64: 128, 32>}, {transform_indices = @transform_4, window_bounds = array<i64: 128, 8>}]} {
    %c0 = arith.constant 0 : index
    %c0_0 = arith.constant 0 : index
    %0 = vector.load %arg1[%c0, %c0_0] : memref<128x128xf32, #tpu.memory_space<vmem>>, vector<128x128xf32>
    %1 = arith.truncf %0 : vector<128x128xf32> to vector<128x128xbf16>
    %c0_1 = arith.constant 0 : index
    %c0_2 = arith.constant 0 : index
    %2 = vector.load %arg2[%c0_1, %c0_2] : memref<128x32xf32, #tpu.memory_space<vmem>>, vector<128x32xf32>
    %3 = arith.truncf %2 : vector<128x32xf32> to vector<128x32xbf16>
    %cst = arith.constant dense<0.000000e+00> : vector<128x32xf32>
    %4 = tpu.matmul %1, %3, %cst {dimension_numbers = #tpu.dot_dimension_numbers<[1], [0], [0], [1], [0, 0, 1, 1], [], []>} : vector<128x128xbf16>, vector<128x32xbf16>, vector<128x32xf32> -> vector<128x32xf32>
    %c0_3 = arith.constant 0 : index
    %c0_4 = arith.constant 0 : index
    %5 = vector.load %arg4[%c0_3, %c0_4] : memref<128x32xf32, #tpu.memory_space<vmem>>, vector<128x32xf32>
    tpu.vector_store %arg4[%c0_3, %c0_4], %4 {strides = array<i32>} : memref<128x32xf32, #tpu.memory_space<vmem>>, vector<128x32xf32>,
    %6 = arith.truncf %4 : vector<128x32xf32> to vector<128x32xbf16>
    %c0_5 = arith.constant 0 : index
    %c0_6 = arith.constant 0 : index
    %7 = vector.load %arg3[%c0_5, %c0_6] : memref<32x8xf32, #tpu.memory_space<vmem>>, vector<32x8xf32>
    %8 = arith.truncf %7 : vector<32x8xf32> to vector<32x8xbf16>
    %cst_7 = arith.constant dense<0.000000e+00> : vector<128x8xf32>
    %9 = tpu.matmul %6, %8, %cst_7 {dimension_numbers = #tpu.dot_dimension_numbers<[1], [0], [0], [1], [0, 0, 1, 1], [], []>} : vector<128x32xbf16>, vector<32x8xbf16>, vector<128x8xf32> -> vector<128x8xf32>
    %c0_8 = arith.constant 0 : index
    %c0_9 = arith.constant 0 : index
    %10 = vector.load %arg5[%c0_8, %c0_9] : memref<128x8xf32, #tpu.memory_space<vmem>>, vector<128x8xf32>
    tpu.vector_store %arg5[%c0_8, %c0_9], %9 {strides = array<i32>} : memref<128x8xf32, #tpu.memory_space<vmem>>, vector<128x8xf32>,
    return
  }
  func.func @transform_0(%arg0: i32) -> (i32, i32) {
    %c0_i32 = arith.constant 0 : i32
    %c0_i32_0 = arith.constant 0 : i32
    return %arg0, %c0_i32 : i32, i32
  }
  func.func @transform_1(%arg0: i32) -> (i32, i32) {
    %c0_i32 = arith.constant 0 : i32
    %c0_i32_0 = arith.constant 0 : i32
    %c0_i32_1 = arith.constant 0 : i32
    return %c0_i32, %c0_i32_0 : i32, i32
  }
  func.func @transform_2(%arg0: i32) -> (i32, i32) {
    %c0_i32 = arith.constant 0 : i32
    %c0_i32_0 = arith.constant 0 : i32
    %c0_i32_1 = arith.constant 0 : i32
    return %c0_i32, %c0_i32_0 : i32, i32
  }
  func.func @transform_3(%arg0: i32) -> (i32, i32) {
    %c0_i32 = arith.constant 0 : i32
    %c0_i32_0 = arith.constant 0 : i32
    return %arg0, %c0_i32 : i32, i32
  }
  func.func @transform_4(%arg0: i32) -> (i32, i32) {
    %c0_i32 = arith.constant 0 : i32
    %c0_i32_0 = arith.constant 0 : i32
    return %arg0, %c0_i32 : i32, i32
  }
}

module attributes {stable_mosaic.version = 11 : i64} {
  func.func @kernel(%arg0: i32, %arg1: memref<128x32xf32, #tpu.memory_space<vmem>>, %arg2: memref<32x32xf32, #tpu.memory_space<vmem>>, %arg3: memref<32x8xf32, #tpu.memory_space<vmem>>, %arg4: memref<128x32xf32, #tpu.memory_space<vmem>>, %arg5: memref<128x8xf32, #tpu.memory_space<vmem>>) attributes {dimension_semantics = [#tpu.dimension_semantics<parallel>], iteration_bounds = array<i64: 1>, scalar_prefetch = 0 : i64, scratch_operands = 0 : i64, tpu.core_type = #tpu.core_type<tc>, window_params = [{transform_indices = @transform_0, window_bounds = array<i64: 128, 32>}, {pipeline_mode = #tpu.pipeline_mode<synchronous>, transform_indices = @transform_1, window_bounds = array<i64: 32, 32>}, {pipeline_mode = #tpu.pipeline_mode<synchronous>, transform_indices = @transform_2, window_bounds = array<i64: 32, 8>}, {transform_indices = @transform_3, window_bounds = array<i64: 128, 32>}, {transform_indices = @transform_4, window_bounds = array<i64: 128, 8>}]} {
    %c0 = arith.constant 0 : index
    %c0_0 = arith.constant 0 : index
    %0 = vector.load %arg1[%c0, %c0_0] : memref<128x32xf32, #tpu.memory_space<vmem>>, vector<128x32xf32>
    %1 = arith.truncf %0 : vector<128x32xf32> to vector<128x32xbf16>
    %c0_1 = arith.constant 0 : index
    %c0_2 = arith.constant 0 : index
    %2 = vector.load %arg2[%c0_1, %c0_2] : memref<32x32xf32, #tpu.memory_space<vmem>>, vector<32x32xf32>
    %3 = arith.truncf %2 : vector<32x32xf32> to vector<32x32xbf16>
    %cst = arith.constant dense<0.000000e+00> : vector<128x32xf32>
    %4 = tpu.matmul %1, %3, %cst {dimension_numbers = #tpu.dot_dimension_numbers<[1], [0], [0], [1], [0, 0, 1, 1], [], []>} : vector<128x32xbf16>, vector<32x32xbf16>, vector<128x32xf32> -> vector<128x32xf32>
    %c0_3 = arith.constant 0 : index
    %c0_4 = arith.constant 0 : index
    %5 = vector.load %arg4[%c0_3, %c0_4] : memref<128x32xf32, #tpu.memory_space<vmem>>, vector<128x32xf32>
    tpu.vector_store %arg4[%c0_3, %c0_4], %4 {strides = array<i32>} : memref<128x32xf32, #tpu.memory_space<vmem>>, vector<128x32xf32>,
    %6 = arith.truncf %4 : vector<128x32xf32> to vector<128x32xbf16>
    %c0_5 = arith.constant 0 : index
    %c0_6 = arith.constant 0 : index
    %7 = vector.load %arg3[%c0_5, %c0_6] : memref<32x8xf32, #tpu.memory_space<vmem>>, vector<32x8xf32>
    %8 = arith.truncf %7 : vector<32x8xf32> to vector<32x8xbf16>
    %cst_7 = arith.constant dense<0.000000e+00> : vector<128x8xf32>
    %9 = tpu.matmul %6, %8, %cst_7 {dimension_numbers = #tpu.dot_dimension_numbers<[1], [0], [0], [1], [0, 0, 1, 1], [], []>} : vector<128x32xbf16>, vector<32x8xbf16>, vector<128x8xf32> -> vector<128x8xf32>
    %c0_8 = arith.constant 0 : index
    %c0_9 = arith.constant 0 : index
    %10 = vector.load %arg5[%c0_8, %c0_9] : memref<128x8xf32, #tpu.memory_space<vmem>>, vector<128x8xf32>
    tpu.vector_store %arg5[%c0_8, %c0_9], %9 {strides = array<i32>} : memref<128x8xf32, #tpu.memory_space<vmem>>, vector<128x8xf32>,
    return
  }
  func.func @transform_0(%arg0: i32) -> (i32, i32) {
    %c0_i32 = arith.constant 0 : i32
    %c0_i32_0 = arith.constant 0 : i32
    return %arg0, %c0_i32 : i32, i32
  }
  func.func @transform_1(%arg0: i32) -> (i32, i32) {
    %c0_i32 = arith.constant 0 : i32
    %c0_i32_0 = arith.constant 0 : i32
    %c0_i32_1 = arith.constant 0 : i32
    return %c0_i32, %c0_i32_0 : i32, i32
  }
  func.func @transform_2(%arg0: i32) -> (i32, i32) {
    %c0_i32 = arith.constant 0 : i32
    %c0_i32_0 = arith.constant 0 : i32
    %c0_i32_1 = arith.constant 0 : i32
    return %c0_i32, %c0_i32_0 : i32, i32
  }
  func.func @transform_3(%arg0: i32) -> (i32, i32) {
    %c0_i32 = arith.constant 0 : i32
    %c0_i32_0 = arith.constant 0 : i32
    return %arg0, %c0_i32 : i32, i32
  }
  func.func @transform_4(%arg0: i32) -> (i32, i32) {
    %c0_i32 = arith.constant 0 : i32
    %c0_i32_0 = arith.constant 0 : i32
    return %arg0, %c0_i32 : i32, i32
  }
}

module attributes {stable_mosaic.version = 11 : i64} {
  func.func @kernel(%arg0: i32, %arg1: memref<128x128xi8, #tpu.memory_space<vmem>>, %arg2: memref<128x8xf32, #tpu.memory_space<vmem>>, %arg3: memref<8x128xf32, #tpu.memory_space<vmem>>, %arg4: memref<4x128x32xbf16, #tpu.memory_space<vmem>>, %arg5: memref<1x32xf32, #tpu.memory_space<vmem>>, %arg6: memref<128x32xf32, #tpu.memory_space<vmem>>) attributes {dimension_semantics = [#tpu.dimension_semantics<parallel>], iteration_bounds = array<i64: 1>, scalar_prefetch = 0 : i64, scratch_operands = 0 : i64, tpu.core_type = #tpu.core_type<tc>, window_params = [{transform_indices = @transform_0, window_bounds = array<i64: 128, 128>}, {transform_indices = @transform_1, window_bounds = array<i64: 128, 8>}, {pipeline_mode = #tpu.pipeline_mode<synchronous>, transform_indices = @transform_2, window_bounds = array<i64: 8, 128>}, {pipeline_mode = #tpu.pipeline_mode<synchronous>, transform_indices = @transform_3, window_bounds = array<i64: 4, 128, 32>}, {pipeline_mode = #tpu.pipeline_mode<synchronous>, transform_indices = @transform_4, window_bounds = array<i64: 1, 32>}, {transform_indices = @transform_5, window_bounds = array<i64: 128, 32>}]} {
    %c0 = arith.constant 0 : index
    %c0_0 = arith.constant 0 : index
    %0 = vector.load %arg1[%c0, %c0_0] : memref<128x128xi8, #tpu.memory_space<vmem>>, vector<128x128xi8>
    %1 = arith.sitofp %0 : vector<128x128xi8> to vector<128x128xf32>
    %cst = arith.constant 1.000000e+00 : f32
    %2 = vector.broadcast %cst : f32 to vector<128x128xf32>
    %3 = arith.subf %1, %2 : vector<128x128xf32>
    %cst_1 = arith.constant 1.000000e+09 : f32
    %4 = vector.broadcast %cst_1 : f32 to vector<128x128xf32>
    %5 = arith.mulf %3, %4 : vector<128x128xf32>
    %c0_2 = arith.constant 0 : index
    %c0_3 = arith.constant 0 : index
    %6 = vector.load %arg2[%c0_2, %c0_3] : memref<128x8xf32, #tpu.memory_space<vmem>>, vector<128x8xf32>
    %c0_4 = arith.constant 0 : index
    %c0_5 = arith.constant 0 : index
    %7 = vector.load %arg3[%c0_4, %c0_5] : memref<8x128xf32, #tpu.memory_space<vmem>>, vector<8x128xf32>
    %8 = vector.extract_strided_slice %6 {offsets = [0, 4], sizes = [128, 1], strides = [1, 1]} : vector<128x8xf32> to vector<128x1xf32>
    %9 = vector.extract_strided_slice %7 {offsets = [0, 0], sizes = [1, 128], strides = [1, 1]} : vector<8x128xf32> to vector<1x128xf32>
    %10 = vector.broadcast %8 : vector<128x1xf32> to vector<128x128xf32>
    %11 = vector.broadcast %9 : vector<1x128xf32> to vector<128x128xf32>
    %12 = arith.addf %10, %11 : vector<128x128xf32>
    %cst_6 = arith.constant 2.000000e-01 : f32
    %13 = vector.broadcast %cst_6 : f32 to vector<128x128xf32>
    %14 = arith.mulf %13, %12 : vector<128x128xf32>
    %15 = arith.maximumf %12, %14 : vector<128x128xf32>
    %16 = arith.addf %15, %5 : vector<128x128xf32>
    %cst_7 = arith.constant dense<0xFF800000> : vector<128xf32>
    %17 = vector.multi_reduction <maximumf>, %16, %cst_7 [1] : vector<128x128xf32> to vector<128xf32>
    %18 = vector.shape_cast %17 : vector<128xf32> to vector<128x1xf32>
    %19 = vector.broadcast %18 : vector<128x1xf32> to vector<128x128xf32>
    %20 = arith.subf %16, %19 : vector<128x128xf32>
    %21 = math.exp %20 : vector<128x128xf32>
    %cst_8 = arith.constant dense<0.000000e+00> : vector<128xf32>
    %22 = vector.multi_reduction <add>, %21, %cst_8 [1] : vector<128x128xf32> to vector<128xf32>
    %23 = vector.shape_cast %22 : vector<128xf32> to vector<128x1xf32>
    %24 = tpu.reciprocal %23 {approx = true} : vector<128x1xf32> -> vector<128x1xf32>
    %25 = vector.broadcast %24 : vector<128x1xf32> to vector<128x128xf32>
    %26 = arith.mulf %21, %25 : vector<128x128xf32>
    %27 = arith.truncf %26 : vector<128x128xf32> to vector<128x128xbf16>
    %c0_9 = arith.constant 0 : index
    %c0_10 = arith.constant 0 : index
    %c0_11 = arith.constant 0 : index
    %28 = vector.load %arg4[%c0_9, %c0_10, %c0_11] : memref<4x128x32xbf16, #tpu.memory_space<vmem>>, vector<1x128x32xbf16>
    %29 = vector.shape_cast %28 : vector<1x128x32xbf16> to vector<128x32xbf16>
    %cst_12 = arith.constant dense<0.000000e+00> : vector<128x32xf32>
    %30 = tpu.matmul %27, %29, %cst_12 {dimension_numbers = #tpu.dot_dimension_numbers<[1], [0], [0], [1], [0, 0, 1, 1], [], []>} : vector<128x128xbf16>, vector<128x32xbf16>, vector<128x32xf32> -> vector<128x32xf32>
    %31 = vector.extract_strided_slice %6 {offsets = [0, 5], sizes = [128, 1], strides = [1, 1]} : vector<128x8xf32> to vector<128x1xf32>
    %32 = vector.extract_strided_slice %7 {offsets = [1, 0], sizes = [1, 128], strides = [1, 1]} : vector<8x128xf32> to vector<1x128xf32>
    %33 = vector.broadcast %31 : vector<128x1xf32> to vector<128x128xf32>
    %34 = vector.broadcast %32 : vector<1x128xf32> to vector<128x128xf32>
    %35 = arith.addf %33, %34 : vector<128x128xf32>
    %cst_13 = arith.constant 2.000000e-01 : f32
    %36 = vector.broadcast %cst_13 : f32 to vector<128x128xf32>
    %37 = arith.mulf %36, %35 : vector<128x128xf32>
    %38 = arith.maximumf %35, %37 : vector<128x128xf32>
    %39 = arith.addf %38, %5 : vector<128x128xf32>
    %cst_14 = arith.constant dense<0xFF800000> : vector<128xf32>
    %40 = vector.multi_reduction <maximumf>, %39, %cst_14 [1] : vector<128x128xf32> to vector<128xf32>
    %41 = vector.shape_cast %40 : vector<128xf32> to vector<128x1xf32>
    %42 = vector.broadcast %41 : vector<128x1xf32> to vector<128x128xf32>
    %43 = arith.subf %39, %42 : vector<128x128xf32>
    %44 = math.exp %43 : vector<128x128xf32>
    %cst_15 = arith.constant dense<0.000000e+00> : vector<128xf32>
    %45 = vector.multi_reduction <add>, %44, %cst_15 [1] : vector<128x128xf32> to vector<128xf32>
    %46 = vector.shape_cast %45 : vector<128xf32> to vector<128x1xf32>
    %47 = tpu.reciprocal %46 {approx = true} : vector<128x1xf32> -> vector<128x1xf32>
    %48 = vector.broadcast %47 : vector<128x1xf32> to vector<128x128xf32>
    %49 = arith.mulf %44, %48 : vector<128x128xf32>
    %50 = arith.truncf %49 : vector<128x128xf32> to vector<128x128xbf16>
    %c1 = arith.constant 1 : index
    %c0_16 = arith.constant 0 : index
    %c0_17 = arith.constant 0 : index
    %51 = vector.load %arg4[%c1, %c0_16, %c0_17] : memref<4x128x32xbf16, #tpu.memory_space<vmem>>, vector<1x128x32xbf16>
    %52 = vector.shape_cast %51 : vector<1x128x32xbf16> to vector<128x32xbf16>
    %cst_18 = arith.constant dense<0.000000e+00> : vector<128x32xf32>
    %53 = tpu.matmul %50, %52, %cst_18 {dimension_numbers = #tpu.dot_dimension_numbers<[1], [0], [0], [1], [0, 0, 1, 1], [], []>} : vector<128x128xbf16>, vector<128x32xbf16>, vector<128x32xf32> -> vector<128x32xf32>
    %54 = arith.addf %30, %53 : vector<128x32xf32>
    %55 = vector.extract_strided_slice %6 {offsets = [0, 6], sizes = [128, 1], strides = [1, 1]} : vector<128x8xf32> to vector<128x1xf32>
    %56 = vector.extract_strided_slice %7 {offsets = [2, 0], sizes = [1, 128], strides = [1, 1]} : vector<8x128xf32> to vector<1x128xf32>
    %57 = vector.broadcast %55 : vector<128x1xf32> to vector<128x128xf32>
    %58 = vector.broadcast %56 : vector<1x128xf32> to vector<128x128xf32>
    %59 = arith.addf %57, %58 : vector<128x128xf32>
    %cst_19 = arith.constant 2.000000e-01 : f32
    %60 = vector.broadcast %cst_19 : f32 to vector<128x128xf32>
    %61 = arith.mulf %60, %59 : vector<128x128xf32>
    %62 = arith.maximumf %59, %61 : vector<128x128xf32>
    %63 = arith.addf %62, %5 : vector<128x128xf32>
    %cst_20 = arith.constant dense<0xFF800000> : vector<128xf32>
    %64 = vector.multi_reduction <maximumf>, %63, %cst_20 [1] : vector<128x128xf32> to vector<128xf32>
    %65 = vector.shape_cast %64 : vector<128xf32> to vector<128x1xf32>
    %66 = vector.broadcast %65 : vector<128x1xf32> to vector<128x128xf32>
    %67 = arith.subf %63, %66 : vector<128x128xf32>
    %68 = math.exp %67 : vector<128x128xf32>
    %cst_21 = arith.constant dense<0.000000e+00> : vector<128xf32>
    %69 = vector.multi_reduction <add>, %68, %cst_21 [1] : vector<128x128xf32> to vector<128xf32>
    %70 = vector.shape_cast %69 : vector<128xf32> to vector<128x1xf32>
    %71 = tpu.reciprocal %70 {approx = true} : vector<128x1xf32> -> vector<128x1xf32>
    %72 = vector.broadcast %71 : vector<128x1xf32> to vector<128x128xf32>
    %73 = arith.mulf %68, %72 : vector<128x128xf32>
    %74 = arith.truncf %73 : vector<128x128xf32> to vector<128x128xbf16>
    %c2 = arith.constant 2 : index
    %c0_22 = arith.constant 0 : index
    %c0_23 = arith.constant 0 : index
    %75 = vector.load %arg4[%c2, %c0_22, %c0_23] : memref<4x128x32xbf16, #tpu.memory_space<vmem>>, vector<1x128x32xbf16>
    %76 = vector.shape_cast %75 : vector<1x128x32xbf16> to vector<128x32xbf16>
    %cst_24 = arith.constant dense<0.000000e+00> : vector<128x32xf32>
    %77 = tpu.matmul %74, %76, %cst_24 {dimension_numbers = #tpu.dot_dimension_numbers<[1], [0], [0], [1], [0, 0, 1, 1], [], []>} : vector<128x128xbf16>, vector<128x32xbf16>, vector<128x32xf32> -> vector<128x32xf32>
    %78 = arith.addf %54, %77 : vector<128x32xf32>
    %79 = vector.extract_strided_slice %6 {offsets = [0, 7], sizes = [128, 1], strides = [1, 1]} : vector<128x8xf32> to vector<128x1xf32>
    %80 = vector.extract_strided_slice %7 {offsets = [3, 0], sizes = [1, 128], strides = [1, 1]} : vector<8x128xf32> to vector<1x128xf32>
    %81 = vector.broadcast %79 : vector<128x1xf32> to vector<128x128xf32>
    %82 = vector.broadcast %80 : vector<1x128xf32> to vector<128x128xf32>
    %83 = arith.addf %81, %82 : vector<128x128xf32>
    %cst_25 = arith.constant 2.000000e-01 : f32
    %84 = vector.broadcast %cst_25 : f32 to vector<128x128xf32>
    %85 = arith.mulf %84, %83 : vector<128x128xf32>
    %86 = arith.maximumf %83, %85 : vector<128x128xf32>
    %87 = arith.addf %86, %5 : vector<128x128xf32>
    %cst_26 = arith.constant dense<0xFF800000> : vector<128xf32>
    %88 = vector.multi_reduction <maximumf>, %87, %cst_26 [1] : vector<128x128xf32> to vector<128xf32>
    %89 = vector.shape_cast %88 : vector<128xf32> to vector<128x1xf32>
    %90 = vector.broadcast %89 : vector<128x1xf32> to vector<128x128xf32>
    %91 = arith.subf %87, %90 : vector<128x128xf32>
    %92 = math.exp %91 : vector<128x128xf32>
    %cst_27 = arith.constant dense<0.000000e+00> : vector<128xf32>
    %93 = vector.multi_reduction <add>, %92, %cst_27 [1] : vector<128x128xf32> to vector<128xf32>
    %94 = vector.shape_cast %93 : vector<128xf32> to vector<128x1xf32>
    %95 = tpu.reciprocal %94 {approx = true} : vector<128x1xf32> -> vector<128x1xf32>
    %96 = vector.broadcast %95 : vector<128x1xf32> to vector<128x128xf32>
    %97 = arith.mulf %92, %96 : vector<128x128xf32>
    %98 = arith.truncf %97 : vector<128x128xf32> to vector<128x128xbf16>
    %c3 = arith.constant 3 : index
    %c0_28 = arith.constant 0 : index
    %c0_29 = arith.constant 0 : index
    %99 = vector.load %arg4[%c3, %c0_28, %c0_29] : memref<4x128x32xbf16, #tpu.memory_space<vmem>>, vector<1x128x32xbf16>
    %100 = vector.shape_cast %99 : vector<1x128x32xbf16> to vector<128x32xbf16>
    %cst_30 = arith.constant dense<0.000000e+00> : vector<128x32xf32>
    %101 = tpu.matmul %98, %100, %cst_30 {dimension_numbers = #tpu.dot_dimension_numbers<[1], [0], [0], [1], [0, 0, 1, 1], [], []>} : vector<128x128xbf16>, vector<128x32xbf16>, vector<128x32xf32> -> vector<128x32xf32>
    %102 = arith.addf %78, %101 : vector<128x32xf32>
    %c0_31 = arith.constant 0 : index
    %c0_32 = arith.constant 0 : index
    %103 = vector.load %arg5[%c0_31, %c0_32] : memref<1x32xf32, #tpu.memory_space<vmem>>, vector<1x32xf32>
    %104 = vector.broadcast %103 : vector<1x32xf32> to vector<128x32xf32>
    %105 = arith.addf %102, %104 : vector<128x32xf32>
    %cst_33 = arith.constant 2.000000e-01 : f32
    %106 = vector.broadcast %cst_33 : f32 to vector<128x32xf32>
    %107 = arith.mulf %106, %105 : vector<128x32xf32>
    %108 = arith.maximumf %105, %107 : vector<128x32xf32>
    %c0_34 = arith.constant 0 : index
    %c0_35 = arith.constant 0 : index
    %109 = vector.load %arg6[%c0_34, %c0_35] : memref<128x32xf32, #tpu.memory_space<vmem>>, vector<128x32xf32>
    tpu.vector_store %arg6[%c0_34, %c0_35], %108 {strides = array<i32>} : memref<128x32xf32, #tpu.memory_space<vmem>>, vector<128x32xf32>,
    return
  }
  func.func @transform_0(%arg0: i32) -> (i32, i32) {
    %c0_i32 = arith.constant 0 : i32
    %c0_i32_0 = arith.constant 0 : i32
    return %arg0, %c0_i32 : i32, i32
  }
  func.func @transform_1(%arg0: i32) -> (i32, i32) {
    %c0_i32 = arith.constant 0 : i32
    %c0_i32_0 = arith.constant 0 : i32
    return %arg0, %c0_i32 : i32, i32
  }
  func.func @transform_2(%arg0: i32) -> (i32, i32) {
    %c0_i32 = arith.constant 0 : i32
    %c0_i32_0 = arith.constant 0 : i32
    %c0_i32_1 = arith.constant 0 : i32
    return %c0_i32, %c0_i32_0 : i32, i32
  }
  func.func @transform_3(%arg0: i32) -> (i32, i32, i32) {
    %c0_i32 = arith.constant 0 : i32
    %c0_i32_0 = arith.constant 0 : i32
    %c0_i32_1 = arith.constant 0 : i32
    %c0_i32_2 = arith.constant 0 : i32
    return %c0_i32, %c0_i32_0, %c0_i32_1 : i32, i32, i32
  }
  func.func @transform_4(%arg0: i32) -> (i32, i32) {
    %c0_i32 = arith.constant 0 : i32
    %c0_i32_0 = arith.constant 0 : i32
    %c0_i32_1 = arith.constant 0 : i32
    return %c0_i32, %c0_i32_0 : i32, i32
  }
  func.func @transform_5(%arg0: i32) -> (i32, i32) {
    %c0_i32 = arith.constant 0 : i32
    %c0_i32_0 = arith.constant 0 : i32
    return %arg0, %c0_i32 : i32, i32
  }
}

module attributes {stable_mosaic.version = 11 : i64} {
  func.func @kernel(%arg0: i32, %arg1: memref<128x32xf32, #tpu.memory_space<vmem>>, %arg2: memref<32x128xf32, #tpu.memory_space<vmem>>, %arg3: memref<1x128xf32, #tpu.memory_space<vmem>>, %arg4: memref<128x128xf32, #tpu.memory_space<vmem>>) attributes {dimension_semantics = [#tpu.dimension_semantics<parallel>], iteration_bounds = array<i64: 1>, scalar_prefetch = 0 : i64, scratch_operands = 0 : i64, tpu.core_type = #tpu.core_type<tc>, window_params = [{transform_indices = @transform_0, window_bounds = array<i64: 128, 32>}, {pipeline_mode = #tpu.pipeline_mode<synchronous>, transform_indices = @transform_1, window_bounds = array<i64: 32, 128>}, {pipeline_mode = #tpu.pipeline_mode<synchronous>, transform_indices = @transform_2, window_bounds = array<i64: 1, 128>}, {transform_indices = @transform_3, window_bounds = array<i64: 128, 128>}]} {
    %c0 = arith.constant 0 : index
    %c0_0 = arith.constant 0 : index
    %0 = vector.load %arg1[%c0, %c0_0] : memref<128x32xf32, #tpu.memory_space<vmem>>, vector<128x32xf32>
    %1 = arith.truncf %0 : vector<128x32xf32> to vector<128x32xbf16>
    %c0_1 = arith.constant 0 : index
    %c0_2 = arith.constant 0 : index
    %2 = vector.load %arg2[%c0_1, %c0_2] : memref<32x128xf32, #tpu.memory_space<vmem>>, vector<32x128xf32>
    %3 = arith.truncf %2 : vector<32x128xf32> to vector<32x128xbf16>
    %cst = arith.constant dense<0.000000e+00> : vector<128x128xf32>
    %4 = tpu.matmul %1, %3, %cst {dimension_numbers = #tpu.dot_dimension_numbers<[1], [0], [0], [1], [0, 0, 1, 1], [], []>} : vector<128x32xbf16>, vector<32x128xbf16>, vector<128x128xf32> -> vector<128x128xf32>
    %c0_3 = arith.constant 0 : index
    %c0_4 = arith.constant 0 : index
    %5 = vector.load %arg3[%c0_3, %c0_4] : memref<1x128xf32, #tpu.memory_space<vmem>>, vector<1x128xf32>
    %6 = vector.broadcast %5 : vector<1x128xf32> to vector<128x128xf32>
    %7 = arith.addf %4, %6 : vector<128x128xf32>
    %c0_5 = arith.constant 0 : index
    %c0_6 = arith.constant 0 : index
    %8 = vector.load %arg4[%c0_5, %c0_6] : memref<128x128xf32, #tpu.memory_space<vmem>>, vector<128x128xf32>
    tpu.vector_store %arg4[%c0_5, %c0_6], %7 {strides = array<i32>} : memref<128x128xf32, #tpu.memory_space<vmem>>, vector<128x128xf32>,
    return
  }
  func.func @transform_0(%arg0: i32) -> (i32, i32) {
    %c0_i32 = arith.constant 0 : i32
    %c0_i32_0 = arith.constant 0 : i32
    return %arg0, %c0_i32 : i32, i32
  }
  func.func @transform_1(%arg0: i32) -> (i32, i32) {
    %c0_i32 = arith.constant 0 : i32
    %c0_i32_0 = arith.constant 0 : i32
    %c0_i32_1 = arith.constant 0 : i32
    return %c0_i32, %c0_i32_0 : i32, i32
  }
  func.func @transform_2(%arg0: i32) -> (i32, i32) {
    %c0_i32 = arith.constant 0 : i32
    %c0_i32_0 = arith.constant 0 : i32
    %c0_i32_1 = arith.constant 0 : i32
    return %c0_i32, %c0_i32_0 : i32, i32
  }
  func.func @transform_3(%arg0: i32) -> (i32, i32) {
    %c0_i32 = arith.constant 0 : i32
    %c0_i32_0 = arith.constant 0 : i32
    return %arg0, %c0_i32 : i32, i32
  }
}

</mosaic_0001>

<bundles_post_ra>
// kernel: sam_gat_forward.5
= control target key start
LH: loop header
LB: loop body
LE: loop exit
PB: predicated region body
PF: predicated region fallthrough
CT: control target
= control target key end

     0   :  { %vm162_vm0 = vcmask 261120   ;;  %vm314_vm1 = vcmask 64512   ;;  %s694_s1 = inlined_call_operand.vmem [shape: f32[128,32], index: 1, kind: input, shape index: {}]   ;;  %s695_s0 = inlined_call_operand.vmem [shape: f32[128,128], index: 0, kind: input, shape index: {}]   ;;  %s696_s2 = inlined_call_operand.vmem [shape: f32[32,8], index: 2, kind: input, shape index: {}]   ;;  %s697_s3 = inlined_call_operand.vmem [shape: f32[128,32], index: 3, kind: output, shape index: {0}]   ;;  %s698_s4 = inlined_call_operand.vmem [shape: f32[128,8], index: 4, kind: output, shape index: {1}]  }
   0x1   :  { %v41_v0 = vld [vmem:[%s694_s1] sm:$0xff]  ;;  %v42_v1 = vld [vmem:[%s694_s1 + $0x8] sm:$0xff]  ;;  %v43_v2 = vld [vmem:[%s694_s1 + $0x10] sm:$0xff] }
   0x2   :  { %v57_v3 = vpack.c.bf16 %v42_v1, %v41_v0  ;;  %v44_v4 = vld [vmem:[%s694_s1 + $0x18] sm:$0xff]  ;;  %v45_v6 = vld [vmem:[%s694_s1 + $0x20] sm:$0xff]  ;;  %v46_v7 = vld [vmem:[%s694_s1 + $0x28] sm:$0xff] }
   0x3   :  { %v58_v5 = vpack.c.bf16 %v44_v4, %v43_v2  ;;  %v59_v8 = vpack.c.bf16 %v46_v7, %v45_v6  ;;  %v17_v9 = vld [vmem:[%s695_s0] sm:$0xff]  ;;  %v18_v10 = vld [vmem:[%s695_s0 + $0x8] sm:$0xff]  ;;  %v47_v11 = vld [vmem:[%s694_s1 + $0x30] sm:$0xff] }
   0x4   :  { %373 = vmatprep.subr.bf16.mxu0 %v57_v3  ;;  %v48_v12 = vld [vmem:[%s694_s1 + $0x38] sm:$0xff]  ;;  %v33_v13 = vpack.c.bf16 %v18_v10, %v17_v9  ;;  %v49_v15 = vld [vmem:[%s694_s1 + $0x40] sm:$0xff]  ;;  %v50_v16 = vld [vmem:[%s694_s1 + $0x48] sm:$0xff] }
   0x5   :  { %374 = vmatpush3.bf16.msra.mxu0 %v57_v3  ;;  %v60_v14 = vpack.c.bf16 %v48_v12, %v47_v11  ;;  %v187_v17 = vld [vmem:[%s696_s2] sm:$0xff]  ;;  %v188_v18 = vld [vmem:[%s696_s2 + $0x8] sm:$0xff]  ;;  %v61_v20 = vpack.c.bf16 %v50_v16, %v49_v15  ;;  %v51_v21 = vld [vmem:[%s694_s1 + $0x50] sm:$0xff] }
   0x6   :  { %375 = vmatprep.subr.bf16.mxu0 %v58_v5  ;;  %389 = vmatprep.mubr.bf16.mxu0 %v33_v13  ;;  %v191_v19 = vpack.c.bf16 %v188_v18, %v187_v17  ;;  %v52_v22 = vld [vmem:[%s694_s1 + $0x58] sm:$0xff]  ;;  %v53_v24 = vld [vmem:[%s694_s1 + $0x60] sm:$0xff]  ;;  %v54_v25 = vld [vmem:[%s694_s1 + $0x68] sm:$0xff] }
   0x7   :  { %v62_v23 = vpack.c.bf16 %v52_v22, %v51_v21  ;;  %v63_v26 = vpack.c.bf16 %v54_v25, %v53_v24  ;;  %v55_v27 = vld [vmem:[%s694_s1 + $0x70] sm:$0xff]  ;;  %v56_v28 = vld [vmem:[%s694_s1 + $0x78] sm:$0xff]  ;;  %v21_v32 = vld [vmem:[%s695_s0 + $0x20] sm:$0xff] }
   0x8   :  { %405 = vmatprep.subr.bf16.mxu1 %v191_v19  ;;  %v64_v29 = vpack.c.bf16 %v56_v28, %v55_v27  ;;  %v19_v30 = vld [vmem:[%s695_s0 + $0x10] sm:$0xff]  ;;  %v20_v31 = vld [vmem:[%s695_s0 + $0x18] sm:$0xff]  ;;  %v22_v33 = vld [vmem:[%s695_s0 + $0x28] sm:$0xff] }
   0x9   :  { %376 = vmatpush3.bf16.msra.mxu0 %v58_v5  ;;  %406 = vmatpush3.bf16.msra.mxu1 %v191_v19  ;;  %v34_v34 = vpack.c.bf16 %v20_v31, %v19_v30  ;;  %v35_v35 = vpack.c.bf16 %v22_v33, %v21_v32  ;;  %v23_v36 = vld [vmem:[%s695_s0 + $0x30] sm:$0xff]  ;;  %v24_v37 = vld [vmem:[%s695_s0 + $0x38] sm:$0xff]  ;;  %v25_v38 = vld [vmem:[%s695_s0 + $0x40] sm:$0xff] }
   0xa   :  { %377 = vmatprep.subr.bf16.mxu0 %v59_v8  ;;  %v26_v39 = vld [vmem:[%s695_s0 + $0x48] sm:$0xff]  ;;  %v36_v40 = vpack.c.bf16 %v24_v37, %v23_v36  ;;  %v27_v42 = vld [vmem:[%s695_s0 + $0x50] sm:$0xff]  ;;  %v28_v43 = vld [vmem:[%s695_s0 + $0x58] sm:$0xff] }
   0xb   :  { %v37_v41 = vpack.c.bf16 %v26_v39, %v25_v38  ;;  %v29_v44 = vld [vmem:[%s695_s0 + $0x60] sm:$0xff]  ;;  %v30_v45 = vld [vmem:[%s695_s0 + $0x68] sm:$0xff]  ;;  %v38_v46 = vpack.c.bf16 %v28_v43, %v27_v42  ;;  %v31_v48 = vld [vmem:[%s695_s0 + $0x70] sm:$0xff] }
   0xc   :  { %v39_v47 = vpack.c.bf16 %v30_v45, %v29_v44  ;;  %v32_v49 = vld [vmem:[%s695_s0 + $0x78] sm:$0xff]  ;;  %v189_v51 = vld [vmem:[%s696_s2 + $0x10] sm:$0xff] }
   0xd   :  { %378 = vmatpush3.bf16.msra.mxu0 %v59_v8  ;;  %v40_v50 = vpack.c.bf16 %v32_v49, %v31_v48  ;;  %v190_v52 = vld [vmem:[%s696_s2 + $0x18] sm:$0xff] }
   0xe   :  { %379 = vmatprep.subr.bf16.mxu0 %v60_v14  ;;  %v192_v53 = vpack.c.bf16 %v190_v52, %v189_v51 }
  0x10   :  { %407 = vmatprep.subr.bf16.mxu1 %v192_v53 }
  0x11   :  { %380 = vmatpush3.bf16.msra.mxu0 %v60_v14  ;;  %408 = vmatpush3.bf16.msra.mxu1 %v192_v53 }
  0x12   :  { %381 = vmatprep.subr.bf16.mxu0 %v61_v20 }
  0x15   :  { %382 = vmatpush3.bf16.msra.mxu0 %v61_v20 }
  0x16   :  { %383 = vmatprep.subr.bf16.mxu0 %v62_v23 }
  0x19   :  { %384 = vmatpush3.bf16.msra.mxu0 %v62_v23 }
  0x1a   :  { %385 = vmatprep.subr.bf16.mxu0 %v63_v26 }
  0x1d   :  { %386 = vmatpush3.bf16.msra.mxu0 %v63_v26 }
  0x1e   :  { %387 = vmatprep.subr.bf16.mxu0 %v64_v29 }
  0x21   :  { %388 = vmatpush3.bf16.msra.mxu0 %v64_v29 }
  0x24   :  { %390 = vmatmul.mubr.bf16.vlgmr.msra.gmra.mrb[0].mxu0 %v34_v34 }
  0x25   :  { %393 = vmatprep.mubr.bf16.mxu0 %v35_v35 }
  0x2c   :  { %394 = vmatmul.mubr.bf16.gmra.mrb[4].mxu0 %v36_v40 }
  0x2d   :  { %397 = vmatprep.mubr.bf16.mxu0 %v37_v41 }
  0x34   :  { %398 = vmatmul.mubr.bf16.gmra.mrb[8].mxu0 %v38_v46 }
  0x35   :  { %401 = vmatprep.mubr.bf16.mxu0 %v39_v47 }
  0x3c   :  { %402 = vmatmul.mubr.bf16.gmra.mrb[12].mxu0 %v40_v50 }
  0xf7   :  { %v391_v54 = vpop.f32.mrb[0].mxu0 }
  0xf8   :  { %165 = vst.msk [vmem:[%s697_s3 + $0x10] sm:$0xff] %vm162_vm0, %v391_v54  ;;  %v99_v55 = vpop.f32.mrb[1].mxu0 }
  0xf9   :  { %163 = vst.msk [vmem:[%s697_s3] sm:$0xff] %vm162_vm0, %v99_v55  ;;  %v392_v56 = vpop.f32.mrb[2].mxu0 }
  0xfa   :  { %166 = vst.msk [vmem:[%s697_s3 + $0x18] sm:$0xff] %vm162_vm0, %v392_v56  ;;  %v180_v57 = vpack.c.bf16 %v392_v56, %v391_v54  ;;  %v102_v58 = vpop.f32.mrb[3].mxu0 }
  0xfb   :  { %164 = vst.msk [vmem:[%s697_s3 + $0x8] sm:$0xff] %vm162_vm0, %v102_v58  ;;  %v179_v59 = vpack.c.bf16 %v102_v58, %v99_v55 }
  0xfd   :  { %409 = vmatprep.mubr.msk.bf16.mxu1 %vm162_vm0, %v179_v59 }
  0xfe   :  { %410 = vmatmul.mubr.msk.bf16.vlgmr.msra.gmra.mrb[0].mxu1 %vm162_vm0, %v180_v57 }
  0xff   :  { %v395_v60 = vpop.f32.mrb[4].mxu0 }
 0x100   :  { %169 = vst.msk [vmem:[%s697_s3 + $0x30] sm:$0xff] %vm162_vm0, %v395_v60  ;;  %v115_v61 = vpop.f32.mrb[5].mxu0 }
 0x101   :  { %167 = vst.msk [vmem:[%s697_s3 + $0x20] sm:$0xff] %vm162_vm0, %v115_v61  ;;  %v396_v62 = vpop.f32.mrb[6].mxu0 }
 0x102   :  { %170 = vst.msk [vmem:[%s697_s3 + $0x38] sm:$0xff] %vm162_vm0, %v396_v62  ;;  %v182_v63 = vpack.c.bf16 %v396_v62, %v395_v60  ;;  %v118_v0 = vpop.f32.mrb[7].mxu0 }
 0x103   :  { %168 = vst.msk [vmem:[%s697_s3 + $0x28] sm:$0xff] %vm162_vm0, %v118_v0  ;;  %v181_v1 = vpack.c.bf16 %v118_v0, %v115_v61 }
 0x105   :  { %413 = vmatprep.mubr.msk.bf16.mxu1 %vm162_vm0, %v181_v1 }
 0x106   :  { %414 = vmatmul.mubr.msk.bf16.gmra.mrb[4].mxu1 %vm162_vm0, %v182_v63 }
 0x107   :  { %v399_v2 = vpop.f32.mrb[8].mxu0 }
 0x108   :  { %173 = vst.msk [vmem:[%s697_s3 + $0x50] sm:$0xff] %vm162_vm0, %v399_v2  ;;  %v131_v3 = vpop.f32.mrb[9].mxu0 }
 0x109   :  { %171 = vst.msk [vmem:[%s697_s3 + $0x40] sm:$0xff] %vm162_vm0, %v131_v3  ;;  %v400_v4 = vpop.f32.mrb[10].mxu0 }
 0x10a   :  { %174 = vst.msk [vmem:[%s697_s3 + $0x58] sm:$0xff] %vm162_vm0, %v400_v4  ;;  %v184_v5 = vpack.c.bf16 %v400_v4, %v399_v2  ;;  %v134_v6 = vpop.f32.mrb[11].mxu0 }
 0x10b   :  { %172 = vst.msk [vmem:[%s697_s3 + $0x48] sm:$0xff] %vm162_vm0, %v134_v6  ;;  %v183_v7 = vpack.c.bf16 %v134_v6, %v131_v3 }
 0x10d   :  { %417 = vmatprep.mubr.msk.bf16.mxu1 %vm162_vm0, %v183_v7 }
 0x10e   :  { %418 = vmatmul.mubr.msk.bf16.gmra.mrb[8].mxu1 %vm162_vm0, %v184_v5 }
 0x10f   :  { %v403_v8 = vpop.f32.mrb[12].mxu0 }
 0x110   :  { %177 = vst.msk [vmem:[%s697_s3 + $0x70] sm:$0xff] %vm162_vm0, %v403_v8  ;;  %v147_v9 = vpop.f32.mrb[13].mxu0 }
 0x111   :  { %175 = vst.msk [vmem:[%s697_s3 + $0x60] sm:$0xff] %vm162_vm0, %v147_v9  ;;  %v404_v10 = vpop.f32.mrb[14].mxu0 }
 0x112   :  { %178 = vst.msk [vmem:[%s697_s3 + $0x78] sm:$0xff] %vm162_vm0, %v404_v10  ;;  %v186_v11 = vpack.c.bf16 %v404_v10, %v403_v8  ;;  %v150_v12 = vpop.f32.mrb[15].mxu0 }
 0x113   :  { %176 = vst.msk [vmem:[%s697_s3 + $0x68] sm:$0xff] %vm162_vm0, %v150_v12  ;;  %v185_v13 = vpack.c.bf16 %v150_v12, %v147_v9 }
 0x115   :  { %421 = vmatprep.mubr.msk.bf16.mxu1 %vm162_vm0, %v185_v13 }
 0x116   :  { %422 = vmatmul.mubr.msk.bf16.gmra.mrb[12].mxu1 %vm162_vm0, %v186_v11 }
 0x1d1   :  { %v411_v14 = vpop.f32.mrb[0].mxu1 }
 0x1d2   :  { %317 = vst.msk [vmem:[%s698_s4 + $0x10] sm:$0xff] %vm314_vm1, %v411_v14  ;;  %v251_v15 = vpop.f32.mrb[1].mxu1 }
 0x1d3   :  { %315 = vst.msk [vmem:[%s698_s4] sm:$0xff] %vm314_vm1, %v251_v15  ;;  %v412_v16 = vpop.f32.mrb[2].mxu1 }
 0x1d4   :  { %318 = vst.msk [vmem:[%s698_s4 + $0x18] sm:$0xff] %vm314_vm1, %v412_v16  ;;  %v254_v17 = vpop.f32.mrb[3].mxu1 }
 0x1d5   :  { %316 = vst.msk [vmem:[%s698_s4 + $0x8] sm:$0xff] %vm314_vm1, %v254_v17 }
 0x1d9   :  { %v415_v18 = vpop.f32.mrb[4].mxu1 }
 0x1da   :  { %321 = vst.msk [vmem:[%s698_s4 + $0x30] sm:$0xff] %vm314_vm1, %v415_v18  ;;  %v267_v19 = vpop.f32.mrb[5].mxu1 }
 0x1db   :  { %319 = vst.msk [vmem:[%s698_s4 + $0x20] sm:$0xff] %vm314_vm1, %v267_v19  ;;  %v416_v20 = vpop.f32.mrb[6].mxu1 }
 0x1dc   :  { %322 = vst.msk [vmem:[%s698_s4 + $0x38] sm:$0xff] %vm314_vm1, %v416_v20  ;;  %v270_v21 = vpop.f32.mrb[7].mxu1 }
 0x1dd   :  { %320 = vst.msk [vmem:[%s698_s4 + $0x28] sm:$0xff] %vm314_vm1, %v270_v21 }
 0x1e1   :  { %v419_v22 = vpop.f32.mrb[8].mxu1 }
 0x1e2   :  { %325 = vst.msk [vmem:[%s698_s4 + $0x50] sm:$0xff] %vm314_vm1, %v419_v22  ;;  %v283_v23 = vpop.f32.mrb[9].mxu1 }
 0x1e3   :  { %323 = vst.msk [vmem:[%s698_s4 + $0x40] sm:$0xff] %vm314_vm1, %v283_v23  ;;  %v420_v24 = vpop.f32.mrb[10].mxu1 }
 0x1e4   :  { %326 = vst.msk [vmem:[%s698_s4 + $0x58] sm:$0xff] %vm314_vm1, %v420_v24  ;;  %v286_v25 = vpop.f32.mrb[11].mxu1 }
 0x1e5   :  { %324 = vst.msk [vmem:[%s698_s4 + $0x48] sm:$0xff] %vm314_vm1, %v286_v25 }
 0x1e9   :  { %v423_v26 = vpop.f32.mrb[12].mxu1 }
 0x1ea   :  { %329 = vst.msk [vmem:[%s698_s4 + $0x70] sm:$0xff] %vm314_vm1, %v423_v26  ;;  %v299_v27 = vpop.f32.mrb[13].mxu1 }
 0x1eb   :  { %327 = vst.msk [vmem:[%s698_s4 + $0x60] sm:$0xff] %vm314_vm1, %v299_v27  ;;  %v424_v28 = vpop.f32.mrb[14].mxu1 }
 0x1ec   :  { %330 = vst.msk [vmem:[%s698_s4 + $0x78] sm:$0xff] %vm314_vm1, %v424_v28  ;;  %v302_v29 = vpop.f32.mrb[15].mxu1 }
 0x1ed   :  { %328 = vst.msk [vmem:[%s698_s4 + $0x68] sm:$0xff] %vm314_vm1, %v302_v29 }

// kernel: sam_gat_forward.7
= control target key start
LH: loop header
LB: loop body
LE: loop exit
PB: predicated region body
PF: predicated region fallthrough
CT: control target
= control target key end

     0   :  { %vm47_vm0 = vcmask 261120   ;;  %vm320_vm1 = vcmask 64512   ;;  %s662_s1 = inlined_call_operand.vmem [shape: f32[32,32], index: 1, kind: input, shape index: {}]   ;;  %s663_s0 = inlined_call_operand.vmem [shape: f32[128,32], index: 0, kind: input, shape index: {}]   ;;  %s664_s2 = inlined_call_operand.vmem [shape: f32[32,8], index: 2, kind: input, shape index: {}]   ;;  %s665_s3 = inlined_call_operand.vmem [shape: f32[128,32], index: 3, kind: output, shape index: {0}]   ;;  %s666_s4 = inlined_call_operand.vmem [shape: f32[128,8], index: 4, kind: output, shape index: {1}]  }
   0x1   :  { %v41_v0 = vld [vmem:[%s662_s1] sm:$0xff]  ;;  %v42_v1 = vld [vmem:[%s662_s1 + $0x8] sm:$0xff]  ;;  %v43_v2 = vld [vmem:[%s662_s1 + $0x10] sm:$0xff] }
   0x2   :  { %v45_v3 = vpack.c.bf16 %v42_v1, %v41_v0  ;;  %v44_v4 = vld [vmem:[%s662_s1 + $0x18] sm:$0xff]  ;;  %v17_v5 = vld [vmem:[%s663_s0] sm:$0xff]  ;;  %v18_v6 = vld [vmem:[%s663_s0 + $0x8] sm:$0xff] }
   0x3   :  { %v46_v7 = vpack.c.bf16 %v44_v4, %v43_v2  ;;  %v33_v8 = vpack.c.bf16 %v18_v6, %v17_v5  ;;  %v19_v9 = vld [vmem:[%s663_s0 + $0x10] sm:$0xff]  ;;  %v20_v10 = vld [vmem:[%s663_s0 + $0x18] sm:$0xff]  ;;  %v21_v11 = vld [vmem:[%s663_s0 + $0x20] sm:$0xff] }
   0x4   :  { %381 = vmatprep.subr.bf16.mxu0 %v45_v3  ;;  %v22_v12 = vld [vmem:[%s663_s0 + $0x28] sm:$0xff]  ;;  %v193_v13 = vld [vmem:[%s664_s2] sm:$0xff]  ;;  %v34_v14 = vpack.c.bf16 %v20_v10, %v19_v9  ;;  %v23_v18 = vld [vmem:[%s663_s0 + $0x30] sm:$0xff] }
   0x5   :  { %382 = vmatpush3.bf16.msra.mxu0 %v45_v3  ;;  %385 = vmatprep.mubr.msk.bf16.mxu0 %vm47_vm0, %v33_v8  ;;  %v194_v15 = vld [vmem:[%s664_s2 + $0x8] sm:$0xff]  ;;  %v35_v16 = vpack.c.bf16 %v22_v12, %v21_v11  ;;  %v24_v19 = vld [vmem:[%s663_s0 + $0x38] sm:$0xff]  ;;  %v25_v20 = vld [vmem:[%s663_s0 + $0x40] sm:$0xff] }
   0x6   :  { %383 = vmatprep.subr.bf16.mxu0 %v46_v7  ;;  %v197_v17 = vpack.c.bf16 %v194_v15, %v193_v13  ;;  %v26_v21 = vld [vmem:[%s663_s0 + $0x48] sm:$0xff]  ;;  %v36_v22 = vpack.c.bf16 %v24_v19, %v23_v18  ;;  %v27_v24 = vld [vmem:[%s663_s0 + $0x50] sm:$0xff]  ;;  %v28_v25 = vld [vmem:[%s663_s0 + $0x58] sm:$0xff] }
   0x7   :  { %v37_v23 = vpack.c.bf16 %v26_v21, %v25_v20  ;;  %v29_v26 = vld [vmem:[%s663_s0 + $0x60] sm:$0xff]  ;;  %v30_v27 = vld [vmem:[%s663_s0 + $0x68] sm:$0xff]  ;;  %v38_v28 = vpack.c.bf16 %v28_v25, %v27_v24  ;;  %v31_v30 = vld [vmem:[%s663_s0 + $0x70] sm:$0xff] }
   0x8   :  { %401 = vmatprep.subr.bf16.mxu1 %v197_v17  ;;  %v39_v29 = vpack.c.bf16 %v30_v27, %v29_v26  ;;  %v32_v31 = vld [vmem:[%s663_s0 + $0x78] sm:$0xff]  ;;  %v195_v33 = vld [vmem:[%s664_s2 + $0x10] sm:$0xff] }
   0x9   :  { %384 = vmatpush3.bf16.msra.mxu0 %v46_v7  ;;  %402 = vmatpush3.bf16.msra.mxu1 %v197_v17  ;;  %v40_v32 = vpack.c.bf16 %v32_v31, %v31_v30  ;;  %v196_v34 = vld [vmem:[%s664_s2 + $0x18] sm:$0xff] }
   0xa   :  { %v198_v35 = vpack.c.bf16 %v196_v34, %v195_v33 }
   0xc   :  { %386 = vmatmul.mubr.msk.bf16.vlgmr.msra.gmra.mrb[0].mxu0 %vm47_vm0, %v34_v14  ;;  %403 = vmatprep.subr.bf16.mxu1 %v198_v35 }
   0xd   :  { %389 = vmatprep.mubr.msk.bf16.mxu0 %vm47_vm0, %v35_v16  ;;  %404 = vmatpush3.bf16.msra.mxu1 %v198_v35 }
  0x14   :  { %390 = vmatmul.mubr.msk.bf16.gmra.mrb[4].mxu0 %vm47_vm0, %v36_v22 }
  0x15   :  { %393 = vmatprep.mubr.msk.bf16.mxu0 %vm47_vm0, %v37_v23 }
  0x1c   :  { %394 = vmatmul.mubr.msk.bf16.gmra.mrb[8].mxu0 %vm47_vm0, %v38_v28 }
  0x1d   :  { %397 = vmatprep.mubr.msk.bf16.mxu0 %vm47_vm0, %v39_v29 }
  0x24   :  { %398 = vmatmul.mubr.msk.bf16.gmra.mrb[12].mxu0 %vm47_vm0, %v40_v32 }
  0xdf   :  { %v387_v36 = vpop.f32.mrb[0].mxu0 }
  0xe0   :  { %171 = vst.msk [vmem:[%s665_s3 + $0x10] sm:$0xff] %vm47_vm0, %v387_v36  ;;  %v106_v37 = vpop.f32.mrb[1].mxu0 }
  0xe1   :  { %169 = vst.msk [vmem:[%s665_s3] sm:$0xff] %vm47_vm0, %v106_v37  ;;  %v388_v38 = vpop.f32.mrb[2].mxu0 }
  0xe2   :  { %172 = vst.msk [vmem:[%s665_s3 + $0x18] sm:$0xff] %vm47_vm0, %v388_v38  ;;  %v186_v39 = vpack.c.bf16 %v388_v38, %v387_v36  ;;  %v109_v40 = vpop.f32.mrb[3].mxu0 }
  0xe3   :  { %170 = vst.msk [vmem:[%s665_s3 + $0x8] sm:$0xff] %vm47_vm0, %v109_v40  ;;  %v185_v41 = vpack.c.bf16 %v109_v40, %v106_v37 }
  0xe5   :  { %405 = vmatprep.mubr.msk.bf16.mxu1 %vm47_vm0, %v185_v41 }
  0xe6   :  { %406 = vmatmul.mubr.msk.bf16.vlgmr.msra.gmra.mrb[0].mxu1 %vm47_vm0, %v186_v39 }
  0xe7   :  { %v391_v42 = vpop.f32.mrb[4].mxu0 }
  0xe8   :  { %175 = vst.msk [vmem:[%s665_s3 + $0x30] sm:$0xff] %vm47_vm0, %v391_v42  ;;  %v122_v43 = vpop.f32.mrb[5].mxu0 }
  0xe9   :  { %173 = vst.msk [vmem:[%s665_s3 + $0x20] sm:$0xff] %vm47_vm0, %v122_v43  ;;  %v392_v44 = vpop.f32.mrb[6].mxu0 }
  0xea   :  { %176 = vst.msk [vmem:[%s665_s3 + $0x38] sm:$0xff] %vm47_vm0, %v392_v44  ;;  %v188_v45 = vpack.c.bf16 %v392_v44, %v391_v42  ;;  %v125_v46 = vpop.f32.mrb[7].mxu0 }
  0xeb   :  { %174 = vst.msk [vmem:[%s665_s3 + $0x28] sm:$0xff] %vm47_vm0, %v125_v46  ;;  %v187_v47 = vpack.c.bf16 %v125_v46, %v122_v43 }
  0xed   :  { %409 = vmatprep.mubr.msk.bf16.mxu1 %vm47_vm0, %v187_v47 }
  0xee   :  { %410 = vmatmul.mubr.msk.bf16.gmra.mrb[4].mxu1 %vm47_vm0, %v188_v45 }
  0xef   :  { %v395_v48 = vpop.f32.mrb[8].mxu0 }
  0xf0   :  { %179 = vst.msk [vmem:[%s665_s3 + $0x50] sm:$0xff] %vm47_vm0, %v395_v48  ;;  %v138_v49 = vpop.f32.mrb[9].mxu0 }
  0xf1   :  { %177 = vst.msk [vmem:[%s665_s3 + $0x40] sm:$0xff] %vm47_vm0, %v138_v49  ;;  %v396_v50 = vpop.f32.mrb[10].mxu0 }
  0xf2   :  { %180 = vst.msk [vmem:[%s665_s3 + $0x58] sm:$0xff] %vm47_vm0, %v396_v50  ;;  %v190_v51 = vpack.c.bf16 %v396_v50, %v395_v48  ;;  %v141_v52 = vpop.f32.mrb[11].mxu0 }
  0xf3   :  { %178 = vst.msk [vmem:[%s665_s3 + $0x48] sm:$0xff] %vm47_vm0, %v141_v52  ;;  %v189_v53 = vpack.c.bf16 %v141_v52, %v138_v49 }
  0xf5   :  { %413 = vmatprep.mubr.msk.bf16.mxu1 %vm47_vm0, %v189_v53 }
  0xf6   :  { %414 = vmatmul.mubr.msk.bf16.gmra.mrb[8].mxu1 %vm47_vm0, %v190_v51 }
  0xf7   :  { %v399_v54 = vpop.f32.mrb[12].mxu0 }
  0xf8   :  { %183 = vst.msk [vmem:[%s665_s3 + $0x70] sm:$0xff] %vm47_vm0, %v399_v54  ;;  %v154_v55 = vpop.f32.mrb[13].mxu0 }
  0xf9   :  { %181 = vst.msk [vmem:[%s665_s3 + $0x60] sm:$0xff] %vm47_vm0, %v154_v55  ;;  %v400_v56 = vpop.f32.mrb[14].mxu0 }
  0xfa   :  { %184 = vst.msk [vmem:[%s665_s3 + $0x78] sm:$0xff] %vm47_vm0, %v400_v56  ;;  %v192_v57 = vpack.c.bf16 %v400_v56, %v399_v54  ;;  %v157_v58 = vpop.f32.mrb[15].mxu0 }
  0xfb   :  { %182 = vst.msk [vmem:[%s665_s3 + $0x68] sm:$0xff] %vm47_vm0, %v157_v58  ;;  %v191_v59 = vpack.c.bf16 %v157_v58, %v154_v55 }
  0xfd   :  { %417 = vmatprep.mubr.msk.bf16.mxu1 %vm47_vm0, %v191_v59 }
  0xfe   :  { %418 = vmatmul.mubr.msk.bf16.gmra.mrb[12].mxu1 %vm47_vm0, %v192_v57 }
 0x1b9   :  { %v407_v60 = vpop.f32.mrb[0].mxu1 }
 0x1ba   :  { %323 = vst.msk [vmem:[%s666_s4 + $0x10] sm:$0xff] %vm320_vm1, %v407_v60  ;;  %v257_v61 = vpop.f32.mrb[1].mxu1 }
 0x1bb   :  { %321 = vst.msk [vmem:[%s666_s4] sm:$0xff] %vm320_vm1, %v257_v61  ;;  %v408_v62 = vpop.f32.mrb[2].mxu1 }
 0x1bc   :  { %324 = vst.msk [vmem:[%s666_s4 + $0x18] sm:$0xff] %vm320_vm1, %v408_v62  ;;  %v260_v63 = vpop.f32.mrb[3].mxu1 }
 0x1bd   :  { %322 = vst.msk [vmem:[%s666_s4 + $0x8] sm:$0xff] %vm320_vm1, %v260_v63 }
 0x1c1   :  { %v411_v0 = vpop.f32.mrb[4].mxu1 }
 0x1c2   :  { %327 = vst.msk [vmem:[%s666_s4 + $0x30] sm:$0xff] %vm320_vm1, %v411_v0  ;;  %v273_v1 = vpop.f32.mrb[5].mxu1 }
 0x1c3   :  { %325 = vst.msk [vmem:[%s666_s4 + $0x20] sm:$0xff] %vm320_vm1, %v273_v1  ;;  %v412_v2 = vpop.f32.mrb[6].mxu1 }
 0x1c4   :  { %328 = vst.msk [vmem:[%s666_s4 + $0x38] sm:$0xff] %vm320_vm1, %v412_v2  ;;  %v276_v3 = vpop.f32.mrb[7].mxu1 }
 0x1c5   :  { %326 = vst.msk [vmem:[%s666_s4 + $0x28] sm:$0xff] %vm320_vm1, %v276_v3 }
 0x1c9   :  { %v415_v4 = vpop.f32.mrb[8].mxu1 }
 0x1ca   :  { %331 = vst.msk [vmem:[%s666_s4 + $0x50] sm:$0xff] %vm320_vm1, %v415_v4  ;;  %v289_v5 = vpop.f32.mrb[9].mxu1 }
 0x1cb   :  { %329 = vst.msk [vmem:[%s666_s4 + $0x40] sm:$0xff] %vm320_vm1, %v289_v5  ;;  %v416_v6 = vpop.f32.mrb[10].mxu1 }
 0x1cc   :  { %332 = vst.msk [vmem:[%s666_s4 + $0x58] sm:$0xff] %vm320_vm1, %v416_v6  ;;  %v292_v7 = vpop.f32.mrb[11].mxu1 }
 0x1cd   :  { %330 = vst.msk [vmem:[%s666_s4 + $0x48] sm:$0xff] %vm320_vm1, %v292_v7 }
 0x1d1   :  { %v419_v8 = vpop.f32.mrb[12].mxu1 }
 0x1d2   :  { %335 = vst.msk [vmem:[%s666_s4 + $0x70] sm:$0xff] %vm320_vm1, %v419_v8  ;;  %v305_v9 = vpop.f32.mrb[13].mxu1 }
 0x1d3   :  { %333 = vst.msk [vmem:[%s666_s4 + $0x60] sm:$0xff] %vm320_vm1, %v305_v9  ;;  %v420_v10 = vpop.f32.mrb[14].mxu1 }
 0x1d4   :  { %336 = vst.msk [vmem:[%s666_s4 + $0x78] sm:$0xff] %vm320_vm1, %v420_v10  ;;  %v308_v11 = vpop.f32.mrb[15].mxu1 }
 0x1d5   :  { %334 = vst.msk [vmem:[%s666_s4 + $0x68] sm:$0xff] %vm320_vm1, %v308_v11 }

// kernel: sam_gat_forward.9
= control target key start
LH: loop header
LB: loop body
LE: loop exit
PB: predicated region body
PF: predicated region fallthrough
CT: control target
= control target key end

     0   :  { %vm52_vm0 = vcmask 261120   ;;  %s376_s1 = inlined_call_operand.vmem [shape: f32[32,128], index: 1, kind: input, shape index: {}]   ;;  %s377_s0 = inlined_call_operand.vmem [shape: f32[128,32], index: 0, kind: input, shape index: {}]   ;;  %s378_s2 = inlined_call_operand.vmem [shape: f32[1,128], index: 2, kind: input, shape index: {}]   ;;  %s379_s3 = inlined_call_operand.vmem [shape: f32[128,128], index: 3, kind: output, shape index: {}]  }
   0x1   :  { %v39_v0 = vld [vmem:[%s376_s1] sm:$0xff]  ;;  %v40_v1 = vld [vmem:[%s376_s1 + $0x8] sm:$0xff]  ;;  %v41_v2 = vld [vmem:[%s376_s1 + $0x10] sm:$0xff] }
   0x2   :  { %v43_v3 = vpack.c.bf16 %v40_v1, %v39_v0  ;;  %v42_v4 = vld [vmem:[%s376_s1 + $0x18] sm:$0xff]  ;;  %v15_v5 = vld [vmem:[%s377_s0] sm:$0xff]  ;;  %v16_v6 = vld [vmem:[%s377_s0 + $0x8] sm:$0xff] }
   0x3   :  { %v44_v7 = vpack.c.bf16 %v42_v4, %v41_v2  ;;  %v31_v8 = vpack.c.bf16 %v16_v6, %v15_v5  ;;  %v23_v9 = vld [vmem:[%s377_s0 + $0x40] sm:$0xff]  ;;  %v24_v10 = vld [vmem:[%s377_s0 + $0x48] sm:$0xff]  ;;  %v17_v12 = vld [vmem:[%s377_s0 + $0x10] sm:$0xff] }
   0x4   :  { %213 = vmatprep.subr.bf16.mxu0 %v43_v3  ;;  %233 = vmatprep.subr.bf16.mxu1 %v43_v3  ;;  %v35_v11 = vpack.c.bf16 %v24_v10, %v23_v9  ;;  %v18_v13 = vld [vmem:[%s377_s0 + $0x18] sm:$0xff]  ;;  %v25_v14 = vld [vmem:[%s377_s0 + $0x50] sm:$0xff]  ;;  %v19_v16 = vld [vmem:[%s377_s0 + $0x20] sm:$0xff] }
   0x5   :  { %214 = vmatpush3.bf16.msra.mxu0 %v43_v3  ;;  %235 = vmatpush3.bf16.msra.mxu1 %v43_v3  ;;  %v26_v15 = vld [vmem:[%s377_s0 + $0x58] sm:$0xff]  ;;  %v20_v17 = vld [vmem:[%s377_s0 + $0x28] sm:$0xff]  ;;  %v27_v18 = vld [vmem:[%s377_s0 + $0x60] sm:$0xff]  ;;  %v32_v20 = vpack.c.bf16 %v18_v13, %v17_v12 }
   0x6   :  { %215 = vmatprep.subr.bf16.mxu0 %v44_v7  ;;  %234 = vmatprep.subr.bf16.mxu1 %v44_v7  ;;  %v28_v19 = vld [vmem:[%s377_s0 + $0x68] sm:$0xff]  ;;  %v36_v21 = vpack.c.bf16 %v26_v15, %v25_v14  ;;  %v33_v22 = vpack.c.bf16 %v20_v17, %v19_v16  ;;  %v21_v24 = vld [vmem:[%s377_s0 + $0x30] sm:$0xff]  ;;  %v22_v25 = vld [vmem:[%s377_s0 + $0x38] sm:$0xff] }
   0x7   :  { %217 = vmatprep.mubr.msk.bf16.mxu0 %vm52_vm0, %v31_v8  ;;  %225 = vmatprep.mubr.msk.bf16.mxu1 %vm52_vm0, %v35_v11  ;;  %v37_v23 = vpack.c.bf16 %v28_v19, %v27_v18  ;;  %v29_v26 = vld [vmem:[%s377_s0 + $0x70] sm:$0xff]  ;;  %v30_v27 = vld [vmem:[%s377_s0 + $0x78] sm:$0xff]  ;;  %v34_v28 = vpack.c.bf16 %v22_v25, %v21_v24  ;;  %v194_v30 = vld [vmem:[%s378_s2] ss:$0 sm:$0xff] }
   0x8   :  { %v38_v29 = vpack.c.bf16 %v30_v27, %v29_v26 }
   0x9   :  { %216 = vmatpush3.bf16.msra.mxu0 %v44_v7  ;;  %236 = vmatpush3.bf16.msra.mxu1 %v44_v7 }
   0xc   :  { %218 = vmatmul.mubr.msk.bf16.vlgmr.msra.gmra.mrb[0].mxu0 %vm52_vm0, %v32_v20  ;;  %226 = vmatmul.mubr.msk.bf16.vlgmr.msra.gmra.mrb[0].mxu1 %vm52_vm0, %v36_v21 }
   0xd   :  { %221 = vmatprep.mubr.msk.bf16.mxu0 %vm52_vm0, %v33_v22  ;;  %229 = vmatprep.mubr.msk.bf16.mxu1 %vm52_vm0, %v37_v23 }
  0x14   :  { %222 = vmatmul.mubr.msk.bf16.gmra.mrb[4].mxu0 %vm52_vm0, %v34_v28  ;;  %230 = vmatmul.mubr.msk.bf16.gmra.mrb[4].mxu1 %vm52_vm0, %v38_v29 }
  0xdf   :  { %v219_v31 = vpop.f32.mrb[0].mxu0  ;;  %v227_v32 = vpop.f32.mrb[0].mxu1 }
  0xe0   :  { %v120_v33 = vadd.f32 %v219_v31, %v194_v30  ;;  %v152_v34 = vadd.f32 %v227_v32, %v194_v30  ;;  %v111_v35 = vpop.f32.mrb[1].mxu0  ;;  %v143_v36 = vpop.f32.mrb[1].mxu1 }
  0xe1   :  { %v112_v37 = vadd.f32 %v194_v30, %v111_v35  ;;  %v144_v38 = vadd.f32 %v194_v30, %v143_v36  ;;  %v220_v39 = vpop.f32.mrb[2].mxu0  ;;  %v228_v40 = vpop.f32.mrb[2].mxu1 }
  0xe2   :  { %176 = vst [vmem:[%s379_s3 + $0x10] sm:$0xff] %v120_v33  ;;  %184 = vst [vmem:[%s379_s3 + $0x50] sm:$0xff] %v152_v34  ;;  %v123_v41 = vadd.f32 %v220_v39, %v194_v30  ;;  %v155_v42 = vadd.f32 %v228_v40, %v194_v30  ;;  %v114_v43 = vpop.f32.mrb[3].mxu0  ;;  %v146_v44 = vpop.f32.mrb[3].mxu1 }
  0xe3   :  { %174 = vst [vmem:[%s379_s3] sm:$0xff] %v112_v37  ;;  %182 = vst [vmem:[%s379_s3 + $0x40] sm:$0xff] %v144_v38  ;;  %v115_v45 = vadd.f32 %v194_v30, %v114_v43  ;;  %v147_v46 = vadd.f32 %v194_v30, %v146_v44 }
  0xe4   :  { %177 = vst [vmem:[%s379_s3 + $0x18] sm:$0xff] %v123_v41  ;;  %185 = vst [vmem:[%s379_s3 + $0x58] sm:$0xff] %v155_v42 }
  0xe5   :  { %175 = vst [vmem:[%s379_s3 + $0x8] sm:$0xff] %v115_v45  ;;  %183 = vst [vmem:[%s379_s3 + $0x48] sm:$0xff] %v147_v46 }
  0xe7   :  { %v223_v47 = vpop.f32.mrb[4].mxu0  ;;  %v231_v48 = vpop.f32.mrb[4].mxu1 }
  0xe8   :  { %v136_v49 = vadd.f32 %v223_v47, %v194_v30  ;;  %v168_v50 = vadd.f32 %v231_v48, %v194_v30  ;;  %v127_v51 = vpop.f32.mrb[5].mxu0  ;;  %v159_v52 = vpop.f32.mrb[5].mxu1 }
  0xe9   :  { %v128_v53 = vadd.f32 %v194_v30, %v127_v51  ;;  %v160_v54 = vadd.f32 %v194_v30, %v159_v52  ;;  %v224_v55 = vpop.f32.mrb[6].mxu0  ;;  %v232_v56 = vpop.f32.mrb[6].mxu1 }
  0xea   :  { %180 = vst [vmem:[%s379_s3 + $0x30] sm:$0xff] %v136_v49  ;;  %188 = vst [vmem:[%s379_s3 + $0x70] sm:$0xff] %v168_v50  ;;  %v139_v57 = vadd.f32 %v224_v55, %v194_v30  ;;  %v171_v58 = vadd.f32 %v232_v56, %v194_v30  ;;  %v130_v59 = vpop.f32.mrb[7].mxu0  ;;  %v162_v60 = vpop.f32.mrb[7].mxu1 }
  0xeb   :  { %178 = vst [vmem:[%s379_s3 + $0x20] sm:$0xff] %v128_v53  ;;  %186 = vst [vmem:[%s379_s3 + $0x60] sm:$0xff] %v160_v54  ;;  %v131_v61 = vadd.f32 %v194_v30, %v130_v59  ;;  %v163_v62 = vadd.f32 %v194_v30, %v162_v60 }
  0xec   :  { %181 = vst [vmem:[%s379_s3 + $0x38] sm:$0xff] %v139_v57  ;;  %189 = vst [vmem:[%s379_s3 + $0x78] sm:$0xff] %v171_v58 }
  0xed   :  { %179 = vst [vmem:[%s379_s3 + $0x28] sm:$0xff] %v131_v61  ;;  %187 = vst [vmem:[%s379_s3 + $0x68] sm:$0xff] %v163_v62 }

// kernel: sam_gat_forward.6
= control target key start
LH: loop header
LB: loop body
LE: loop exit
PB: predicated region body
PF: predicated region fallthrough
CT: control target
= control target key end

     0   :  { %v2664_v0 = vmov 4   ;;  %v3789_v17 = vmov 5   ;;  %v3791_v18 = vmov 6   ;;  %v186_v19 = vlaneseq  ;;  %s3783_s1 = inlined_call_operand.vmem [shape: f32[128,8], index: 1, kind: input, shape index: {}]   ;;  %s3784_s0 = inlined_call_operand.vmem [shape: s8[128,128], index: 0, kind: input, shape index: {}]   ;;  %s3785_s2 = inlined_call_operand.vmem [shape: f32[8,128], index: 2, kind: input, shape index: {}]   ;;  %s3786_s3 = inlined_call_operand.vmem [shape: bf16[4,128,32], index: 3, kind: input, shape index: {}]   ;;  %s3787_s4 = inlined_call_operand.vmem [shape: f32[1,32], index: 4, kind: input, shape index: {}]   ;;  %s3788_s5 = inlined_call_operand.vmem [shape: f32[128,32], index: 5, kind: output, shape index: {}]  }
   0x1   :  { %2355 = vset.pattern.permute.xlu1 %v2664_v0  ;;  %2354 = vset.pattern.permute.xlu0 %v2664_v0  ;;  %v2701_v1 = vld [vmem:[%s3783_s1 + $0x10] sm:$0xff]  ;;  %v2706_v2 = vld [vmem:[%s3783_s1] sm:$0xff]  ;;  %v2713_v3 = vld [vmem:[%s3783_s1 + $0x18] sm:$0xff]  ;;  %vm1992_vm0 = vcmask 261120  }
   0x2   :  { %118 = vperm.xlu1 %2355, %v2701_v1   ;;  %108 = vperm.xlu0 %2354, %v2706_v2   ;;  %v2718_v4 = vld [vmem:[%s3783_s1 + $0x8] sm:$0xff]  ;;  %v2730_v6 = vld [vmem:[%s3783_s1 + $0x20] sm:$0xff]  ;;  %v2737_v7 = vld [vmem:[%s3783_s1 + $0x38] sm:$0xff]  ;;  %v2822_v21 = vshrl.u32 %v186_v19, 7 }
   0x3   :  { %v2725_v5 = vld [vmem:[%s3783_s1 + $0x28] sm:$0xff]  ;;  %v2742_v8 = vld [vmem:[%s3783_s1 + $0x30] sm:$0xff]  ;;  %v2754_v10 = vld [vmem:[%s3783_s1 + $0x40] sm:$0xff] }
   0x4   :  { %v2749_v9 = vld [vmem:[%s3783_s1 + $0x48] sm:$0xff]  ;;  %v2761_v11 = vld [vmem:[%s3783_s1 + $0x58] sm:$0xff]  ;;  %v2766_v12 = vld [vmem:[%s3783_s1 + $0x50] sm:$0xff]  ;;  %v188_v24 = vsub.s32 0, %v2822_v21 }
   0x5   :  { %v2773_v13 = vld [vmem:[%s3783_s1 + $0x68] sm:$0xff]  ;;  %v2778_v14 = vld [vmem:[%s3783_s1 + $0x60] sm:$0xff]  ;;  %v2785_v15 = vld [vmem:[%s3783_s1 + $0x78] sm:$0xff] }
   0x6   :  { %123 = vperm.xlu1 %2355, %v2713_v3   ;;  %113 = vperm.xlu0 %2354, %v2718_v4   ;;  %v2790_v16 = vld [vmem:[%s3783_s1 + $0x70] sm:$0xff]  ;;  %v21_v20 = vld [vmem:[%s3784_s0] sm:$0xff]  ;;  %v22_v23 = vld [vmem:[%s3784_s0 + $0x8] sm:$0xff] }
   0x7   :  { %v25_v22 = vunpack.c.0.s8 %v21_v20  ;;  %v26_v25 = vunpack.c.1.s8 %v21_v20  ;;  %v2831_v26 = vld [vmem:[%s3785_s2] sm:$0xff]  ;;  %v27_v27 = vunpack.c.2.s8 %v21_v20  ;;  %v29_v28 = vunpack.c.0.s8 %v22_v23  ;;  %v23_v44 = vld [vmem:[%s3784_s0 + $0x10] sm:$0xff] }
   0x8   :  { %v28_v30 = vunpack.c.3.s8 %v21_v20  ;;  %v30_v31 = vunpack.c.1.s8 %v22_v23  ;;  %v2834_v32 = vrot.slane %v2831_v26, %v188_v24  ;;  %v31_v47 = vunpack.c.2.s8 %v22_v23 }
   0x9   :  { %v41_v29 = vcvt.s32.f32 %v25_v22  ;;  %v42_v33 = vcvt.s32.f32 %v26_v25  ;;  %v43_v34 = vcvt.s32.f32 %v27_v27  ;;  %v45_v35 = vcvt.s32.f32 %v29_v28 }
   0xa   :  { %133 = vperm.xlu1 %2355, %v2725_v5   ;;  %128 = vperm.xlu0 %2354, %v2730_v6   ;;  %v44_v39 = vcvt.s32.f32 %v28_v30  ;;  %v46_v40 = vcvt.s32.f32 %v30_v31  ;;  %v32_v48 = vunpack.c.3.s8 %v22_v23  ;;  %v34_v56 = vunpack.c.1.s8 %v23_v44 }
   0xb   :  { %v2013_v36 = vadd.f32 -1.0, %v41_v29  ;;  %v2014_v43 = vadd.f32 -1.0, %v42_v33  ;;  %v2015_v45 = vadd.f32 -1.0, %v43_v34  ;;  %v2017_v46 = vadd.f32 -1.0, %v45_v35 }
   0xc   :  { %v2016_v54 = vadd.f32 -1.0, %v44_v39  ;;  %v2018_v55 = vadd.f32 -1.0, %v46_v40  ;;  %v47_v63 = vcvt.s32.f32 %v31_v47  ;;  %v48_v0 = vcvt.s32.f32 %v32_v48  ;;  %v24_v40 = vld [vmem:[%s3784_s0 + $0x18] sm:$0xff] }
   0xd   :  { %v2841_v51 = vmul.f32 1e+09, %v2013_v36  ;;  %v2845_v60 = vmul.f32 1e+09, %v2014_v43  ;;  %v2847_v61 = vmul.f32 1e+09, %v2015_v45  ;;  %v33_v27 = vunpack.c.0.s8 %v23_v44 }
   0xe   :  { %143 = vperm.xlu1 %2355, %v2737_v7   ;;  %138 = vperm.xlu0 %2354, %v2742_v8   ;;  %v2852_v23 = vmul.f32 1e+09, %v2017_v46  ;;  %v50_v28 = vcvt.s32.f32 %v34_v56  ;;  %v35_v29 = vunpack.c.2.s8 %v23_v44  ;;  %v36_v30 = vunpack.c.3.s8 %v23_v44 }
   0xf   :  { %v2857_v35 = vmul.f32 1e+09, %v2016_v54  ;;  %v2020_v39 = vadd.f32 -1.0, %v48_v0  ;;  %v49_v47 = vcvt.s32.f32 %v33_v27 }
  0x10   :  { %v2022_v48 = vadd.f32 -1.0, %v50_v28 }
  0x12   :  { %153 = vperm.xlu1 %2355, %v2749_v9   ;;  %148 = vperm.xlu0 %2354, %v2754_v10   ;;  %v2884_v27 = vmul.f32 1e+09, %v2022_v48 }
  0x16   :  { %163 = vperm.xlu1 %2355, %v2761_v11   ;;  %158 = vperm.xlu0 %2354, %v2766_v12  }
  0x1a   :  { %173 = vperm.xlu1 %2355, %v2773_v13   ;;  %168 = vperm.xlu0 %2354, %v2778_v14  }
  0x1e   :  { %183 = vperm.xlu1 %2355, %v2785_v15   ;;  %178 = vperm.xlu0 %2354, %v2790_v16  }
  0x22   :  { %2357 = vset.pattern.permute.xlu1 %v3789_v17  ;;  %2356 = vset.pattern.permute.xlu0 %v3789_v17 }
  0x23   :  { %427 = vperm.xlu1 %2357, %v2718_v4   ;;  %423 = vperm.xlu0 %2356, %v2706_v2  }
  0x27   :  { %2358 = vset.pattern.permute.xlu1 %v3791_v18  ;;  %443 = vperm.xlu0 %2356, %v2725_v5  }
  0x28   :  { %1014 = vperm.xlu1 %2358, %v2706_v2  }
  0x2b   :  { %455 = vperm.xlu0 %2356, %v2754_v10  }
  0x2c   :  { %1018 = vperm.xlu1 %2358, %v2718_v4  }
  0x30   :  { %2359 = vset.pattern.permute.xlu1 %v3789_v17 }
  0x31   :  { %431 = vperm.xlu1 %2359, %v2701_v1  }
  0x35   :  { %435 = vperm.xlu1 %2359, %v2713_v3  }
  0x39   :  { %2360 = vset.pattern.permute.xlu1 %v3791_v18 }
  0x3a   :  { %1022 = vperm.xlu1 %2360, %v2701_v1  }
  0x3e   :  { %1026 = vperm.xlu1 %2360, %v2713_v3  }
  0x42   :  { %2361 = vset.pattern.permute.xlu1 %v3789_v17 }
  0x43   :  { %439 = vperm.xlu1 %2361, %v2730_v6  }
  0x47   :  { %2362 = vset.pattern.permute.xlu1 %v3791_v18 }
  0x48   :  { %1030 = vperm.xlu1 %2362, %v2730_v6  }
  0x4c   :  { %2363 = vset.pattern.permute.xlu1 %v3789_v17 }
  0x4d   :  { %447 = vperm.xlu1 %2363, %v2742_v8  }
  0x51   :  { %451 = vperm.xlu1 %2363, %v2737_v7  }
  0x55   :  { %2364 = vset.pattern.permute.xlu1 %v3791_v18 }
  0x56   :  { %1042 = vperm.xlu1 %2364, %v2737_v7  }
  0x5a   :  { %2365 = vset.pattern.permute.xlu1 %v3789_v17 }
  0x81   :  { %v119_v37 = vpop.permute.xlu1 %118  ;;  %v109_v38 = vpop.permute.xlu0 %108 }
  0x82   :  { %v192_v41 = vadd.f32 %v2834_v32, %v119_v37  ;;  %v190_v42 = vadd.f32 %v2834_v32, %v109_v38  ;;  %v2019_v37 = vadd.f32 -1.0, %v47_v63  ;;  %v2862_v38 = vmul.f32 1e+09, %v2018_v55 }
  0x83   :  { %v37_v55 = vunpack.c.0.s8 %v24_v40 }
  0x84   :  { %v208_v49 = vmul.f32 0.2, %v192_v41  ;;  %v206_v50 = vmul.f32 0.2, %v190_v42  ;;  %v2874_v56 = vmul.f32 1e+09, %v2019_v37 }
  0x85   :  { %v124_v52 = vpop.permute.xlu1 %123  ;;  %v114_v53 = vpop.permute.xlu0 %113 }
  0x86   :  { %v193_v57 = vadd.f32 %v2834_v32, %v124_v52  ;;  %v191_v58 = vadd.f32 %v2834_v32, %v114_v53  ;;  %v222_v59 = vmax.f32 %v190_v42, %v206_v50  ;;  %v224_v62 = vmax.f32 %v192_v41, %v208_v49 }
  0x87   :  { %v51_v49 = vcvt.s32.f32 %v35_v29  ;;  %v52_v50 = vcvt.s32.f32 %v36_v30 }
  0x88   :  { %v209_v19 = vmul.f32 0.2, %v193_v57  ;;  %v207_v20 = vmul.f32 0.2, %v191_v58  ;;  %v2850_v22 = vadd.f32 %v222_v59, %v2841_v51  ;;  %v2860_v36 = vadd.f32 %v224_v62, %v2847_v61 }
  0x89   :  { %v134_v24 = vpop.permute.xlu1 %133  ;;  %v129_v25 = vpop.permute.xlu0 %128  ;;  %v38_v59 = vunpack.c.1.s8 %v24_v40  ;;  %v2023_v28 = vadd.f32 -1.0, %v51_v49  ;;  %v2024_v29 = vadd.f32 -1.0, %v52_v50 }
  0x8a   :  { %3831 = vst [vmem:[#allocation2_spill] sm:$0xff] %v2850_v22  ;;  %v195_v31 = vadd.f32 %v2834_v32, %v134_v24  ;;  %v194_v33 = vadd.f32 %v2834_v32, %v129_v25  ;;  %254 = vmax.xlane.f32.xlu0 %v2850_v22  ;;  %v223_v34 = vmax.f32 %v191_v58, %v207_v20  ;;  %3832 = vst [vmem:[#allocation3_spill] sm:$0xff] %v2860_v36 }
  0x8b   :  { %v225_v44 = vmax.f32 %v193_v57, %v209_v19  ;;  %v2876_v57 = vmul.f32 1e+09, %v2020_v39  ;;  %v2021_v25 = vadd.f32 -1.0, %v49_v47  ;;  %v54_v39 = vcvt.s32.f32 %v38_v59 }
  0x8c   :  { %v211_v41 = vmul.f32 0.2, %v195_v31  ;;  %v210_v42 = vmul.f32 0.2, %v194_v33  ;;  %v2868_v43 = vadd.f32 %v223_v34, %v2845_v60  ;;  %v53_v34 = vcvt.s32.f32 %v37_v55 }
  0x8d   :  { %v144_v45 = vpop.permute.xlu1 %143  ;;  %v139_v46 = vpop.permute.xlu0 %138  ;;  %v2882_v19 = vadd.f32 %v225_v44, %v2857_v35  ;;  %v2896_v50 = vmul.f32 1e+09, %v2021_v25 }
  0x8e   :  { %3833 = vst [vmem:[#allocation4_spill] sm:$0xff] %v2868_v43  ;;  %v197_v52 = vadd.f32 %v2834_v32, %v144_v45  ;;  %v196_v53 = vadd.f32 %v2834_v32, %v139_v46  ;;  %256 = vmax.xlane.f32.xlu1 %v2868_v43  ;;  %258 = vmax.xlane.f32.xlu0 %v2860_v36 }
  0x8f   :  { %v226_v54 = vmax.f32 %v194_v33, %v210_v42  ;;  %v227_v58 = vmax.f32 %v195_v31, %v211_v41  ;;  %3835 = vst [vmem:[#allocation6_spill] sm:$0xff] %v2882_v19  ;;  %v39_v41 = vunpack.c.2.s8 %v24_v40  ;;  %v40_v42 = vunpack.c.3.s8 %v24_v40 }
  0x90   :  { %v213_v62 = vmul.f32 0.2, %v197_v52  ;;  %v212_v63 = vmul.f32 0.2, %v196_v53  ;;  %v2025_v40 = vadd.f32 -1.0, %v53_v34 }
  0x91   :  { %v2879_v0 = vadd.f32 %v226_v54, %v2852_v23  ;;  %v154_v20 = vpop.permute.xlu1 %153  ;;  %v149_v24 = vpop.permute.xlu0 %148  ;;  %v2891_v37 = vadd.f32 %v227_v58, %v2862_v38  ;;  %v2898_v54 = vmul.f32 1e+09, %v2023_v28 }
  0x92   :  { %v199_v30 = vadd.f32 %v2834_v32, %v154_v20  ;;  %v198_v31 = vadd.f32 %v2834_v32, %v149_v24  ;;  %260 = vmax.xlane.f32.xlu0 %v2882_v19  ;;  %v228_v33 = vmax.f32 %v196_v53, %v212_v63  ;;  %v229_v47 = vmax.f32 %v197_v52, %v213_v62 }
  0x93   :  { %3834 = vst [vmem:[#allocation5_spill] sm:$0xff] %v2879_v0  ;;  %262 = vmax.xlane.f32.xlu1 %v2879_v0  ;;  %3836 = vst [vmem:[#allocation7_spill] sm:$0xff] %v2891_v37  ;;  %v2900_v53 = vmul.f32 1e+09, %v2024_v29  ;;  %v2026_v52 = vadd.f32 -1.0, %v54_v39  ;;  %v55_v62 = vcvt.s32.f32 %v39_v41  ;;  %v56_v20 = vcvt.s32.f32 %v40_v42 }
  0x94   :  { %v215_v44 = vmul.f32 0.2, %v199_v30  ;;  %v214_v45 = vmul.f32 0.2, %v198_v31  ;;  %v2894_v46 = vadd.f32 %v228_v33, %v2874_v56  ;;  %v2907_v28 = vadd.f32 %v229_v47, %v2876_v57 }
  0x95   :  { %v164_v48 = vpop.permute.xlu1 %163  ;;  %v159_v49 = vpop.permute.xlu0 %158  ;;  %v2919_v39 = vmul.f32 1e+09, %v2025_v40  ;;  %v2921_v41 = vmul.f32 1e+09, %v2026_v52  ;;  %v2027_v42 = vadd.f32 -1.0, %v55_v62 }
  0x96   :  { %3837 = vst [vmem:[#allocation8_spill] sm:$0xff] %v2894_v46  ;;  %v231_v55 = vmax.f32 %v199_v30, %v215_v44  ;;  %v201_v58 = vadd.f32 %v2834_v32, %v164_v48  ;;  %v200_v59 = vadd.f32 %v2834_v32, %v159_v49  ;;  %264 = vmax.xlane.f32.xlu0 %v2891_v37  ;;  %3838 = vst [vmem:[#allocation9_spill] sm:$0xff] %v2907_v28 }
  0x97   :  { %266 = vmax.xlane.f32.xlu1 %v2894_v46  ;;  %v230_v63 = vmax.f32 %v198_v31, %v214_v45  ;;  %v2028_v45 = vadd.f32 -1.0, %v56_v20  ;;  %v2931_v52 = vmul.f32 1e+09, %v2027_v42  ;;  %v3841_v42 = vmov 5  }
  0x98   :  { %v217_v24 = vmul.f32 0.2, %v201_v58  ;;  %v216_v25 = vmul.f32 0.2, %v200_v59  ;;  %v2910_v29 = vadd.f32 %v231_v55, %v2884_v27 }
  0x99   :  { %v174_v30 = vpop.permute.xlu1 %173  ;;  %v169_v33 = vpop.permute.xlu0 %168  ;;  %v2913_v44 = vadd.f32 %v230_v63, %v2896_v50  ;;  %v2933_v62 = vmul.f32 1e+09, %v2028_v45 }
  0x9a   :  { %v233_v48 = vmax.f32 %v201_v58, %v217_v24  ;;  %v232_v49 = vmax.f32 %v200_v59, %v216_v25  ;;  %v203_v31 = vadd.f32 %v2834_v32, %v174_v30  ;;  %v202_v34 = vadd.f32 %v2834_v32, %v169_v33  ;;  %268 = vmax.xlane.f32.xlu0 %v2907_v28 }
  0x9b   :  { %3839 = vst [vmem:[#allocation10_spill] sm:$0xff] %v2913_v44  ;;  %270 = vmax.xlane.f32.xlu1 %v2913_v44 }
  0x9c   :  { %v219_v47 = vmul.f32 0.2, %v203_v31  ;;  %v218_v55 = vmul.f32 0.2, %v202_v34  ;;  %v2924_v63 = vadd.f32 %v232_v49, %v2898_v54  ;;  %v2927_v58 = vadd.f32 %v233_v48, %v2900_v53 }
  0x9d   :  { %v184_v59 = vpop.permute.xlu1 %183  ;;  %v179_v24 = vpop.permute.xlu0 %178 }
  0x9e   :  { %v235_v25 = vmax.f32 %v203_v31, %v219_v47  ;;  %v234_v30 = vmax.f32 %v202_v34, %v218_v55  ;;  %v205_v33 = vadd.f32 %v2834_v32, %v184_v59  ;;  %v204_v40 = vadd.f32 %v2834_v32, %v179_v24 }
  0x9f   :  { %v3840_v32 = vmov 6  }
  0xa0   :  { %v221_v20 = vmul.f32 0.2, %v205_v33  ;;  %v220_v17 = vmul.f32 0.2, %v204_v40  ;;  %v2936_v49 = vadd.f32 %v234_v30, %v2919_v39  ;;  %v2939_v48 = vadd.f32 %v235_v25, %v2921_v41 }
  0xa2   :  { %v237_v18 = vmax.f32 %v205_v33, %v221_v20  ;;  %v236_v44 = vmax.f32 %v204_v40, %v220_v17  ;;  %v2667_v17 = vmov 7   ;;  %v424_v59 = vpop.permute.xlu0 %423 }
  0xa4   :  { %v2942_v31 = vadd.f32 %v236_v44, %v2931_v52  ;;  %v2945_v34 = vadd.f32 %v237_v18, %v2933_v62  ;;  %v428_v18 = vpop.permute.xlu1 %427 }
  0xa8   :  { %v1015_v44 = vpop.permute.xlu1 %1014 }
  0xac   :  { %459 = vperm.xlu1 %2365, %v2749_v9  }
  0xb0   :  { %2366 = vset.pattern.permute.xlu1 %v3840_v32  ;;  %471 = vperm.xlu0 %2356, %v2778_v14  }
  0xb1   :  { %1046 = vperm.xlu1 %2366, %v2754_v10  }
  0xb4   :  { %2369 = vset.pattern.permute.xlu0 %v3840_v32 }
  0xb5   :  { %2367 = vset.pattern.permute.xlu1 %v3841_v42  ;;  %1034 = vperm.xlu0 %2369, %v2725_v5  }
  0xb6   :  { %463 = vperm.xlu1 %2367, %v2766_v12  }
  0xb9   :  { %1038 = vperm.xlu0 %2369, %v2742_v8  }
  0xba   :  { %467 = vperm.xlu1 %2367, %v2761_v11  }
  0xbd   :  { %1050 = vperm.xlu0 %2369, %v2749_v9  }
  0xbe   :  { %2368 = vset.pattern.permute.xlu1 %v3840_v32 }
  0xbf   :  { %1058 = vperm.xlu1 %2368, %v2761_v11  }
  0xc1   :  { %1054 = vperm.xlu0 %2369, %v2766_v12  }
  0xc3   :  { %2370 = vset.pattern.permute.xlu1 %v3841_v42 }
  0xc4   :  { %475 = vperm.xlu1 %2370, %v2773_v13  }
  0xc5   :  { %1066 = vperm.xlu0 %2369, %v2773_v13  }
  0xc8   :  { %2371 = vset.pattern.permute.xlu1 %v3840_v32 }
  0xc9   :  { %1062 = vperm.xlu1 %2371, %v2778_v14   ;;  %1070 = vperm.xlu0 %2369, %v2790_v16  }
  0xcd   :  { %2372 = vset.pattern.permute.xlu1 %v3841_v42  ;;  %2374 = vset.pattern.permute.xlu0 %v2667_v17 }
  0xce   :  { %479 = vperm.xlu1 %2372, %v2790_v16   ;;  %1476 = vperm.xlu0 %2374, %v2706_v2   ;;  %v1019_v2 = vpop.permute.xlu1 %1018 }
  0xd2   :  { %483 = vperm.xlu1 %2372, %v2785_v15   ;;  %1488 = vperm.xlu0 %2374, %v2713_v3   ;;  %v432_v3 = vpop.permute.xlu1 %431 }
  0xd6   :  { %2373 = vset.pattern.permute.xlu1 %v3840_v32  ;;  %1496 = vperm.xlu0 %2374, %v2725_v5   ;;  %v488_v5 = vsub.s32 1, %v2822_v21  ;;  %v444_v32 = vpop.permute.xlu0 %443 }
  0xd7   :  { %1074 = vperm.xlu1 %2373, %v2785_v15  }
  0xda   :  { %1504 = vperm.xlu0 %2374, %v2737_v7  }
  0xdb   :  { %2375 = vset.pattern.permute.xlu1 %v2667_v17 }
  0xdc   :  { %1480 = vperm.xlu1 %2375, %v2718_v4   ;;  %v436_v4 = vpop.permute.xlu1 %435 }
  0xde   :  { %1512 = vperm.xlu0 %2374, %v2749_v9  }
  0xe0   :  { %1484 = vperm.xlu1 %2375, %v2701_v1   ;;  %v2989_v1 = vrot.slane %v2831_v26, %v488_v5  ;;  %v1023_v7 = vpop.permute.xlu1 %1022 }
  0xe2   :  { %1520 = vperm.xlu0 %2374, %v2761_v11   ;;  %v490_v17 = vadd.f32 %v2989_v1, %v424_v59 }
  0xe4   :  { %1492 = vperm.xlu1 %2375, %v2730_v6   ;;  %v1079_v6 = vsub.s32 2, %v2822_v21 }
  0xe6   :  { %1528 = vperm.xlu0 %2374, %v2773_v13   ;;  %v2995_v9 = vrot.slane %v2831_v26, %v1079_v6 }
  0xe8   :  { %1500 = vperm.xlu1 %2375, %v2742_v8   ;;  %v491_v8 = vadd.f32 %v2989_v1, %v428_v18  ;;  %v1083_v55 = vadd.f32 %v2995_v9, %v1023_v7  ;;  %v1082_v6 = vadd.f32 %v2995_v9, %v1019_v2  ;;  %v506_v7 = vmul.f32 0.2, %v490_v17 }
  0xea   :  { %1536 = vperm.xlu0 %2374, %v2785_v15   ;;  %v507_v11 = vmul.f32 0.2, %v491_v8  ;;  %v1099_v30 = vmul.f32 0.2, %v1083_v55 }
  0xec   :  { %1508 = vperm.xlu1 %2375, %v2754_v10   ;;  %v1027_v10 = vpop.permute.xlu1 %1026  ;;  %v523_v45 = vmax.f32 %v491_v8, %v507_v11  ;;  %v1115_v5 = vmax.f32 %v1083_v55, %v1099_v30  ;;  %v456_v11 = vpop.permute.xlu0 %455  ;;  %v522_v55 = vmax.f32 %v490_v17, %v506_v7 }
  0xf0   :  { %1516 = vperm.xlu1 %2375, %v2766_v12   ;;  %v1081_v12 = vadd.f32 %v2995_v9, %v1015_v44  ;;  %v440_v13 = vpop.permute.xlu1 %439 }
  0xf1   :  { %v494_v33 = vadd.f32 %v2989_v1, %v440_v13 }
  0xf2   :  { %v1097_v15 = vmul.f32 0.2, %v1081_v12 }
  0xf3   :  { %v510_v18 = vmul.f32 0.2, %v494_v33 }
  0xf4   :  { %1524 = vperm.xlu1 %2375, %v2778_v14   ;;  %v492_v14 = vadd.f32 %v2989_v1, %v432_v3  ;;  %v1031_v24 = vpop.permute.xlu1 %1030  ;;  %v1113_v25 = vmax.f32 %v1081_v12, %v1097_v15  ;;  %v3018_v15 = vadd.f32 %v1115_v5, %v2847_v61 }
  0xf5   :  { %v1085_v44 = vadd.f32 %v2995_v9, %v1031_v24 }
  0xf6   :  { %v508_v47 = vmul.f32 0.2, %v492_v14  ;;  %v3006_v40 = vadd.f32 %v1113_v25, %v2841_v51 }
  0xf7   :  { %v1101_v8 = vmul.f32 0.2, %v1085_v44 }
  0xf8   :  { %1532 = vperm.xlu1 %2375, %v2790_v16   ;;  %v3001_v16 = vadd.f32 %v523_v45, %v2845_v60  ;;  %v524_v20 = vmax.f32 %v492_v14, %v508_v47  ;;  %v448_v42 = vpop.permute.xlu1 %447  ;;  %v526_v14 = vmax.f32 %v494_v33, %v510_v18  ;;  %v1098_v45 = vmul.f32 0.2, %v1082_v6 }
  0xf9   :  { %v496_v12 = vadd.f32 %v2989_v1, %v448_v42  ;;  %v493_v47 = vadd.f32 %v2989_v1, %v436_v4  ;;  %v1117_v30 = vmax.f32 %v1085_v44, %v1101_v8  ;;  %v1084_v42 = vadd.f32 %v2995_v9, %v1027_v10 }
  0xfa   :  { %v3012_v3 = vadd.f32 %v524_v20, %v2847_v61  ;;  %v3025_v2 = vadd.f32 %v526_v14, %v2852_v23  ;;  %v3030_v33 = vadd.f32 %v522_v55, %v2841_v51  ;;  %v1114_v18 = vmax.f32 %v1082_v6, %v1098_v45 }
  0xfb   :  { %v512_v59 = vmul.f32 0.2, %v496_v12  ;;  %v509_v20 = vmul.f32 0.2, %v493_v47  ;;  %v3037_v17 = vadd.f32 %v1117_v30, %v2852_v23  ;;  %v1100_v44 = vmul.f32 0.2, %v1084_v42 }
  0xfc   :  { %v452_v13 = vpop.permute.xlu1 %451  ;;  %v495_v8 = vadd.f32 %v2989_v1, %v444_v32  ;;  %v3043_v10 = vadd.f32 %v1114_v18, %v2845_v60 }
  0xfd   :  { %v528_v7 = vmax.f32 %v496_v12, %v512_v59  ;;  %v525_v14 = vmax.f32 %v493_v47, %v509_v20  ;;  %v1116_v32 = vmax.f32 %v1084_v42, %v1100_v44 }
  0xfe   :  { %v511_v12 = vmul.f32 0.2, %v495_v8 }
  0xff   :  { %v3050_v55 = vadd.f32 %v528_v7, %v2874_v56  ;;  %v3055_v59 = vadd.f32 %v525_v14, %v2857_v35  ;;  %v3063_v20 = vadd.f32 %v1116_v32, %v2857_v35 }
 0x100   :  { %v1043_v24 = vpop.permute.xlu1 %1042  ;;  %v527_v18 = vmax.f32 %v495_v8, %v511_v12  ;;  %v498_v12 = vadd.f32 %v2989_v1, %v456_v11 }
 0x102   :  { %v3069_v28 = vadd.f32 %v527_v18, %v2862_v38  ;;  %v514_v19 = vmul.f32 0.2, %v498_v12 }
 0x109   :  { %556 = vmax.xlane.f32.xlu0 %v3001_v16 }
 0x10d   :  { %1145 = vmax.xlane.f32.xlu0 %v3006_v40 }
 0x111   :  { %558 = vmax.xlane.f32.xlu0 %v3012_v3 }
 0x115   :  { %1149 = vmax.xlane.f32.xlu0 %v3018_v15 }
 0x117   :  { %v3022_v25 = vpop.xlane.xlu0 %254 }
 0x118   :  { %3842 = vst [vmem:[#allocation11_spill] sm:$0xff] %v3022_v25 }
 0x119   :  { %562 = vmax.xlane.f32.xlu0 %v3025_v2 }
 0x11b   :  { %v3032_v5 = vpop.xlane.xlu1 %256  ;;  %v3034_v4 = vpop.xlane.xlu0 %258 }
 0x11c   :  { %3843 = vst [vmem:[#allocation12_spill] sm:$0xff] %v3032_v5  ;;  %3844 = vst [vmem:[#allocation13_spill] sm:$0xff] %v3034_v4  ;;  %554 = vmax.xlane.f32.xlu1 %v3030_v33 }
 0x11d   :  { %1153 = vmax.xlane.f32.xlu0 %v3037_v17 }
 0x11f   :  { %v3047_v45 = vpop.xlane.xlu0 %260 }
 0x120   :  { %v3045_v6 = vpop.xlane.xlu1 %262  ;;  %3846 = vst [vmem:[#allocation15_spill] sm:$0xff] %v3047_v45  ;;  %1147 = vmax.xlane.f32.xlu1 %v3043_v10 }
 0x121   :  { %3845 = vst [vmem:[#allocation14_spill] sm:$0xff] %v3045_v6  ;;  %566 = vmax.xlane.f32.xlu0 %v3050_v55 }
 0x123   :  { %v3060_v47 = vpop.xlane.xlu0 %264 }
 0x124   :  { %v3057_v30 = vpop.xlane.xlu1 %266  ;;  %560 = vmax.xlane.f32.xlu1 %v3055_v59  ;;  %3848 = vst [vmem:[#allocation17_spill] sm:$0xff] %v3060_v47  ;;  %v1088_v47 = vadd.f32 %v2995_v9, %v1043_v24 }
 0x125   :  { %3847 = vst [vmem:[#allocation16_spill] sm:$0xff] %v3057_v30  ;;  %v497_v30 = vadd.f32 %v2989_v1, %v452_v13 }
 0x126   :  { %v1104_v13 = vmul.f32 0.2, %v1088_v47 }
 0x127   :  { %v3071_v14 = vpop.xlane.xlu0 %268 }
 0x128   :  { %v3065_v7 = vpop.xlane.xlu1 %270  ;;  %1151 = vmax.xlane.f32.xlu1 %v3063_v20  ;;  %3850 = vst [vmem:[#allocation19_spill] sm:$0xff] %v3071_v14 }
 0x129   :  { %3849 = vst [vmem:[#allocation18_spill] sm:$0xff] %v3065_v7  ;;  %v513_v7 = vmul.f32 0.2, %v497_v30 }
 0x12b   :  { %v529_v4 = vmax.f32 %v497_v30, %v513_v7  ;;  %v1120_v30 = vmax.f32 %v1088_v47, %v1104_v13 }
 0x12c   :  { %564 = vmax.xlane.f32.xlu1 %v3069_v28  ;;  %v460_v42 = vpop.permute.xlu1 %459 }
 0x12d   :  { %v499_v45 = vadd.f32 %v2989_v1, %v460_v42  ;;  %v530_v42 = vmax.f32 %v498_v12, %v514_v19  ;;  %v3101_v13 = vadd.f32 %v1120_v30, %v2876_v57 }
 0x12f   :  { %v472_v44 = vpop.permute.xlu0 %471  ;;  %v515_v22 = vmul.f32 0.2, %v499_v45 }
 0x130   :  { %v1047_v46 = vpop.permute.xlu1 %1046 }
 0x131   :  { %v1089_v43 = vadd.f32 %v2995_v9, %v1047_v46 }
 0x133   :  { %v1105_v7 = vmul.f32 0.2, %v1089_v43 }
 0x134   :  { %v1035_v37 = vpop.permute.xlu0 %1034 }
 0x135   :  { %v1086_v32 = vadd.f32 %v2995_v9, %v1035_v37  ;;  %v464_v8 = vpop.permute.xlu1 %463 }
 0x137   :  { %v1102_v18 = vmul.f32 0.2, %v1086_v32 }
 0x138   :  { %v1039_v0 = vpop.permute.xlu0 %1038 }
 0x139   :  { %v1087_v14 = vadd.f32 %v2995_v9, %v1039_v0  ;;  %v1118_v6 = vmax.f32 %v1086_v32, %v1102_v18  ;;  %v468_v36 = vpop.permute.xlu1 %467  ;;  %v500_v0 = vadd.f32 %v2989_v1, %v464_v8  ;;  %v3087_v18 = vadd.f32 %v529_v4, %v2876_v57 }
 0x13a   :  { %v501_v8 = vadd.f32 %v2989_v1, %v468_v36  ;;  %v3097_v4 = vadd.f32 %v530_v42, %v2896_v50 }
 0x13b   :  { %v1103_v37 = vmul.f32 0.2, %v1087_v14  ;;  %v3082_v5 = vadd.f32 %v1118_v6, %v2862_v38  ;;  %3851 = vst [vmem:[#allocation20_spill] sm:$0xff] %v3087_v18 }
 0x13c   :  { %v1051_v11 = vpop.permute.xlu0 %1050  ;;  %3853 = vst [vmem:[#allocation22_spill] sm:$0xff] %v3097_v4 }
 0x13d   :  { %1155 = vmax.xlane.f32.xlu1 %v3082_v5  ;;  %v1119_v24 = vmax.f32 %v1087_v14, %v1103_v37  ;;  %v1090_v46 = vadd.f32 %v2995_v9, %v1051_v11  ;;  %v531_v14 = vmax.f32 %v499_v45, %v515_v22  ;;  %v516_v37 = vmul.f32 0.2, %v500_v0 }
 0x13e   :  { %v1059_v32 = vpop.permute.xlu1 %1058  ;;  %v1121_v11 = vmax.f32 %v1089_v43, %v1105_v7  ;;  %v502_v22 = vadd.f32 %v2989_v1, %v472_v44  ;;  %v517_v45 = vmul.f32 0.2, %v501_v8 }
 0x13f   :  { %v3091_v25 = vadd.f32 %v1119_v24, %v2874_v56  ;;  %v1106_v19 = vmul.f32 0.2, %v1090_v46  ;;  %v3107_v36 = vadd.f32 %v531_v14, %v2884_v27  ;;  %v532_v42 = vmax.f32 %v500_v0, %v516_v37 }
 0x140   :  { %v1055_v6 = vpop.permute.xlu0 %1054  ;;  %v3111_v30 = vadd.f32 %v1121_v11, %v2896_v50  ;;  %v518_v7 = vmul.f32 0.2, %v502_v22  ;;  %v533_v44 = vmax.f32 %v501_v8, %v517_v45  ;;  %v1541_v8 = vsub.s32 3, %v2822_v21 }
 0x141   :  { %3852 = vst [vmem:[#allocation21_spill] sm:$0xff] %v3091_v25  ;;  %568 = vmax.xlane.f32.xlu1 %v3087_v18  ;;  %1157 = vmax.xlane.f32.xlu0 %v3091_v25  ;;  %v1091_v47 = vadd.f32 %v2995_v9, %v1055_v6  ;;  %3854 = vst [vmem:[#allocation23_spill] sm:$0xff] %v3107_v36  ;;  %v1122_v25 = vmax.f32 %v1090_v46, %v1106_v19 }
 0x142   :  { %v1092_v6 = vadd.f32 %v2995_v9, %v1059_v32  ;;  %3855 = vst [vmem:[#allocation24_spill] sm:$0xff] %v3111_v30  ;;  %v3117_v14 = vadd.f32 %v532_v42, %v2898_v54  ;;  %v3128_v42 = vadd.f32 %v533_v44, %v2900_v53 }
 0x143   :  { %v476_v12 = vpop.permute.xlu1 %475  ;;  %v1107_v18 = vmul.f32 0.2, %v1091_v47  ;;  %v3121_v32 = vadd.f32 %v1122_v25, %v2884_v27 }
 0x144   :  { %v1067_v24 = vpop.permute.xlu0 %1066  ;;  %3856 = vst [vmem:[#allocation25_spill] sm:$0xff] %v3117_v14  ;;  %v1108_v0 = vmul.f32 0.2, %v1092_v6 }
 0x145   :  { %1159 = vmax.xlane.f32.xlu1 %v3101_v13  ;;  %570 = vmax.xlane.f32.xlu0 %v3097_v4  ;;  %v503_v4 = vadd.f32 %v2989_v1, %v476_v12  ;;  %v1123_v37 = vmax.f32 %v1091_v47, %v1107_v18  ;;  %v1094_v12 = vadd.f32 %v2995_v9, %v1067_v24 }
 0x146   :  { %v3135_v47 = vrot.slane %v2831_v26, %v1541_v8 }
 0x147   :  { %v519_v45 = vmul.f32 0.2, %v503_v4  ;;  %v3132_v18 = vadd.f32 %v1123_v37, %v2898_v54  ;;  %v1110_v21 = vmul.f32 0.2, %v1094_v12 }
 0x148   :  { %v1063_v43 = vpop.permute.xlu1 %1062  ;;  %v1071_v19 = vpop.permute.xlu0 %1070 }
 0x149   :  { %572 = vmax.xlane.f32.xlu1 %v3107_v36  ;;  %1161 = vmax.xlane.f32.xlu0 %v3111_v30  ;;  %v1093_v46 = vadd.f32 %v2995_v9, %v1063_v43  ;;  %v534_v30 = vmax.f32 %v502_v22, %v518_v7  ;;  %v1124_v43 = vmax.f32 %v1092_v6, %v1108_v0 }
 0x14a   :  { %3857 = vst [vmem:[#allocation26_spill] sm:$0xff] %v3132_v18  ;;  %v535_v24 = vmax.f32 %v503_v4, %v519_v45  ;;  %v1095_v44 = vadd.f32 %v2995_v9, %v1071_v19  ;;  %v1126_v4 = vmax.f32 %v1094_v12, %v1110_v21 }
 0x14b   :  { %v1109_v36 = vmul.f32 0.2, %v1093_v46  ;;  %v3141_v6 = vadd.f32 %v534_v30, %v2919_v39  ;;  %v3145_v37 = vadd.f32 %v1124_v43, %v2900_v53 }
 0x14c   :  { %v1111_v8 = vmul.f32 0.2, %v1095_v44  ;;  %v3151_v45 = vadd.f32 %v535_v24, %v2921_v41  ;;  %v3160_v12 = vadd.f32 %v1126_v4, %v2921_v41 }
 0x14d   :  { %v480_v11 = vpop.permute.xlu1 %479  ;;  %574 = vmax.xlane.f32.xlu0 %v3117_v14  ;;  %1163 = vmax.xlane.f32.xlu1 %v3121_v32  ;;  %v1477_v22 = vpop.permute.xlu0 %1476  ;;  %v1125_v26 = vmax.f32 %v1093_v46, %v1109_v36 }
 0x14e   :  { %v504_v25 = vadd.f32 %v2989_v1, %v480_v11  ;;  %v1543_v11 = vadd.f32 %v3135_v47, %v1477_v22  ;;  %3858 = vst [vmem:[#allocation27_spill] sm:$0xff] %v3151_v45 }
 0x150   :  { %v520_v7 = vmul.f32 0.2, %v504_v25  ;;  %v1559_v46 = vmul.f32 0.2, %v1543_v11 }
 0x151   :  { %v484_v14 = vpop.permute.xlu1 %483  ;;  %576 = vmax.xlane.f32.xlu1 %v3128_v42  ;;  %1165 = vmax.xlane.f32.xlu0 %v3132_v18  ;;  %v1489_v36 = vpop.permute.xlu0 %1488 }
 0x152   :  { %v505_v0 = vadd.f32 %v2989_v1, %v484_v14  ;;  %v3155_v1 = vadd.f32 %v1125_v26, %v2919_v39  ;;  %v536_v14 = vmax.f32 %v504_v25, %v520_v7  ;;  %v1575_v25 = vmax.f32 %v1543_v11, %v1559_v46 }
 0x154   :  { %v521_v30 = vmul.f32 0.2, %v505_v0  ;;  %3859 = vst [vmem:[#allocation28_spill] sm:$0xff] %v3155_v1  ;;  %v3163_v22 = vadd.f32 %v536_v14, %v2931_v52  ;;  %v3179_v11 = vadd.f32 %v1575_v25, %v2841_v51 }
 0x155   :  { %1167 = vmax.xlane.f32.xlu1 %v3145_v37  ;;  %578 = vmax.xlane.f32.xlu0 %v3141_v6  ;;  %v1497_v7 = vpop.permute.xlu0 %1496 }
 0x156   :  { %v1075_v19 = vpop.permute.xlu1 %1074  ;;  %v537_v43 = vmax.f32 %v505_v0, %v521_v30  ;;  %3861 = vst [vmem:[#allocation30_spill] sm:$0xff] %v3179_v11 }
 0x157   :  { %v1096_v18 = vadd.f32 %v2995_v9, %v1075_v19  ;;  %v1127_v9 = vmax.f32 %v1095_v44, %v1111_v8 }
 0x158   :  { %v3170_v0 = vadd.f32 %v537_v43, %v2933_v62 }
 0x159   :  { %580 = vmax.xlane.f32.xlu1 %v3151_v45  ;;  %1169 = vmax.xlane.f32.xlu0 %v3155_v1  ;;  %v1112_v21 = vmul.f32 0.2, %v1096_v18  ;;  %v1546_v1 = vadd.f32 %v3135_v47, %v1489_v36  ;;  %v3173_v30 = vadd.f32 %v1127_v9, %v2931_v52 }
 0x15b   :  { %v1481_v24 = vpop.permute.xlu1 %1480  ;;  %v1128_v4 = vmax.f32 %v1096_v18, %v1112_v21  ;;  %3860 = vst [vmem:[#allocation29_spill] sm:$0xff] %v3173_v30  ;;  %v1562_v36 = vmul.f32 0.2, %v1546_v1  ;;  %v1548_v18 = vadd.f32 %v3135_v47, %v1497_v7  ;;  %v1505_v21 = vpop.permute.xlu0 %1504 }
 0x15c   :  { %v1544_v26 = vadd.f32 %v3135_v47, %v1481_v24  ;;  %v1550_v51 = vadd.f32 %v3135_v47, %v1505_v21 }
 0x15d   :  { %582 = vmax.xlane.f32.xlu0 %v3163_v22  ;;  %1171 = vmax.xlane.f32.xlu1 %v3160_v12  ;;  %v3183_v43 = vadd.f32 %v1128_v4, %v2933_v62  ;;  %v1578_v7 = vmax.f32 %v1546_v1, %v1562_v36 }
 0x15e   :  { %v1560_v19 = vmul.f32 0.2, %v1544_v26 }
 0x15f   :  { %v1485_v45 = vpop.permute.xlu1 %1484  ;;  %v3203_v1 = vadd.f32 %v1578_v7, %v2857_v35 }
 0x160   :  { %v1545_v44 = vadd.f32 %v3135_v47, %v1485_v45  ;;  %v1576_v8 = vmax.f32 %v1544_v26, %v1560_v19  ;;  %v1564_v19 = vmul.f32 0.2, %v1548_v18 }
 0x161   :  { %584 = vmax.xlane.f32.xlu1 %v3170_v0  ;;  %1173 = vmax.xlane.f32.xlu0 %v3173_v30 }
 0x162   :  { %v1561_v14 = vmul.f32 0.2, %v1545_v44  ;;  %v3189_v9 = vadd.f32 %v1576_v8, %v2845_v60  ;;  %v1580_v8 = vmax.f32 %v1548_v18, %v1564_v19 }
 0x163   :  { %v1493_v46 = vpop.permute.xlu1 %1492 }
 0x164   :  { %v1547_v24 = vadd.f32 %v3135_v47, %v1493_v46  ;;  %v1577_v45 = vmax.f32 %v1545_v44, %v1561_v14  ;;  %v1566_v44 = vmul.f32 0.2, %v1550_v51  ;;  %v1513_v14 = vpop.permute.xlu0 %1512  ;;  %v3212_v19 = vadd.f32 %v1580_v8, %v2862_v38 }
 0x165   :  { %1175 = vmax.xlane.f32.xlu1 %v3183_v43  ;;  %1607 = vmax.xlane.f32.xlu0 %v3179_v11  ;;  %v1552_v21 = vadd.f32 %v3135_v47, %v1513_v14 }
 0x166   :  { %v1563_v26 = vmul.f32 0.2, %v1547_v24  ;;  %v3193_v25 = vadd.f32 %v1577_v45, %v2847_v61  ;;  %v1582_v45 = vmax.f32 %v1550_v51, %v1566_v44 }
 0x167   :  { %v1501_v4 = vpop.permute.xlu1 %1500 }
 0x168   :  { %v1579_v30 = vmax.f32 %v1547_v24, %v1563_v26  ;;  %v1549_v46 = vadd.f32 %v3135_v47, %v1501_v4  ;;  %v1568_v26 = vmul.f32 0.2, %v1552_v21  ;;  %v3217_v35 = vadd.f32 %v1582_v45, %v2876_v57 }
 0x169   :  { %1609 = vmax.xlane.f32.xlu1 %v3189_v9  ;;  %1611 = vmax.xlane.f32.xlu0 %v3193_v25 }
 0x16a   :  { %v1565_v60 = vmul.f32 0.2, %v1549_v46  ;;  %v3200_v61 = vadd.f32 %v1579_v30, %v2852_v23  ;;  %v1521_v23 = vpop.permute.xlu0 %1520 }
 0x16b   :  { %v1509_v11 = vpop.permute.xlu1 %1508  ;;  %v1554_v51 = vadd.f32 %v3135_v47, %v1521_v23 }
 0x16c   :  { %v1581_v36 = vmax.f32 %v1549_v46, %v1565_v60  ;;  %v1551_v24 = vadd.f32 %v3135_v47, %v1509_v11  ;;  %v1584_v11 = vmax.f32 %v1552_v21, %v1568_v26 }
 0x16d   :  { %1615 = vmax.xlane.f32.xlu0 %v3200_v61  ;;  %1613 = vmax.xlane.f32.xlu1 %v3203_v1  ;;  %v1570_v38 = vmul.f32 0.2, %v1554_v51 }
 0x16e   :  { %v1567_v4 = vmul.f32 0.2, %v1551_v24  ;;  %v3209_v18 = vadd.f32 %v1581_v36, %v2874_v56  ;;  %v3227_v14 = vadd.f32 %v1584_v11, %v2884_v27  ;;  %v1529_v57 = vpop.permute.xlu0 %1528 }
 0x16f   :  { %v1517_v30 = vpop.permute.xlu1 %1516  ;;  %v1586_v8 = vmax.f32 %v1554_v51, %v1570_v38  ;;  %v1556_v21 = vadd.f32 %v3135_v47, %v1529_v57 }
 0x170   :  { %v1583_v7 = vmax.f32 %v1551_v24, %v1567_v4  ;;  %v1553_v46 = vadd.f32 %v3135_v47, %v1517_v30 }
 0x171   :  { %1619 = vmax.xlane.f32.xlu0 %v3209_v18  ;;  %1617 = vmax.xlane.f32.xlu1 %v3212_v19  ;;  %v3239_v26 = vadd.f32 %v1586_v8, %v2900_v53 }
 0x172   :  { %v1569_v56 = vmul.f32 0.2, %v1553_v46  ;;  %v3224_v44 = vadd.f32 %v1583_v7, %v2896_v50  ;;  %v1572_v50 = vmul.f32 0.2, %v1556_v21  ;;  %v1537_v4 = vpop.permute.xlu0 %1536 }
 0x173   :  { %v1525_v60 = vpop.permute.xlu1 %1524  ;;  %v1558_v11 = vadd.f32 %v3135_v47, %v1537_v4 }
 0x174   :  { %v1585_v36 = vmax.f32 %v1553_v46, %v1569_v56  ;;  %v1555_v24 = vadd.f32 %v3135_v47, %v1525_v60  ;;  %v1588_v30 = vmax.f32 %v1556_v21, %v1572_v50 }
 0x175   :  { %272 = vmax.xlane.f32.xlu0 %v2910_v29  ;;  %1621 = vmax.xlane.f32.xlu1 %v3217_v35 }
 0x176   :  { %v1571_v45 = vmul.f32 0.2, %v1555_v24  ;;  %v3236_v27 = vadd.f32 %v1585_v36, %v2898_v54  ;;  %v1574_v54 = vmul.f32 0.2, %v1558_v11  ;;  %v3251_v38 = vadd.f32 %v1588_v30, %v2921_v41 }
 0x177   :  { %v1533_v23 = vpop.permute.xlu1 %1532 }
 0x178   :  { %v1587_v51 = vmax.f32 %v1555_v24, %v1571_v45  ;;  %v1557_v7 = vadd.f32 %v3135_v47, %v1533_v23  ;;  %v1590_v56 = vmax.f32 %v1558_v11, %v1574_v54 }
 0x179   :  { %1623 = vmax.xlane.f32.xlu1 %v3224_v44  ;;  %1625 = vmax.xlane.f32.xlu0 %v3227_v14 }
 0x17a   :  { %v1573_v46 = vmul.f32 0.2, %v1557_v7  ;;  %v3248_v53 = vadd.f32 %v1587_v51, %v2919_v39  ;;  %v3261_v60 = vadd.f32 %v1590_v56, %v2933_v62 }
 0x17c   :  { %v1589_v57 = vmax.f32 %v1557_v7, %v1573_v46 }
 0x17d   :  { %274 = vmax.xlane.f32.xlu1 %v2924_v63  ;;  %276 = vmax.xlane.f32.xlu0 %v2927_v58 }
 0x17e   :  { %v3258_v47 = vadd.f32 %v1589_v57, %v2931_v52 }
 0x181   :  { %1627 = vmax.xlane.f32.xlu1 %v3236_v27  ;;  %1629 = vmax.xlane.f32.xlu0 %v3239_v26 }
 0x185   :  { %278 = vmax.xlane.f32.xlu1 %v2936_v49  ;;  %280 = vmax.xlane.f32.xlu0 %v2939_v48 }
 0x189   :  { %1631 = vmax.xlane.f32.xlu1 %v3248_v53  ;;  %1633 = vmax.xlane.f32.xlu0 %v3251_v38 }
 0x18d   :  { %282 = vmax.xlane.f32.xlu1 %v2942_v31  ;;  %284 = vmax.xlane.f32.xlu0 %v2945_v34 }
 0x191   :  { %1635 = vmax.xlane.f32.xlu1 %v3258_v47  ;;  %1637 = vmax.xlane.f32.xlu0 %v3261_v60 }
 0x196   :  { %v557_v39 = vpop.xlane.xlu0 %556 }
 0x197   :  { %v587_v41 = vsub.f32 %v3001_v16, %v557_v39 }
 0x199   :  { %v604_v8 = vmul.f32 1.442695, %v587_v41 }
 0x19a   :  { %v1146_v21 = vpop.xlane.xlu0 %1145 }
 0x19b   :  { %2408 = vpow2.f32 %v604_v8  ;;  %v1177_v50 = vsub.f32 %v3006_v40, %v1146_v21 }
 0x19d   :  { %v1193_v23 = vmul.f32 1.442695, %v1177_v50 }
 0x19e   :  { %v559_v36 = vpop.xlane.xlu0 %558 }
 0x19f   :  { %v588_v30 = vsub.f32 %v3012_v3, %v559_v36 }
 0x1a1   :  { %v606_v54 = vmul.f32 1.442695, %v588_v30  ;;  %v2378_v30 = vld [vmem:[%s3786_s3 + $0x80] sm:$0xff]  }
 0x1a2   :  { %v1150_v52 = vpop.xlane.xlu0 %1149  ;;  %2238 = vmatprep.subr.bf16.mxu0 %v2378_v30 }
 0x1a3   :  { %v1179_v46 = vsub.f32 %v3018_v15, %v1150_v52  ;;  %2239 = vmatpush3.bf16.msra.mxu0 %v2378_v30 }
 0x1a5   :  { %v3266_v24 = vpop.eup %2408  ;;  %v1197_v39 = vmul.f32 1.442695, %v1179_v46 }
 0x1a6   :  { %636 = vadd.xlane.f32.xlu0 %v3266_v24  ;;  %v563_v16 = vpop.xlane.xlu0 %562 }
 0x1a7   :  { %v590_v3 = vsub.f32 %v3025_v2, %v563_v16  ;;  %v2379_v16 = vld [vmem:[%s3786_s3 + $0x50] sm:$0xff]  }
 0x1a9   :  { %v555_v62 = vpop.xlane.xlu1 %554  ;;  %v610_v15 = vmul.f32 1.442695, %v590_v3 }
 0x1aa   :  { %v586_v45 = vsub.f32 %v3030_v33, %v555_v62  ;;  %v1154_v57 = vpop.xlane.xlu0 %1153 }
 0x1ac   :  { %v602_v4 = vmul.f32 1.442695, %v586_v45 }
 0x1ad   :  { %v1148_v11 = vpop.xlane.xlu1 %1147 }
 0x1ae   :  { %2410 = vpow2.f32 %v602_v4  ;;  %v1178_v51 = vsub.f32 %v3043_v10, %v1148_v11  ;;  %v1181_v10 = vsub.f32 %v3037_v17, %v1154_v57  ;;  %v567_v62 = vpop.xlane.xlu0 %566  ;;  %v2376_v17 = vld [vmem:[%s3786_s3 + $0x40] sm:$0xff]  }
 0x1af   :  { %2412 = vpow2.f32 %v1193_v23  ;;  %v592_v4 = vsub.f32 %v3050_v55, %v567_v62  ;;  %2174 = vmatprep.subr.bf16.mxu1 %v2376_v17  ;;  %v2377_v23 = vld [vmem:[%s3786_s3 + $0x48] sm:$0xff]  }
 0x1b0   :  { %v1195_v7 = vmul.f32 1.442695, %v1178_v51  ;;  %v1201_v2 = vmul.f32 1.442695, %v1181_v10  ;;  %2175 = vmatpush3.bf16.msra.mxu1 %v2376_v17  ;;  %v2380_v51 = vld [vmem:[%s3786_s3 + $0x88] sm:$0xff]   ;;  %v2386_v17 = vld [vmem:[%s3786_s3 + $0xa0] sm:$0xff]  }
 0x1b1   :  { %v561_v56 = vpop.xlane.xlu1 %560  ;;  %v614_v55 = vmul.f32 1.442695, %v592_v4  ;;  %2176 = vmatprep.subr.bf16.mxu1 %v2377_v23  ;;  %2240 = vmatprep.subr.bf16.mxu0 %v2380_v51 }
 0x1b2   :  { %2414 = vpow2.f32 %v1195_v7  ;;  %v589_v40 = vsub.f32 %v3055_v59, %v561_v56  ;;  %2241 = vmatpush3.bf16.msra.mxu0 %v2380_v51  ;;  %v2381_v56 = vld [vmem:[%s3786_s3 + $0x58] sm:$0xff]   ;;  %v3864_v51 = vld [vmem:[#allocation22_spill] sm:$0xff] }
 0x1b3   :  { %2416 = vpow2.f32 %v606_v54 }
 0x1b4   :  { %v608_v33 = vmul.f32 1.442695, %v589_v40  ;;  %2177 = vmatpush3.bf16.msra.mxu1 %v2377_v23  ;;  %v2382_v40 = vld [vmem:[%s3786_s3 + $0x90] sm:$0xff]  }
 0x1b5   :  { %v1152_v41 = vpop.xlane.xlu1 %1151  ;;  %2178 = vmatprep.subr.bf16.mxu1 %v2379_v16  ;;  %2242 = vmatprep.subr.bf16.mxu0 %v2382_v40 }
 0x1b6   :  { %2418 = vpow2.f32 %v608_v33  ;;  %v1180_v8 = vsub.f32 %v3063_v20, %v1152_v41  ;;  %2243 = vmatpush3.bf16.msra.mxu0 %v2382_v40  ;;  %v2383_v41 = vld [vmem:[%s3786_s3 + $0x60] sm:$0xff]   ;;  %v2387_v40 = vld [vmem:[%s3786_s3 + $0x70] sm:$0xff]  }
 0x1b7   :  { %2420 = vpow2.f32 %v1197_v39 }
 0x1b8   :  { %v3278_v21 = vpop.eup %2410  ;;  %v1199_v36 = vmul.f32 1.442695, %v1180_v8  ;;  %2179 = vmatpush3.bf16.msra.mxu1 %v2379_v16  ;;  %v2384_v8 = vld [vmem:[%s3786_s3 + $0x98] sm:$0xff]  }
 0x1b9   :  { %v565_v52 = vpop.xlane.xlu1 %564  ;;  %634 = vadd.xlane.f32.xlu1 %v3278_v21  ;;  %v3282_v50 = vpop.eup %2412  ;;  %2180 = vmatprep.subr.bf16.mxu1 %v2381_v56 }
 0x1ba   :  { %2422 = vpow2.f32 %v1199_v36  ;;  %v591_v59 = vsub.f32 %v3069_v28, %v565_v52  ;;  %2244 = vmatprep.subr.bf16.mxu0 %v2384_v8 }
 0x1bb   :  { %2424 = vpow2.f32 %v610_v15  ;;  %2245 = vmatpush3.bf16.msra.mxu0 %v2384_v8 }
 0x1bc   :  { %v3284_v45 = vpop.eup %2414  ;;  %v612_v20 = vmul.f32 1.442695, %v591_v59  ;;  %2181 = vmatpush3.bf16.msra.mxu1 %v2381_v56  ;;  %v3863_v59 = vld [vmem:[#allocation21_spill] sm:$0xff]  ;;  %2246 = vmatprep.subr.bf16.mxu0 %v2386_v17 }
 0x1bd   :  { %1227 = vadd.xlane.f32.xlu0 %v3284_v45  ;;  %1225 = vadd.xlane.f32.xlu1 %v3282_v50  ;;  %v3292_v28 = vpop.eup %2416 }
 0x1be   :  { %2426 = vpow2.f32 %v612_v20  ;;  %2182 = vmatprep.subr.bf16.mxu1 %v2383_v41  ;;  %v2385_v20 = vld [vmem:[%s3786_s3 + $0x68] sm:$0xff]  }
 0x1bf   :  { %2428 = vpow2.f32 %v1201_v2  ;;  %2247 = vmatpush3.bf16.msra.mxu0 %v2386_v17 }
 0x1c0   :  { %v3300_v11 = vpop.eup %2418  ;;  %2430 = vpow2.f32 %v614_v55  ;;  %2183 = vmatpush3.bf16.msra.mxu1 %v2383_v41 }
 0x1c1   :  { %640 = vadd.xlane.f32.xlu0 %v3300_v11  ;;  %638 = vadd.xlane.f32.xlu1 %v3292_v28  ;;  %v3310_v7 = vpop.eup %2420 }
 0x1c2   :  { %2184 = vmatprep.subr.bf16.mxu1 %v2385_v20 }
 0x1c4   :  { %v3312_v54 = vpop.eup %2422  ;;  %2185 = vmatpush3.bf16.msra.mxu1 %v2385_v20 }
 0x1c5   :  { %1231 = vadd.xlane.f32.xlu0 %v3312_v54  ;;  %1229 = vadd.xlane.f32.xlu1 %v3310_v7  ;;  %v3316_v46 = vpop.eup %2424 }
 0x1c6   :  { %2186 = vmatprep.subr.bf16.mxu1 %v2387_v40 }
 0x1c8   :  { %v3324_v57 = vpop.eup %2426  ;;  %2187 = vmatpush3.bf16.msra.mxu1 %v2387_v40 }
 0x1c9   :  { %644 = vadd.xlane.f32.xlu0 %v3324_v57  ;;  %642 = vadd.xlane.f32.xlu1 %v3316_v46  ;;  %v3329_v3 = vpop.eup %2428 }
 0x1ca   :  { %v1156_v33 = vpop.xlane.xlu1 %1155  ;;  %v3340_v62 = vpop.eup %2430 }
 0x1cb   :  { %v1182_v39 = vsub.f32 %v3082_v5, %v1156_v33  ;;  %v3862_v5 = vld [vmem:[#allocation20_spill] sm:$0xff]  ;;  %v2388_v33 = vld [vmem:[%s3786_s3 + $0xa8] sm:$0xff]  }
 0x1cc   :  { %2248 = vmatprep.subr.bf16.mxu0 %v2388_v33 }
 0x1cd   :  { %v1203_v10 = vmul.f32 1.442695, %v1182_v39  ;;  %1233 = vadd.xlane.f32.xlu1 %v3329_v3  ;;  %2249 = vmatpush3.bf16.msra.mxu0 %v2388_v33 }
 0x1ce   :  { %v569_v36 = vpop.xlane.xlu1 %568  ;;  %v1158_v15 = vpop.xlane.xlu0 %1157 }
 0x1cf   :  { %2432 = vpow2.f32 %v1203_v10  ;;  %v593_v52 = vsub.f32 %v3862_v5, %v569_v36  ;;  %v1183_v2 = vsub.f32 %v3863_v59, %v1158_v15  ;;  %v3866_v15 = vld [vmem:[#allocation24_spill] sm:$0xff] }
 0x1d0   :  { %v2390_v59 = vld [vmem:[%s3786_s3 + $0xb0] sm:$0xff]  }
 0x1d1   :  { %v616_v4 = vmul.f32 1.442695, %v593_v52  ;;  %v1205_v23 = vmul.f32 1.442695, %v1183_v2  ;;  %646 = vadd.xlane.f32.xlu1 %v3340_v62  ;;  %v2389_v52 = vld [vmem:[%s3786_s3 + $0x78] sm:$0xff]   ;;  %2250 = vmatprep.subr.bf16.mxu0 %v2390_v59 }
 0x1d2   :  { %v1160_v30 = vpop.xlane.xlu1 %1159  ;;  %v571_v55 = vpop.xlane.xlu0 %570  ;;  %2188 = vmatprep.subr.bf16.mxu1 %v2389_v52  ;;  %2251 = vmatpush3.bf16.msra.mxu0 %v2390_v59 }
 0x1d3   :  { %2434 = vpow2.f32 %v616_v4  ;;  %v1184_v16 = vsub.f32 %v3101_v13, %v1160_v30  ;;  %v594_v56 = vsub.f32 %v3864_v51, %v571_v55  ;;  %v3865_v13 = vld [vmem:[#allocation23_spill] sm:$0xff]  ;;  %v3867_v55 = vld [vmem:[#allocation25_spill] sm:$0xff]  ;;  %2189 = vmatpush3.bf16.msra.mxu1 %v2389_v52 }
 0x1d4   :  { %2436 = vpow2.f32 %v1205_v23  ;;  %v2391_v51 = vld [vmem:[%s3786_s3 + $0xb8] sm:$0xff]  }
 0x1d5   :  { %v1207_v39 = vmul.f32 1.442695, %v1184_v16  ;;  %v618_v41 = vmul.f32 1.442695, %v594_v56  ;;  %2252 = vmatprep.subr.bf16.mxu0 %v2391_v51 }
 0x1d6   :  { %v573_v8 = vpop.xlane.xlu1 %572  ;;  %v1162_v10 = vpop.xlane.xlu0 %1161  ;;  %2253 = vmatpush3.bf16.msra.mxu0 %v2391_v51 }
 0x1d7   :  { %2438 = vpow2.f32 %v1207_v39  ;;  %v595_v36 = vsub.f32 %v3865_v13, %v573_v8  ;;  %v1185_v5 = vsub.f32 %v3866_v15, %v1162_v10  ;;  %v3868_v10 = vld [vmem:[#allocation26_spill] sm:$0xff] }
 0x1d8   :  { %2440 = vpow2.f32 %v618_v41 }
 0x1d9   :  { %v3365_v2 = vpop.eup %2432  ;;  %v620_v20 = vmul.f32 1.442695, %v595_v36  ;;  %v1209_v17 = vmul.f32 1.442695, %v1185_v5 }
 0x1da   :  { %v1164_v4 = vpop.xlane.xlu1 %1163  ;;  %1235 = vadd.xlane.f32.xlu0 %v3365_v2  ;;  %v575_v23 = vpop.xlane.xlu0 %574 }
 0x1db   :  { %2442 = vpow2.f32 %v620_v20  ;;  %v1186_v30 = vsub.f32 %v3121_v32, %v1164_v4  ;;  %v596_v16 = vsub.f32 %v3867_v55, %v575_v23 }
 0x1dc   :  { %2444 = vpow2.f32 %v1209_v17 }
 0x1dd   :  { %v3373_v56 = vpop.eup %2434  ;;  %v1211_v40 = vmul.f32 1.442695, %v1186_v30  ;;  %v622_v33 = vmul.f32 1.442695, %v596_v16 }
 0x1de   :  { %v3375_v39 = vpop.eup %2436  ;;  %v577_v41 = vpop.xlane.xlu1 %576  ;;  %648 = vadd.xlane.f32.xlu0 %v3373_v56 }
 0x1df   :  { %v1166_v32 = vpop.xlane.xlu0 %1165  ;;  %2446 = vpow2.f32 %v1211_v40  ;;  %v597_v8 = vsub.f32 %v3128_v42, %v577_v41  ;;  %1237 = vadd.xlane.f32.xlu1 %v3375_v39  ;;  %v3869_v40 = vld [vmem:[#allocation27_spill] sm:$0xff] }
 0x1e0   :  { %v1187_v13 = vsub.f32 %v3868_v10, %v1166_v32  ;;  %2448 = vpow2.f32 %v622_v33 }
 0x1e1   :  { %v3381_v36 = vpop.eup %2438  ;;  %v624_v15 = vmul.f32 1.442695, %v597_v8 }
 0x1e2   :  { %v1213_v5 = vmul.f32 1.442695, %v1187_v13  ;;  %v3383_v52 = vpop.eup %2440  ;;  %v1168_v59 = vpop.xlane.xlu1 %1167  ;;  %1239 = vadd.xlane.f32.xlu0 %v3381_v36 }
 0x1e3   :  { %v579_v20 = vpop.xlane.xlu0 %578  ;;  %2450 = vpow2.f32 %v624_v15  ;;  %v1188_v17 = vsub.f32 %v3145_v37, %v1168_v59  ;;  %650 = vadd.xlane.f32.xlu1 %v3383_v52  ;;  %v3870_v37 = vld [vmem:[#allocation28_spill] sm:$0xff] }
 0x1e4   :  { %v598_v42 = vsub.f32 %v3141_v6, %v579_v20  ;;  %2452 = vpow2.f32 %v1213_v5 }
 0x1e5   :  { %v3389_v4 = vpop.eup %2442  ;;  %v1215_v23 = vmul.f32 1.442695, %v1188_v17 }
 0x1e6   :  { %v626_v30 = vmul.f32 1.442695, %v598_v42  ;;  %v3391_v55 = vpop.eup %2444  ;;  %v581_v16 = vpop.xlane.xlu1 %580  ;;  %652 = vadd.xlane.f32.xlu0 %v3389_v4 }
 0x1e7   :  { %v1170_v51 = vpop.xlane.xlu0 %1169  ;;  %2454 = vpow2.f32 %v1215_v23  ;;  %v599_v33 = vsub.f32 %v3869_v40, %v581_v16  ;;  %1241 = vadd.xlane.f32.xlu1 %v3391_v55 }
 0x1e8   :  { %v1189_v41 = vsub.f32 %v3870_v37, %v1170_v51  ;;  %2456 = vpow2.f32 %v626_v30 }
 0x1e9   :  { %v3397_v6 = vpop.eup %2446  ;;  %v628_v32 = vmul.f32 1.442695, %v599_v33  ;;  %v3873_v33 = vld [vmem:[#allocation11_spill] sm:$0xff] }
 0x1ea   :  { %v1217_v8 = vmul.f32 1.442695, %v1189_v41  ;;  %v3399_v10 = vpop.eup %2448  ;;  %v1172_v13 = vpop.xlane.xlu1 %1171  ;;  %1243 = vadd.xlane.f32.xlu0 %v3397_v6 }
 0x1eb   :  { %v583_v15 = vpop.xlane.xlu0 %582  ;;  %2458 = vpow2.f32 %v628_v32  ;;  %v1190_v5 = vsub.f32 %v3160_v12, %v1172_v13  ;;  %654 = vadd.xlane.f32.xlu1 %v3399_v10  ;;  %v3872_v12 = vld [vmem:[#allocation29_spill] sm:$0xff] }
 0x1ec   :  { %v600_v59 = vsub.f32 %v3163_v22, %v583_v15  ;;  %2460 = vpow2.f32 %v1217_v8  ;;  %v3874_v22 = vld [vmem:[#allocation2_spill] sm:$0xff] }
 0x1ed   :  { %v3405_v20 = vpop.eup %2450  ;;  %v1219_v17 = vmul.f32 1.442695, %v1190_v5  ;;  %v286_v37 = vsub.f32 %v3874_v22, %v3873_v33 }
 0x1ee   :  { %v630_v42 = vmul.f32 1.442695, %v600_v59  ;;  %v3407_v23 = vpop.eup %2452  ;;  %v585_v30 = vpop.xlane.xlu1 %584  ;;  %656 = vadd.xlane.f32.xlu0 %v3405_v20  ;;  %v3876_v59 = vld [vmem:[#allocation12_spill] sm:$0xff] }
 0x1ef   :  { %3871 = vst [vmem:[#allocation20_spill] sm:$0xff] %v3407_v23  ;;  %v1174_v16 = vpop.xlane.xlu0 %1173  ;;  %2462 = vpow2.f32 %v1219_v17  ;;  %v601_v51 = vsub.f32 %v3170_v0, %v585_v30  ;;  %1245 = vadd.xlane.f32.xlu1 %v3407_v23  ;;  %v3877_v0 = vld [vmem:[#allocation4_spill] sm:$0xff] }
 0x1f0   :  { %v1191_v40 = vsub.f32 %v3872_v12, %v1174_v16  ;;  %2464 = vpow2.f32 %v630_v42  ;;  %v287_v17 = vsub.f32 %v3877_v0, %v3876_v59  ;;  %v302_v16 = vmul.f32 1.442695, %v286_v37  ;;  %v3878_v42 = vld [vmem:[#allocation30_spill] sm:$0xff]  ;;  %v3881_v37 = vld [vmem:[#allocation3_spill] sm:$0xff] }
 0x1f1   :  { %v3415_v41 = vpop.eup %2454  ;;  %v632_v32 = vmul.f32 1.442695, %v601_v51 }
 0x1f2   :  { %3875 = vst [vmem:[#allocation21_spill] sm:$0xff] %v3415_v41  ;;  %v1221_v8 = vmul.f32 1.442695, %v1191_v40  ;;  %v3417_v13 = vpop.eup %2456  ;;  %v1176_v15 = vpop.xlane.xlu1 %1175  ;;  %1247 = vadd.xlane.f32.xlu0 %v3415_v41  ;;  %v304_v23 = vmul.f32 1.442695, %v287_v17  ;;  %v3884_v17 = vld [vmem:[#allocation15_spill] sm:$0xff] }
 0x1f3   :  { %v1608_v5 = vpop.xlane.xlu0 %1607  ;;  %2466 = vpow2.f32 %v632_v32  ;;  %v1192_v30 = vsub.f32 %v3183_v43, %v1176_v15  ;;  %658 = vadd.xlane.f32.xlu1 %v3417_v13  ;;  %v3880_v43 = vld [vmem:[#allocation13_spill] sm:$0xff] }
 0x1f4   :  { %2468 = vpow2.f32 %v1221_v8  ;;  %v1639_v12 = vsub.f32 %v3878_v42, %v1608_v5  ;;  %v288_v8 = vsub.f32 %v3881_v37, %v3880_v43  ;;  %v3885_v42 = vld [vmem:[#allocation6_spill] sm:$0xff] }
 0x1f5   :  { %v3425_v51 = vpop.eup %2458  ;;  %v1223_v40 = vmul.f32 1.442695, %v1192_v30 }
 0x1f6   :  { %v3427_v33 = vpop.eup %2460  ;;  %v1610_v22 = vpop.xlane.xlu1 %1609  ;;  %660 = vadd.xlane.f32.xlu0 %v3425_v51  ;;  %v1655_v15 = vmul.f32 1.442695, %v1639_v12 }
 0x1f7   :  { %3879 = vst [vmem:[#allocation22_spill] sm:$0xff] %v3427_v33  ;;  %v1612_v41 = vpop.xlane.xlu0 %1611  ;;  %2470 = vpow2.f32 %v1223_v40  ;;  %v1640_v32 = vsub.f32 %v3189_v9, %v1610_v22  ;;  %1249 = vadd.xlane.f32.xlu1 %v3427_v33  ;;  %v289_v40 = vsub.f32 %v3885_v42, %v3884_v17 }
 0x1f8   :  { %2472 = vpow2.f32 %v302_v16  ;;  %v306_v16 = vmul.f32 1.442695, %v288_v8  ;;  %v1641_v22 = vsub.f32 %v3193_v25, %v1612_v41  ;;  %v3888_v8 = vld [vmem:[#allocation5_spill] sm:$0xff] }
 0x1f9   :  { %v3434_v5 = vpop.eup %2462  ;;  %2474 = vpow2.f32 %v304_v23  ;;  %v1657_v9 = vmul.f32 1.442695, %v1640_v32  ;;  %v308_v33 = vmul.f32 1.442695, %v289_v40  ;;  %v3887_v32 = vld [vmem:[#allocation14_spill] sm:$0xff]  ;;  %v3891_v40 = vld [vmem:[#allocation17_spill] sm:$0xff] }
 0x1fa   :  { %3882 = vst [vmem:[#allocation23_spill] sm:$0xff] %v3434_v5  ;;  %v3436_v59 = vpop.eup %2464  ;;  %v1614_v0 = vpop.xlane.xlu1 %1613  ;;  %1251 = vadd.xlane.f32.xlu0 %v3434_v5  ;;  %2476 = vpow2.f32 %v1655_v15  ;;  %v290_v15 = vsub.f32 %v3888_v8, %v3887_v32  ;;  %v1659_v17 = vmul.f32 1.442695, %v1641_v22 }
 0x1fb   :  { %3883 = vst [vmem:[#allocation24_spill] sm:$0xff] %v3436_v59  ;;  %v1616_v30 = vpop.xlane.xlu0 %1615  ;;  %662 = vadd.xlane.f32.xlu1 %v3436_v59  ;;  %2478 = vpow2.f32 %v1657_v9  ;;  %v1642_v23 = vsub.f32 %v3203_v1, %v1614_v0  ;;  %v3892_v9 = vld [vmem:[#allocation7_spill] sm:$0xff] }
 0x1fc   :  { %2480 = vpow2.f32 %v306_v16  ;;  %v291_v59 = vsub.f32 %v3892_v9, %v3891_v40  ;;  %v310_v0 = vmul.f32 1.442695, %v290_v15  ;;  %v1643_v16 = vsub.f32 %v3200_v61, %v1616_v30  ;;  %v3896_v40 = vld [vmem:[#allocation8_spill] sm:$0xff]  ;;  %v3475_v30 = vld [vmem:[%s3786_s3] sm:$0xff]  }
 0x1fd   :  { %v3443_v12 = vpop.eup %2466  ;;  %2482 = vpow2.f32 %v308_v33  ;;  %v1661_v1 = vmul.f32 1.442695, %v1642_v23  ;;  %v3895_v23 = vld [vmem:[#allocation16_spill] sm:$0xff]  ;;  %2206 = vmatprep.subr.bf16.mxu1 %v3475_v30 }
 0x1fe   :  { %3886 = vst [vmem:[#allocation25_spill] sm:$0xff] %v3443_v12  ;;  %v3445_v43 = vpop.eup %2468  ;;  %v1618_v37 = vpop.xlane.xlu1 %1617  ;;  %664 = vadd.xlane.f32.xlu0 %v3443_v12  ;;  %2484 = vpow2.f32 %v1659_v17  ;;  %v292_v15 = vsub.f32 %v3896_v40, %v3895_v23  ;;  %v1663_v17 = vmul.f32 1.442695, %v1643_v16 }
 0x1ff   :  { %v1620_v5 = vpop.xlane.xlu0 %1619  ;;  %1253 = vadd.xlane.f32.xlu1 %v3445_v43  ;;  %2486 = vpow2.f32 %v1661_v1  ;;  %v1644_v33 = vsub.f32 %v3212_v19, %v1618_v37  ;;  %v3899_v19 = vld [vmem:[#allocation19_spill] sm:$0xff] }
 0x200   :  { %2488 = vpow2.f32 %v310_v0  ;;  %v314_v16 = vmul.f32 1.442695, %v292_v15  ;;  %v1645_v23 = vsub.f32 %v3209_v18, %v1620_v5  ;;  %v3901_v18 = vld [vmem:[#allocation18_spill] sm:$0xff] }
 0x201   :  { %v3452_v25 = vpop.eup %2470  ;;  %v1665_v1 = vmul.f32 1.442695, %v1644_v33  ;;  %v3902_v5 = vld [vmem:[#allocation10_spill] sm:$0xff] }
 0x202   :  { %3889 = vst [vmem:[#allocation26_spill] sm:$0xff] %v3452_v25  ;;  %v3454_v41 = vpop.eup %2472  ;;  %v1622_v42 = vpop.xlane.xlu1 %1621  ;;  %1255 = vadd.xlane.f32.xlu0 %v3452_v25  ;;  %v312_v25 = vmul.f32 1.442695, %v291_v59  ;;  %v3900_v59 = vld [vmem:[#allocation9_spill] sm:$0xff]  ;;  %v294_v15 = vsub.f32 %v3902_v5, %v3901_v18 }
 0x203   :  { %3890 = vst [vmem:[#allocation27_spill] sm:$0xff] %v3454_v41  ;;  %v273_v12 = vpop.xlane.xlu0 %272  ;;  %334 = vadd.xlane.f32.xlu1 %v3454_v41  ;;  %v3461_v22 = vpop.eup %2474  ;;  %v293_v37 = vsub.f32 %v3900_v59, %v3899_v19  ;;  %v1646_v59 = vsub.f32 %v3217_v35, %v1622_v42 }
 0x204   :  { %3893 = vst [vmem:[#allocation28_spill] sm:$0xff] %v3461_v22  ;;  %v3463_v32 = vpop.eup %2476  ;;  %2490 = vpow2.f32 %v312_v25  ;;  %v295_v35 = vsub.f32 %v2910_v29, %v273_v12  ;;  %v318_v42 = vmul.f32 1.442695, %v294_v15 }
 0x205   :  { %3894 = vst [vmem:[#allocation29_spill] sm:$0xff] %v3463_v32  ;;  %v3470_v61 = vpop.eup %2478  ;;  %2492 = vpow2.f32 %v1663_v17  ;;  %v316_v33 = vmul.f32 1.442695, %v293_v37  ;;  %v1667_v17 = vmul.f32 1.442695, %v1645_v23 }
 0x206   :  { %v1624_v8 = vpop.xlane.xlu1 %1623  ;;  %336 = vadd.xlane.f32.xlu0 %v3461_v22  ;;  %3897 = vst [vmem:[#allocation11_spill] sm:$0xff] %v3470_v61  ;;  %v3477_v22 = vpop.eup %2480  ;;  %2494 = vpow2.f32 %v1665_v1  ;;  %v1669_v37 = vmul.f32 1.442695, %v1646_v59  ;;  %v320_v5 = vmul.f32 1.442695, %v295_v35 }
 0x207   :  { %1687 = vadd.xlane.f32.xlu1 %v3463_v32  ;;  %v1626_v9 = vpop.xlane.xlu0 %1625  ;;  %3898 = vst [vmem:[#allocation2_spill] sm:$0xff] %v3477_v22  ;;  %v3485_v40 = vpop.eup %2482  ;;  %2496 = vpow2.f32 %v314_v16  ;;  %v1647_v1 = vsub.f32 %v3224_v44, %v1624_v8 }
 0x208   :  { %v3492_v25 = vpop.eup %2484  ;;  %2498 = vpow2.f32 %v316_v33  ;;  %v1648_v33 = vsub.f32 %v3227_v14, %v1626_v9 }
 0x209   :  { %2500 = vpow2.f32 %v1667_v17  ;;  %v1671_v29 = vmul.f32 1.442695, %v1647_v1 }
 0x20a   :  { %1689 = vadd.xlane.f32.xlu0 %v3470_v61  ;;  %v275_v0 = vpop.xlane.xlu1 %274  ;;  %v3490_v61 = vld [vmem:[%s3786_s3 + $0xc0] sm:$0xff]   ;;  %2502 = vpow2.f32 %v1669_v37  ;;  %v1673_v17 = vmul.f32 1.442695, %v1648_v33 }
 0x20b   :  { %338 = vadd.xlane.f32.xlu1 %v3477_v22  ;;  %v277_v19 = vpop.xlane.xlu0 %276  ;;  %2270 = vmatprep.subr.bf16.mxu0 %v3490_v61  ;;  %v3500_v22 = vpop.eup %2486  ;;  %2504 = vpow2.f32 %v318_v42  ;;  %v296_v12 = vsub.f32 %v2924_v63, %v275_v0 }
 0x20c   :  { %v3502_v41 = vpop.eup %2488  ;;  %2506 = vpow2.f32 %v320_v5  ;;  %v297_v37 = vsub.f32 %v2927_v58, %v277_v19 }
 0x20d   :  { %2508 = vpow2.f32 %v1671_v29  ;;  %v322_v14 = vmul.f32 1.442695, %v296_v12 }
 0x20e   :  { %340 = vadd.xlane.f32.xlu0 %v3485_v40  ;;  %v1628_v32 = vpop.xlane.xlu1 %1627  ;;  %v3508_v18 = vpop.eup %2490  ;;  %2510 = vpow2.f32 %v1673_v17  ;;  %v324_v42 = vmul.f32 1.442695, %v297_v37 }
 0x20f   :  { %1691 = vadd.xlane.f32.xlu1 %v3492_v25  ;;  %v1630_v16 = vpop.xlane.xlu0 %1629  ;;  %v3510_v23 = vpop.eup %2492  ;;  %v1649_v9 = vsub.f32 %v3236_v27, %v1628_v32  ;;  %2512 = vpow2.f32 %v322_v14 }
 0x210   :  { %v3516_v15 = vpop.eup %2494  ;;  %v1650_v1 = vsub.f32 %v3239_v26, %v1630_v16  ;;  %2514 = vpow2.f32 %v324_v42 }
 0x211   :  { %v3518_v44 = vpop.eup %2496  ;;  %v1675_v58 = vmul.f32 1.442695, %v1649_v9 }
 0x212   :  { %1693 = vadd.xlane.f32.xlu0 %v3500_v22  ;;  %v279_v59 = vpop.xlane.xlu1 %278  ;;  %v3524_v35 = vpop.eup %2498  ;;  %v1677_v32 = vmul.f32 1.442695, %v1650_v1 }
 0x213   :  { %342 = vadd.xlane.f32.xlu1 %v3502_v41  ;;  %v281_v8 = vpop.xlane.xlu0 %280  ;;  %v3526_v0 = vpop.eup %2500  ;;  %v298_v19 = vsub.f32 %v2936_v49, %v279_v59  ;;  %2516 = vpow2.f32 %v1675_v58 }
 0x214   :  { %v3532_v33 = vpop.eup %2502  ;;  %v299_v29 = vsub.f32 %v2939_v48, %v281_v8  ;;  %2518 = vpow2.f32 %v1677_v32 }
 0x215   :  { %v3534_v27 = vpop.eup %2504  ;;  %v326_v26 = vmul.f32 1.442695, %v298_v19 }
 0x216   :  { %344 = vadd.xlane.f32.xlu0 %v3508_v18  ;;  %v1632_v63 = vpop.xlane.xlu1 %1631  ;;  %v3540_v17 = vpop.eup %2506  ;;  %v328_v37 = vmul.f32 1.442695, %v299_v29 }
 0x217   :  { %1695 = vadd.xlane.f32.xlu1 %v3510_v23  ;;  %v1634_v5 = vpop.xlane.xlu0 %1633  ;;  %v1651_v16 = vsub.f32 %v3248_v53, %v1632_v63  ;;  %v3542_v49 = vpop.eup %2508  ;;  %2520 = vpow2.f32 %v326_v26 }
 0x218   :  { %v1652_v14 = vsub.f32 %v3251_v38, %v1634_v5  ;;  %v3548_v9 = vpop.eup %2510  ;;  %2522 = vpow2.f32 %v328_v37 }
 0x219   :  { %v1679_v48 = vmul.f32 1.442695, %v1651_v16  ;;  %v3550_v63 = vpop.eup %2512 }
 0x21a   :  { %1697 = vadd.xlane.f32.xlu0 %v3516_v15  ;;  %v283_v12 = vpop.xlane.xlu1 %282  ;;  %v1681_v42 = vmul.f32 1.442695, %v1652_v14  ;;  %v3556_v5 = vpop.eup %2514 }
 0x21b   :  { %346 = vadd.xlane.f32.xlu1 %v3518_v44  ;;  %v285_v59 = vpop.xlane.xlu0 %284  ;;  %v300_v8 = vsub.f32 %v2942_v31, %v283_v12  ;;  %2524 = vpow2.f32 %v1679_v48 }
 0x21c   :  { %v301_v1 = vsub.f32 %v2945_v34, %v285_v59  ;;  %2526 = vpow2.f32 %v1681_v42 }
 0x21d   :  { %v330_v38 = vmul.f32 1.442695, %v300_v8  ;;  %v3558_v31 = vpop.eup %2516 }
 0x21e   :  { %348 = vadd.xlane.f32.xlu0 %v3524_v35  ;;  %v1636_v53 = vpop.xlane.xlu1 %1635  ;;  %v332_v32 = vmul.f32 1.442695, %v301_v1  ;;  %v3563_v12 = vpop.eup %2518 }
 0x21f   :  { %1699 = vadd.xlane.f32.xlu1 %v3526_v0  ;;  %v1653_v58 = vsub.f32 %v3258_v47, %v1636_v53  ;;  %v1638_v19 = vpop.xlane.xlu0 %1637  ;;  %2528 = vpow2.f32 %v330_v38 }
 0x220   :  { %v1654_v29 = vsub.f32 %v3261_v60, %v1638_v19  ;;  %2530 = vpow2.f32 %v332_v32 }
 0x221   :  { %v1683_v34 = vmul.f32 1.442695, %v1653_v58  ;;  %v3565_v26 = vpop.eup %2520 }
 0x222   :  { %1701 = vadd.xlane.f32.xlu0 %v3532_v33  ;;  %v1685_v47 = vmul.f32 1.442695, %v1654_v29  ;;  %v3569_v16 = vpop.eup %2522 }
 0x223   :  { %350 = vadd.xlane.f32.xlu1 %v3534_v27  ;;  %2532 = vpow2.f32 %v1683_v34 }
 0x224   :  { %2534 = vpow2.f32 %v1685_v47 }
 0x225   :  { %v3571_v59 = vpop.eup %2524 }
 0x226   :  { %352 = vadd.xlane.f32.xlu0 %v3540_v17  ;;  %3903 = vst [vmem:[#allocation12_spill] sm:$0xff] %v3571_v59  ;;  %v3575_v60 = vpop.eup %2526 }
 0x227   :  { %1703 = vadd.xlane.f32.xlu1 %v3542_v49  ;;  %3904 = vst [vmem:[#allocation4_spill] sm:$0xff] %v3575_v60 }
 0x229   :  { %v3577_v37 = vpop.eup %2528 }
 0x22a   :  { %1705 = vadd.xlane.f32.xlu0 %v3548_v9  ;;  %3905 = vst [vmem:[#allocation30_spill] sm:$0xff] %v3577_v37  ;;  %v3581_v14 = vpop.eup %2530 }
 0x22b   :  { %354 = vadd.xlane.f32.xlu1 %v3550_v63  ;;  %3906 = vst [vmem:[#allocation13_spill] sm:$0xff] %v3581_v14 }
 0x22d   :  { %v3583_v48 = vpop.eup %2532 }
 0x22e   :  { %356 = vadd.xlane.f32.xlu0 %v3556_v5  ;;  %3907 = vst [vmem:[#allocation3_spill] sm:$0xff] %v3583_v48  ;;  %v3587_v8 = vpop.eup %2534 }
 0x22f   :  { %1707 = vadd.xlane.f32.xlu1 %v3558_v31  ;;  %3908 = vst [vmem:[#allocation15_spill] sm:$0xff] %v3587_v8 }
 0x232   :  { %1709 = vadd.xlane.f32.xlu0 %v3563_v12 }
 0x233   :  { %358 = vadd.xlane.f32.xlu1 %v3565_v26  ;;  %v637_v53 = vpop.xlane.xlu0 %636 }
 0x234   :  { %2536 = vrcp.f32 %v637_v53 }
 0x236   :  { %360 = vadd.xlane.f32.xlu0 %v3569_v16 }
 0x237   :  { %1711 = vadd.xlane.f32.xlu1 %v3571_v59 }
 0x23a   :  { %1713 = vadd.xlane.f32.xlu0 %v3575_v60 }
 0x23b   :  { %362 = vadd.xlane.f32.xlu1 %v3577_v37 }
 0x23e   :  { %364 = vadd.xlane.f32.xlu0 %v3581_v14  ;;  %v2537_v32 = vpop.eup %2536 }
 0x23f   :  { %1715 = vadd.xlane.f32.xlu1 %v3583_v48  ;;  %v683_v14 = vmul.f32 %v2537_v32, %v3266_v24  ;;  %v2394_v32 = vld [vmem:[%s3786_s3 + $0x8] sm:$0xff]  }
 0x242   :  { %1717 = vadd.xlane.f32.xlu0 %v3587_v8 }
 0x246   :  { %v635_v42 = vpop.xlane.xlu1 %634 }
 0x247   :  { %2538 = vrcp.f32 %v635_v42 }
 0x24a   :  { %v1226_v1 = vpop.xlane.xlu1 %1225  ;;  %v1228_v38 = vpop.xlane.xlu0 %1227 }
 0x24b   :  { %2540 = vrcp.f32 %v1226_v1 }
 0x24c   :  { %2542 = vrcp.f32 %v1228_v38 }
 0x24e   :  { %v639_v58 = vpop.xlane.xlu1 %638  ;;  %v641_v19 = vpop.xlane.xlu0 %640 }
 0x24f   :  { %2544 = vrcp.f32 %v639_v58 }
 0x250   :  { %2546 = vrcp.f32 %v641_v19 }
 0x251   :  { %v2539_v29 = vpop.eup %2538 }
 0x252   :  { %v1230_v34 = vpop.xlane.xlu1 %1229  ;;  %v1232_v47 = vpop.xlane.xlu0 %1231  ;;  %v682_v48 = vmul.f32 %v2539_v29, %v3278_v21 }
 0x253   :  { %2548 = vrcp.f32 %v1230_v34  ;;  %v2397_v34 = vld [vmem:[%s3786_s3 + $0x18] sm:$0xff]  }
 0x254   :  { %2550 = vrcp.f32 %v1232_v47  ;;  %v698_v53 = vpack.c.bf16 %v683_v14, %v682_v48  ;;  %v2398_v47 = vld [vmem:[%s3786_s3 + $0xd0] sm:$0xff]  }
 0x255   :  { %v2541_v42 = vpop.eup %2540 }
 0x256   :  { %v2543_v8 = vpop.eup %2542  ;;  %v643_v37 = vpop.xlane.xlu1 %642  ;;  %2190 = vmatprep.mubr.bf16.mxu1 %v698_v53  ;;  %v1273_v38 = vmul.f32 %v2541_v42, %v3282_v50 }
 0x257   :  { %v645_v1 = vpop.xlane.xlu0 %644  ;;  %2552 = vrcp.f32 %v643_v37  ;;  %v1274_v58 = vmul.f32 %v2543_v8, %v3284_v45 }
 0x258   :  { %2554 = vrcp.f32 %v645_v1 }
 0x259   :  { %v2545_v19 = vpop.eup %2544  ;;  %v1289_v60 = vpack.c.bf16 %v1274_v58, %v1273_v38  ;;  %v2401_v38 = vld [vmem:[%s3786_s3 + $0x28] sm:$0xff]   ;;  %v2402_v58 = vld [vmem:[%s3786_s3 + $0xe0] sm:$0xff]  }
 0x25a   :  { %v2547_v59 = vpop.eup %2546  ;;  %v684_v21 = vmul.f32 %v2545_v19, %v3292_v28  ;;  %v1234_v8 = vpop.xlane.xlu1 %1233 }
 0x25b   :  { %2254 = vmatprep.mubr.bf16.mxu0 %v1289_v60  ;;  %v685_v24 = vmul.f32 %v2547_v59, %v3300_v11  ;;  %v2395_v11 = vld [vmem:[%s3786_s3 + $0x10] sm:$0xff]   ;;  %v2396_v59 = vld [vmem:[%s3786_s3 + $0xc8] sm:$0xff]   ;;  %2556 = vrcp.f32 %v1234_v8 }
 0x25d   :  { %v2549_v14 = vpop.eup %2548  ;;  %v699_v48 = vpack.c.bf16 %v685_v24, %v684_v21 }
 0x25e   :  { %v2551_v29 = vpop.eup %2550  ;;  %v1275_v50 = vmul.f32 %v2549_v14, %v3310_v7  ;;  %v647_v53 = vpop.xlane.xlu1 %646  ;;  %v2403_v14 = vld [vmem:[%s3786_s3 + $0x30] sm:$0xff]  }
 0x25f   :  { %2191 = vmatmul.mubr.bf16.vlgmr.msra.gmra.mrb[0].mxu1 %v699_v48  ;;  %v1276_v45 = vmul.f32 %v2551_v29, %v3312_v54  ;;  %v2404_v48 = vld [vmem:[%s3786_s3 + $0xe8] sm:$0xff]  }
 0x260   :  { %2207 = vmatpush3.bf16.msra.mxu1 %v3475_v30 }
 0x261   :  { %v2553_v37 = vpop.eup %2552  ;;  %v1290_v28 = vpack.c.bf16 %v1276_v45, %v1275_v50  ;;  %2208 = vmatprep.subr.bf16.mxu1 %v2394_v32 }
 0x262   :  { %v2555_v60 = vpop.eup %2554  ;;  %v686_v7 = vmul.f32 %v2553_v37, %v3316_v46 }
 0x263   :  { %2255 = vmatmul.mubr.bf16.vlgmr.msra.gmra.mrb[0].mxu0 %v1290_v28  ;;  %v687_v54 = vmul.f32 %v2555_v60, %v3324_v57  ;;  %v2399_v57 = vld [vmem:[%s3786_s3 + $0x20] sm:$0xff]  }
 0x264   :  { %2209 = vmatpush3.bf16.msra.mxu1 %v2394_v32  ;;  %2271 = vmatpush3.bf16.msra.mxu0 %v3490_v61  ;;  %v2400_v61 = vld [vmem:[%s3786_s3 + $0xd8] sm:$0xff]  }
 0x265   :  { %v700_v30 = vpack.c.bf16 %v687_v54, %v686_v7  ;;  %2210 = vmatprep.subr.bf16.mxu1 %v2395_v11  ;;  %2272 = vmatprep.subr.bf16.mxu0 %v2396_v59  ;;  %v2557_v21 = vpop.eup %2556 }
 0x266   :  { %v1277_v50 = vmul.f32 %v2557_v21, %v3329_v3 }
 0x267   :  { %2194 = vmatprep.mubr.bf16.mxu1 %v700_v30  ;;  %v1236_v46 = vpop.xlane.xlu0 %1235 }
 0x268   :  { %2558 = vrcp.f32 %v1236_v46  ;;  %2211 = vmatpush3.bf16.msra.mxu1 %v2395_v11  ;;  %2273 = vmatpush3.bf16.msra.mxu0 %v2396_v59  ;;  %v2405_v11 = vld [vmem:[%s3786_s3 + $0x38] sm:$0xff]   ;;  %v2406_v59 = vld [vmem:[%s3786_s3 + $0xf0] sm:$0xff]  }
 0x269   :  { %2212 = vmatprep.subr.bf16.mxu1 %v2397_v34  ;;  %2274 = vmatprep.subr.bf16.mxu0 %v2398_v47  ;;  %2560 = vrcp.f32 %v647_v53 }
 0x26b   :  { %v649_v42 = vpop.xlane.xlu0 %648 }
 0x26c   :  { %v1238_v1 = vpop.xlane.xlu1 %1237  ;;  %2562 = vrcp.f32 %v649_v42  ;;  %2213 = vmatpush3.bf16.msra.mxu1 %v2397_v34  ;;  %2275 = vmatpush3.bf16.msra.mxu0 %v2398_v47  ;;  %v2407_v47 = vld [vmem:[%s3786_s3 + $0xf8] sm:$0xff]  }
 0x26d   :  { %2214 = vmatprep.subr.bf16.mxu1 %v2399_v57  ;;  %2276 = vmatprep.subr.bf16.mxu0 %v2400_v61  ;;  %2564 = vrcp.f32 %v1238_v1 }
 0x26f   :  { %v1240_v19 = vpop.xlane.xlu0 %1239 }
 0x270   :  { %v651_v24 = vpop.xlane.xlu1 %650  ;;  %2566 = vrcp.f32 %v1240_v19  ;;  %2215 = vmatpush3.bf16.msra.mxu1 %v2399_v57  ;;  %2277 = vmatpush3.bf16.msra.mxu0 %v2400_v61 }
 0x271   :  { %2216 = vmatprep.subr.bf16.mxu1 %v2401_v38  ;;  %2278 = vmatprep.subr.bf16.mxu0 %v2402_v58  ;;  %2568 = vrcp.f32 %v651_v24 }
 0x272   :  { %v2559_v32 = vpop.eup %2558 }
 0x273   :  { %v653_v29 = vpop.xlane.xlu0 %652  ;;  %v1278_v45 = vmul.f32 %v2559_v32, %v3365_v2  ;;  %v2561_v37 = vpop.eup %2560 }
 0x274   :  { %v1242_v8 = vpop.xlane.xlu1 %1241  ;;  %2570 = vrcp.f32 %v653_v29  ;;  %2217 = vmatpush3.bf16.msra.mxu1 %v2401_v38  ;;  %2279 = vmatpush3.bf16.msra.mxu0 %v2402_v58  ;;  %v688_v2 = vmul.f32 %v2561_v37, %v3340_v62 }
 0x275   :  { %v1291_v28 = vpack.c.bf16 %v1278_v45, %v1277_v50  ;;  %2218 = vmatprep.subr.bf16.mxu1 %v2403_v14  ;;  %2280 = vmatprep.subr.bf16.mxu0 %v2404_v48  ;;  %2572 = vrcp.f32 %v1242_v8 }
 0x276   :  { %v2563_v60 = vpop.eup %2562 }
 0x277   :  { %2258 = vmatprep.mubr.bf16.mxu0 %v1291_v28  ;;  %v1244_v3 = vpop.xlane.xlu0 %1243  ;;  %v689_v7 = vmul.f32 %v2563_v60, %v3373_v56  ;;  %v2565_v54 = vpop.eup %2564 }
 0x278   :  { %v655_v30 = vpop.xlane.xlu1 %654  ;;  %2574 = vrcp.f32 %v1244_v3  ;;  %2219 = vmatpush3.bf16.msra.mxu1 %v2403_v14  ;;  %2281 = vmatpush3.bf16.msra.mxu0 %v2404_v48  ;;  %v1279_v62 = vmul.f32 %v2565_v54, %v3375_v39 }
 0x279   :  { %v701_v34 = vpack.c.bf16 %v689_v7, %v688_v2  ;;  %2220 = vmatprep.subr.bf16.mxu1 %v2405_v11  ;;  %2282 = vmatprep.subr.bf16.mxu0 %v2406_v59  ;;  %2576 = vrcp.f32 %v655_v30  ;;  %v3910_v2 = vld [vmem:[#allocation21_spill] sm:$0xff] }
 0x27a   :  { %v2567_v53 = vpop.eup %2566 }
 0x27b   :  { %2195 = vmatmul.mubr.bf16.gmra.mrb[4].mxu1 %v701_v34  ;;  %v657_v46 = vpop.xlane.xlu0 %656  ;;  %v1280_v56 = vmul.f32 %v2567_v53, %v3381_v36  ;;  %v2569_v57 = vpop.eup %2568 }
 0x27c   :  { %v1246_v61 = vpop.xlane.xlu1 %1245  ;;  %2578 = vrcp.f32 %v657_v46  ;;  %2221 = vmatpush3.bf16.msra.mxu1 %v2405_v11  ;;  %2283 = vmatpush3.bf16.msra.mxu0 %v2406_v59  ;;  %v690_v58 = vmul.f32 %v2569_v57, %v3383_v52 }
 0x27d   :  { %v1292_v42 = vpack.c.bf16 %v1280_v56, %v1279_v62  ;;  %2284 = vmatprep.subr.bf16.mxu0 %v2407_v47  ;;  %2580 = vrcp.f32 %v1246_v61 }
 0x27e   :  { %v2571_v1 = vpop.eup %2570 }
 0x27f   :  { %2259 = vmatmul.mubr.bf16.gmra.mrb[4].mxu0 %v1292_v42  ;;  %v1248_v38 = vpop.xlane.xlu0 %1247  ;;  %v691_v19 = vmul.f32 %v2571_v1, %v3389_v4  ;;  %v2573_v21 = vpop.eup %2572  ;;  %v3911_v42 = vld [vmem:[#allocation22_spill] sm:$0xff] }
 0x280   :  { %v659_v24 = vpop.xlane.xlu1 %658  ;;  %2582 = vrcp.f32 %v1248_v38  ;;  %2285 = vmatpush3.bf16.msra.mxu0 %v2407_v47  ;;  %v1281_v48 = vmul.f32 %v2573_v21, %v3391_v55  ;;  %v3912_v38 = vld [vmem:[#allocation23_spill] sm:$0xff] }
 0x281   :  { %v702_v39 = vpack.c.bf16 %v691_v19, %v690_v58  ;;  %2584 = vrcp.f32 %v659_v24 }
 0x282   :  { %v2575_v36 = vpop.eup %2574 }
 0x283   :  { %2198 = vmatprep.mubr.bf16.mxu1 %v702_v39  ;;  %v661_v14 = vpop.xlane.xlu0 %660  ;;  %v1282_v32 = vmul.f32 %v2575_v36, %v3397_v6  ;;  %v2577_v29 = vpop.eup %2576  ;;  %v3909_v6 = vld [vmem:[#allocation20_spill] sm:$0xff] }
 0x284   :  { %v1250_v50 = vpop.xlane.xlu1 %1249  ;;  %2586 = vrcp.f32 %v661_v14  ;;  %v692_v37 = vmul.f32 %v2577_v29, %v3399_v10  ;;  %v3914_v14 = vld [vmem:[#allocation25_spill] sm:$0xff] }
 0x285   :  { %v1293_v45 = vpack.c.bf16 %v1282_v32, %v1281_v48  ;;  %2588 = vrcp.f32 %v1250_v50 }
 0x286   :  { %v2579_v52 = vpop.eup %2578 }
 0x287   :  { %2262 = vmatprep.mubr.bf16.mxu0 %v1293_v45  ;;  %v1252_v4 = vpop.xlane.xlu0 %1251  ;;  %v693_v8 = vmul.f32 %v2579_v52, %v3405_v20  ;;  %v2581_v28 = vpop.eup %2580 }
 0x288   :  { %v663_v11 = vpop.xlane.xlu1 %662  ;;  %2590 = vrcp.f32 %v1252_v4  ;;  %v1283_v3 = vmul.f32 %v2581_v28, %v3909_v6  ;;  %v3916_v6 = vld [vmem:[#allocation27_spill] sm:$0xff] }
 0x289   :  { %v703_v59 = vpack.c.bf16 %v693_v8, %v692_v37  ;;  %2592 = vrcp.f32 %v663_v11  ;;  %v3915_v37 = vld [vmem:[#allocation26_spill] sm:$0xff] }
 0x28a   :  { %v2583_v60 = vpop.eup %2582 }
 0x28b   :  { %2199 = vmatmul.mubr.bf16.gmra.mrb[8].mxu1 %v703_v59  ;;  %v665_v55 = vpop.xlane.xlu0 %664  ;;  %v1284_v7 = vmul.f32 %v2583_v60, %v3910_v2  ;;  %v2585_v54 = vpop.eup %2584  ;;  %v3917_v2 = vld [vmem:[#allocation28_spill] sm:$0xff] }
 0x28c   :  { %v1254_v30 = vpop.xlane.xlu1 %1253  ;;  %2594 = vrcp.f32 %v665_v55  ;;  %v694_v20 = vmul.f32 %v2585_v54, %v3417_v13 }
 0x28d   :  { %v1294_v34 = vpack.c.bf16 %v1284_v7, %v1283_v3  ;;  %2596 = vrcp.f32 %v1254_v30 }
 0x28e   :  { %v2587_v47 = vpop.eup %2586 }
 0x28f   :  { %2263 = vmatmul.mubr.bf16.gmra.mrb[8].mxu0 %v1294_v34  ;;  %v1256_v10 = vpop.xlane.xlu0 %1255  ;;  %v695_v53 = vmul.f32 %v2587_v47, %v3425_v51  ;;  %v2589_v46 = vpop.eup %2588  ;;  %v3913_v51 = vld [vmem:[#allocation24_spill] sm:$0xff] }
 0x290   :  { %v335_v62 = vpop.xlane.xlu1 %334  ;;  %2598 = vrcp.f32 %v1256_v10  ;;  %v1285_v1 = vmul.f32 %v2589_v46, %v3911_v42  ;;  %v3918_v10 = vld [vmem:[#allocation29_spill] sm:$0xff]  ;;  %v3920_v42 = vld [vmem:[#allocation2_spill] sm:$0xff] }
 0x291   :  { %v704_v56 = vpack.c.bf16 %v695_v53, %v694_v20  ;;  %2600 = vrcp.f32 %v335_v62  ;;  %v3919_v53 = vld [vmem:[#allocation11_spill] sm:$0xff] }
 0x292   :  { %v2591_v57 = vpop.eup %2590 }
 0x293   :  { %2202 = vmatprep.mubr.bf16.mxu1 %v704_v56  ;;  %v337_v61 = vpop.xlane.xlu0 %336  ;;  %v1286_v58 = vmul.f32 %v2591_v57, %v3912_v38  ;;  %v2593_v19 = vpop.eup %2592 }
 0x294   :  { %v1688_v21 = vpop.xlane.xlu1 %1687  ;;  %2602 = vrcp.f32 %v337_v61  ;;  %v696_v36 = vmul.f32 %v2593_v19, %v3913_v51 }
 0x295   :  { %v1295_v24 = vpack.c.bf16 %v1286_v58, %v1285_v1  ;;  %2604 = vrcp.f32 %v1688_v21 }
 0x296   :  { %v2595_v39 = vpop.eup %2594 }
 0x297   :  { %2266 = vmatprep.mubr.bf16.mxu0 %v1295_v24  ;;  %v1690_v13 = vpop.xlane.xlu0 %1689  ;;  %v697_v48 = vmul.f32 %v2595_v39, %v3914_v14  ;;  %v2597_v32 = vpop.eup %2596 }
 0x298   :  { %v339_v29 = vpop.xlane.xlu1 %338  ;;  %2606 = vrcp.f32 %v1690_v13  ;;  %v1287_v4 = vmul.f32 %v2597_v32, %v3445_v43 }
 0x299   :  { %v705_v50 = vpack.c.bf16 %v697_v48, %v696_v36  ;;  %2608 = vrcp.f32 %v339_v29 }
 0x29a   :  { %v2599_v45 = vpop.eup %2598 }
 0x29b   :  { %2203 = vmatmul.mubr.bf16.gmra.mrb[12].mxu1 %v705_v50  ;;  %v341_v52 = vpop.xlane.xlu0 %340  ;;  %v1288_v8 = vmul.f32 %v2599_v45, %v3915_v37  ;;  %v2601_v28 = vpop.eup %2600 }
 0x29c   :  { %v1692_v11 = vpop.xlane.xlu1 %1691  ;;  %2610 = vrcp.f32 %v341_v52  ;;  %v382_v3 = vmul.f32 %v2601_v28, %v3916_v6 }
 0x29d   :  { %v1296_v59 = vpack.c.bf16 %v1288_v8, %v1287_v4  ;;  %2612 = vrcp.f32 %v1692_v11 }
 0x29e   :  { %v2603_v60 = vpop.eup %2602 }
 0x29f   :  { %2267 = vmatmul.mubr.bf16.gmra.mrb[12].mxu0 %v1296_v59  ;;  %v1694_v55 = vpop.xlane.xlu0 %1693  ;;  %v383_v7 = vmul.f32 %v2603_v60, %v3917_v2  ;;  %v2605_v54 = vpop.eup %2604 }
 0x2a0   :  { %v343_v30 = vpop.xlane.xlu1 %342  ;;  %2614 = vrcp.f32 %v1694_v55  ;;  %v1735_v20 = vmul.f32 %v2605_v54, %v3918_v10 }
 0x2a1   :  { %v398_v34 = vpack.c.bf16 %v383_v7, %v382_v3  ;;  %2616 = vrcp.f32 %v343_v30 }
 0x2a2   :  { %v2607_v47 = vpop.eup %2606 }
 0x2a3   :  { %2222 = vmatprep.mubr.bf16.mxu1 %v398_v34  ;;  %v345_v43 = vpop.xlane.xlu0 %344  ;;  %v1736_v46 = vmul.f32 %v2607_v47, %v3919_v53  ;;  %v2609_v62 = vpop.eup %2608 }
 0x2a4   :  { %v1696_v56 = vpop.xlane.xlu1 %1695  ;;  %2618 = vrcp.f32 %v345_v43  ;;  %v384_v1 = vmul.f32 %v2609_v62, %v3920_v42 }
 0x2a5   :  { %v1751_v57 = vpack.c.bf16 %v1736_v46, %v1735_v20  ;;  %2620 = vrcp.f32 %v1696_v56 }
 0x2a6   :  { %v2611_v61 = vpop.eup %2610 }
 0x2a7   :  { %v385_v38 = vmul.f32 %v2611_v61, %v3485_v40  ;;  %2286 = vmatprep.mubr.bf16.mxu0 %v1751_v57  ;;  %v1698_v58 = vpop.xlane.xlu0 %1697  ;;  %v2613_v19 = vpop.eup %2612 }
 0x2a8   :  { %v347_v21 = vpop.xlane.xlu1 %346  ;;  %2622 = vrcp.f32 %v1698_v58  ;;  %v1737_v13 = vmul.f32 %v2613_v19, %v3492_v25 }
 0x2a9   :  { %v399_v24 = vpack.c.bf16 %v385_v38, %v384_v1  ;;  %2624 = vrcp.f32 %v347_v21 }
 0x2aa   :  { %v2615_v39 = vpop.eup %2614 }
 0x2ab   :  { %v1738_v51 = vmul.f32 %v2615_v39, %v3500_v22  ;;  %2223 = vmatmul.mubr.bf16.vlgmr.msra.gmra.mrb[0].mxu1 %v399_v24  ;;  %v349_v36 = vpop.xlane.xlu0 %348  ;;  %v2617_v14 = vpop.eup %2616 }
 0x2ac   :  { %v1700_v48 = vpop.xlane.xlu1 %1699  ;;  %2626 = vrcp.f32 %v349_v36  ;;  %v386_v50 = vmul.f32 %v2617_v14, %v3502_v41 }
 0x2ad   :  { %v1752_v32 = vpack.c.bf16 %v1738_v51, %v1737_v13  ;;  %2628 = vrcp.f32 %v1700_v48 }
 0x2ae   :  { %v2619_v29 = vpop.eup %2618 }
 0x2af   :  { %2287 = vmatmul.mubr.bf16.vlgmr.msra.gmra.mrb[0].mxu0 %v1752_v32  ;;  %v1702_v40 = vpop.xlane.xlu0 %1701  ;;  %v387_v45 = vmul.f32 %v2619_v29, %v3508_v18  ;;  %v2621_v52 = vpop.eup %2620 }
 0x2b0   :  { %v351_v4 = vpop.xlane.xlu1 %350  ;;  %2630 = vrcp.f32 %v1702_v40  ;;  %v1739_v8 = vmul.f32 %v2621_v52, %v3510_v23 }
 0x2b1   :  { %v400_v25 = vpack.c.bf16 %v387_v45, %v386_v50  ;;  %2632 = vrcp.f32 %v351_v4 }
 0x2b2   :  { %v2623_v37 = vpop.eup %2622 }
 0x2b3   :  { %2226 = vmatprep.mubr.bf16.mxu1 %v400_v25  ;;  %v353_v22 = vpop.xlane.xlu0 %352  ;;  %v1740_v28 = vmul.f32 %v2623_v37, %v3516_v15  ;;  %v2625_v11 = vpop.eup %2624 }
 0x2b4   :  { %v1704_v59 = vpop.xlane.xlu1 %1703  ;;  %2634 = vrcp.f32 %v353_v22  ;;  %v388_v18 = vmul.f32 %v2625_v11, %v3518_v44  ;;  %v3923_v22 = vld [vmem:[#allocation30_spill] sm:$0xff] }
 0x2b5   :  { %v1753_v60 = vpack.c.bf16 %v1740_v28, %v1739_v8  ;;  %2636 = vrcp.f32 %v1704_v59  ;;  %v3924_v28 = vld [vmem:[#allocation13_spill] sm:$0xff] }
 0x2b6   :  { %v2627_v55 = vpop.eup %2626 }
 0x2b7   :  { %2290 = vmatprep.mubr.bf16.mxu0 %v1753_v60  ;;  %v1706_v41 = vpop.xlane.xlu0 %1705  ;;  %v389_v6 = vmul.f32 %v2627_v55, %v3524_v35  ;;  %v2629_v3 = vpop.eup %2628  ;;  %v3925_v60 = vld [vmem:[#allocation3_spill] sm:$0xff] }
 0x2b8   :  { %v355_v2 = vpop.xlane.xlu1 %354  ;;  %2638 = vrcp.f32 %v1706_v41  ;;  %v1741_v15 = vmul.f32 %v2629_v3, %v3526_v0  ;;  %v3926_v41 = vld [vmem:[#allocation15_spill] sm:$0xff] }
 0x2b9   :  { %v401_v7 = vpack.c.bf16 %v389_v6, %v388_v18  ;;  %2640 = vrcp.f32 %v355_v2 }
 0x2ba   :  { %v2631_v54 = vpop.eup %2630 }
 0x2bb   :  { %2227 = vmatmul.mubr.bf16.gmra.mrb[4].mxu1 %v401_v7  ;;  %v357_v23 = vpop.xlane.xlu0 %356  ;;  %v1742_v30 = vmul.f32 %v2631_v54, %v3532_v33  ;;  %v2633_v34 = vpop.eup %2632 }
 0x2bc   :  { %v1708_v47 = vpop.xlane.xlu1 %1707  ;;  %2642 = vrcp.f32 %v357_v23  ;;  %v390_v35 = vmul.f32 %v2633_v34, %v3534_v27 }
 0x2bd   :  { %v1754_v43 = vpack.c.bf16 %v1742_v30, %v1741_v15  ;;  %2644 = vrcp.f32 %v1708_v47  ;;  %v3701_v15 = vld [vmem:[%s3787_s4] ss:$0 sm:$0xff] }
 0x2be   :  { %v2635_v10 = vpop.eup %2634 }
 0x2bf   :  { %2291 = vmatmul.mubr.bf16.gmra.mrb[4].mxu0 %v1754_v43  ;;  %v1710_v44 = vpop.xlane.xlu0 %1709  ;;  %v391_v20 = vmul.f32 %v2635_v10, %v3540_v17  ;;  %v2637_v53 = vpop.eup %2636 }
 0x2c0   :  { %v359_v46 = vpop.xlane.xlu1 %358  ;;  %2646 = vrcp.f32 %v1710_v44  ;;  %v1743_v33 = vmul.f32 %v2637_v53, %v3542_v49 }
 0x2c1   :  { %v402_v62 = vpack.c.bf16 %v391_v20, %v390_v35  ;;  %2648 = vrcp.f32 %v359_v46 }
 0x2c2   :  { %v2639_v56 = vpop.eup %2638 }
 0x2c3   :  { %2230 = vmatprep.mubr.bf16.mxu1 %v402_v62  ;;  %v361_v0 = vpop.xlane.xlu0 %360  ;;  %v1744_v57 = vmul.f32 %v2639_v56, %v3548_v9  ;;  %v2641_v61 = vpop.eup %2640 }
 0x2c4   :  { %v1712_v42 = vpop.xlane.xlu1 %1711  ;;  %2650 = vrcp.f32 %v361_v0  ;;  %v392_v17 = vmul.f32 %v2641_v61, %v3550_v63 }
 0x2c5   :  { %v1755_v1 = vpack.c.bf16 %v1744_v57, %v1743_v33  ;;  %2652 = vrcp.f32 %v1712_v42 }
 0x2c6   :  { %v2643_v38 = vpop.eup %2642 }
 0x2c7   :  { %2294 = vmatprep.mubr.bf16.mxu0 %v1755_v1  ;;  %v1714_v27 = vpop.xlane.xlu0 %1713  ;;  %v393_v58 = vmul.f32 %v2643_v38, %v3556_v5  ;;  %v2645_v19 = vpop.eup %2644 }
 0x2c8   :  { %v363_v21 = vpop.xlane.xlu1 %362  ;;  %2654 = vrcp.f32 %v1714_v27  ;;  %v1745_v9 = vmul.f32 %v2645_v19, %v3558_v31  ;;  %v3921_v31 = vld [vmem:[#allocation12_spill] sm:$0xff] }
 0x2c9   :  { %v403_v24 = vpack.c.bf16 %v393_v58, %v392_v17  ;;  %2656 = vrcp.f32 %v363_v21 }
 0x2ca   :  { %v2647_v39 = vpop.eup %2646 }
 0x2cb   :  { %2231 = vmatmul.mubr.bf16.gmra.mrb[8].mxu1 %v403_v24  ;;  %v365_v49 = vpop.xlane.xlu0 %364  ;;  %v1746_v13 = vmul.f32 %v2647_v39, %v3563_v12  ;;  %v2649_v51 = vpop.eup %2648  ;;  %v3922_v12 = vld [vmem:[#allocation4_spill] sm:$0xff] }
 0x2cc   :  { %v1716_v36 = vpop.xlane.xlu1 %1715  ;;  %2658 = vrcp.f32 %v365_v49  ;;  %v394_v5 = vmul.f32 %v2649_v51, %v3565_v26 }
 0x2cd   :  { %v1756_v14 = vpack.c.bf16 %v1746_v13, %v1745_v9  ;;  %2660 = vrcp.f32 %v1716_v36 }
 0x2ce   :  { %v2651_v48 = vpop.eup %2650 }
 0x2cf   :  { %2295 = vmatmul.mubr.bf16.gmra.mrb[8].mxu0 %v1756_v14  ;;  %v1718_v63 = vpop.xlane.xlu0 %1717  ;;  %v395_v32 = vmul.f32 %v2651_v48, %v3569_v16  ;;  %v2653_v29 = vpop.eup %2652 }
 0x2d0   :  { %2662 = vrcp.f32 %v1718_v63  ;;  %v1747_v45 = vmul.f32 %v2653_v29, %v3921_v31 }
 0x2d1   :  { %v404_v40 = vpack.c.bf16 %v395_v32, %v394_v5 }
 0x2d2   :  { %v2655_v50 = vpop.eup %2654 }
 0x2d3   :  { %2234 = vmatprep.mubr.bf16.mxu1 %v404_v40  ;;  %v1748_v52 = vmul.f32 %v2655_v50, %v3922_v12  ;;  %v2657_v4 = vpop.eup %2656 }
 0x2d4   :  { %v396_v8 = vmul.f32 %v2657_v4, %v3923_v22 }
 0x2d5   :  { %v1757_v25 = vpack.c.bf16 %v1748_v52, %v1747_v45 }
 0x2d6   :  { %v2659_v37 = vpop.eup %2658 }
 0x2d7   :  { %2298 = vmatprep.mubr.bf16.mxu0 %v1757_v25  ;;  %v397_v11 = vmul.f32 %v2659_v37, %v3924_v28  ;;  %v2661_v26 = vpop.eup %2660 }
 0x2d8   :  { %v1749_v55 = vmul.f32 %v2661_v26, %v3925_v60 }
 0x2d9   :  { %v405_v59 = vpack.c.bf16 %v397_v11, %v396_v8 }
 0x2da   :  { %v2663_v16 = vpop.eup %2662 }
 0x2db   :  { %2235 = vmatmul.mubr.bf16.gmra.mrb[12].mxu1 %v405_v59  ;;  %v1750_v18 = vmul.f32 %v2663_v16, %v3926_v41 }
 0x2dd   :  { %v1758_v6 = vpack.c.bf16 %v1750_v18, %v1749_v55 }
 0x2df   :  { %2299 = vmatmul.mubr.bf16.gmra.mrb[12].mxu0 %v1758_v6 }
 0x37e   :  { %v2224_v3 = vpop.f32.mrb[0].mxu1 }
 0x37f   :  { %v950_v2 = vpop.f32.mrb[1].mxu1 }
 0x380   :  { %v2225_v7 = vpop.f32.mrb[2].mxu1 }
 0x381   :  { %v953_v54 = vpop.f32.mrb[3].mxu1 }
 0x382   :  { %v2288_v23 = vpop.f32.mrb[0].mxu0 }
 0x383   :  { %v2302_v30 = vadd.f32 %v2288_v23, %v2224_v3  ;;  %v1858_v34 = vpop.f32.mrb[1].mxu0 }
 0x384   :  { %v2303_v47 = vadd.f32 %v1858_v34, %v950_v2  ;;  %v2289_v43 = vpop.f32.mrb[2].mxu0 }
 0x385   :  { %v1946_v10 = vadd.f32 %v2302_v30, %v3701_v15  ;;  %v2304_v44 = vadd.f32 %v2289_v43, %v2225_v7  ;;  %v1861_v35 = vpop.f32.mrb[3].mxu0 }
 0x386   :  { %v1944_v20 = vadd.f32 %v2303_v47, %v3701_v15  ;;  %v2305_v53 = vadd.f32 %v1861_v35, %v953_v54 }
 0x387   :  { %v1962_v46 = vmul.f32 0.2, %v1946_v10  ;;  %v1947_v62 = vadd.f32 %v2304_v44, %v3701_v15 }
 0x388   :  { %v1960_v56 = vmul.f32 0.2, %v1944_v20  ;;  %v1945_v0 = vadd.f32 %v2305_v53, %v3701_v15 }
 0x389   :  { %v1978_v33 = vmax.f32 %v1946_v10, %v1962_v46  ;;  %v1963_v57 = vmul.f32 0.2, %v1947_v62 }
 0x38a   :  { %v1976_v61 = vmax.f32 %v1944_v20, %v1960_v56  ;;  %v1961_v42 = vmul.f32 0.2, %v1945_v0 }
 0x38b   :  { %1995 = vst.msk [vmem:[%s3788_s5 + $0x10] sm:$0xff] %vm1992_vm0, %v1978_v33  ;;  %v1979_v1 = vmax.f32 %v1947_v62, %v1963_v57 }
 0x38c   :  { %1993 = vst.msk [vmem:[%s3788_s5] sm:$0xff] %vm1992_vm0, %v1976_v61  ;;  %v1977_v38 = vmax.f32 %v1945_v0, %v1961_v42 }
 0x38d   :  { %1996 = vst.msk [vmem:[%s3788_s5 + $0x18] sm:$0xff] %vm1992_vm0, %v1979_v1 }
 0x38e   :  { %1994 = vst.msk [vmem:[%s3788_s5 + $0x8] sm:$0xff] %vm1992_vm0, %v1977_v38  ;;  %v2228_v27 = vpop.f32.mrb[4].mxu1 }
 0x38f   :  { %v966_v17 = vpop.f32.mrb[5].mxu1 }
 0x390   :  { %v2229_v58 = vpop.f32.mrb[6].mxu1 }
 0x391   :  { %v969_v19 = vpop.f32.mrb[7].mxu1 }
 0x392   :  { %v2292_v21 = vpop.f32.mrb[4].mxu0 }
 0x393   :  { %v2306_v24 = vadd.f32 %v2292_v21, %v2228_v27  ;;  %v1874_v39 = vpop.f32.mrb[5].mxu0 }
 0x394   :  { %v2307_v49 = vadd.f32 %v1874_v39, %v966_v17  ;;  %v2293_v9 = vpop.f32.mrb[6].mxu0 }
 0x395   :  { %v1950_v13 = vadd.f32 %v2306_v24, %v3701_v15  ;;  %v2308_v51 = vadd.f32 %v2293_v9, %v2229_v58  ;;  %v1877_v36 = vpop.f32.mrb[7].mxu0 }
 0x396   :  { %v1948_v14 = vadd.f32 %v2307_v49, %v3701_v15  ;;  %v2309_v48 = vadd.f32 %v1877_v36, %v969_v19 }
 0x397   :  { %v1966_v63 = vmul.f32 0.2, %v1950_v13  ;;  %v1951_v5 = vadd.f32 %v2308_v51, %v3701_v15 }
 0x398   :  { %v1964_v32 = vmul.f32 0.2, %v1948_v14  ;;  %v1949_v29 = vadd.f32 %v2309_v48, %v3701_v15 }
 0x399   :  { %v1982_v40 = vmax.f32 %v1950_v13, %v1966_v63  ;;  %v1967_v50 = vmul.f32 0.2, %v1951_v5 }
 0x39a   :  { %v1980_v31 = vmax.f32 %v1948_v14, %v1964_v32  ;;  %v1965_v45 = vmul.f32 0.2, %v1949_v29 }
 0x39b   :  { %1999 = vst.msk [vmem:[%s3788_s5 + $0x30] sm:$0xff] %vm1992_vm0, %v1982_v40  ;;  %v1983_v12 = vmax.f32 %v1951_v5, %v1967_v50 }
 0x39c   :  { %1997 = vst.msk [vmem:[%s3788_s5 + $0x20] sm:$0xff] %vm1992_vm0, %v1980_v31  ;;  %v1981_v52 = vmax.f32 %v1949_v29, %v1965_v45 }
 0x39d   :  { %2000 = vst.msk [vmem:[%s3788_s5 + $0x38] sm:$0xff] %vm1992_vm0, %v1983_v12 }
 0x39e   :  { %1998 = vst.msk [vmem:[%s3788_s5 + $0x28] sm:$0xff] %vm1992_vm0, %v1981_v52  ;;  %v2232_v4 = vpop.f32.mrb[8].mxu1 }
 0x39f   :  { %v982_v25 = vpop.f32.mrb[9].mxu1 }
 0x3a0   :  { %v2233_v37 = vpop.f32.mrb[10].mxu1 }
 0x3a1   :  { %v985_v22 = vpop.f32.mrb[11].mxu1 }
 0x3a2   :  { %v2296_v8 = vpop.f32.mrb[8].mxu0 }
 0x3a3   :  { %v2310_v28 = vadd.f32 %v2296_v8, %v2232_v4  ;;  %v1890_v11 = vpop.f32.mrb[9].mxu0 }
 0x3a4   :  { %v2311_v26 = vadd.f32 %v1890_v11, %v982_v25  ;;  %v2297_v59 = vpop.f32.mrb[10].mxu0 }
 0x3a5   :  { %v1954_v16 = vadd.f32 %v2310_v28, %v3701_v15  ;;  %v2312_v60 = vadd.f32 %v2297_v59, %v2233_v37  ;;  %v1893_v55 = vpop.f32.mrb[11].mxu0 }
 0x3a6   :  { %v1952_v41 = vadd.f32 %v2311_v26, %v3701_v15  ;;  %v2313_v18 = vadd.f32 %v1893_v55, %v985_v22 }
 0x3a7   :  { %v1970_v6 = vmul.f32 0.2, %v1954_v16  ;;  %v1955_v3 = vadd.f32 %v2312_v60, %v3701_v15 }
 0x3a8   :  { %v1968_v2 = vmul.f32 0.2, %v1952_v41  ;;  %v1953_v7 = vadd.f32 %v2313_v18, %v3701_v15 }
 0x3a9   :  { %v1986_v54 = vmax.f32 %v1954_v16, %v1970_v6  ;;  %v1971_v23 = vmul.f32 0.2, %v1955_v3 }
 0x3aa   :  { %v1984_v30 = vmax.f32 %v1952_v41, %v1968_v2  ;;  %v1969_v34 = vmul.f32 0.2, %v1953_v7 }
 0x3ab   :  { %2003 = vst.msk [vmem:[%s3788_s5 + $0x50] sm:$0xff] %vm1992_vm0, %v1986_v54  ;;  %v1987_v47 = vmax.f32 %v1955_v3, %v1971_v23 }
 0x3ac   :  { %2001 = vst.msk [vmem:[%s3788_s5 + $0x40] sm:$0xff] %vm1992_vm0, %v1984_v30  ;;  %v1985_v43 = vmax.f32 %v1953_v7, %v1969_v34 }
 0x3ad   :  { %2004 = vst.msk [vmem:[%s3788_s5 + $0x58] sm:$0xff] %vm1992_vm0, %v1987_v47 }
 0x3ae   :  { %2002 = vst.msk [vmem:[%s3788_s5 + $0x48] sm:$0xff] %vm1992_vm0, %v1985_v43  ;;  %v2236_v10 = vpop.f32.mrb[12].mxu1 }
 0x3af   :  { %v998_v44 = vpop.f32.mrb[13].mxu1 }
 0x3b0   :  { %v2237_v35 = vpop.f32.mrb[14].mxu1 }
 0x3b1   :  { %v1001_v20 = vpop.f32.mrb[15].mxu1 }
 0x3b2   :  { %v2300_v53 = vpop.f32.mrb[12].mxu0 }
 0x3b3   :  { %v2314_v46 = vadd.f32 %v2300_v53, %v2236_v10  ;;  %v1906_v62 = vpop.f32.mrb[13].mxu0 }
 0x3b4   :  { %v2315_v56 = vadd.f32 %v1906_v62, %v998_v44  ;;  %v2301_v0 = vpop.f32.mrb[14].mxu0 }
 0x3b5   :  { %v1958_v33 = vadd.f32 %v2314_v46, %v3701_v15  ;;  %v2316_v57 = vadd.f32 %v2301_v0, %v2237_v35  ;;  %v1909_v61 = vpop.f32.mrb[15].mxu0 }
 0x3b6   :  { %v1956_v42 = vadd.f32 %v2315_v56, %v3701_v15  ;;  %v2317_v1 = vadd.f32 %v1909_v61, %v1001_v20 }
 0x3b7   :  { %v1974_v38 = vmul.f32 0.2, %v1958_v33  ;;  %v1959_v27 = vadd.f32 %v2316_v57, %v3701_v15 }
 0x3b8   :  { %v1972_v17 = vmul.f32 0.2, %v1956_v42  ;;  %v1957_v58 = vadd.f32 %v2317_v1, %v3701_v15 }
 0x3b9   :  { %v1990_v19 = vmax.f32 %v1958_v33, %v1974_v38  ;;  %v1975_v21 = vmul.f32 0.2, %v1959_v27 }
 0x3ba   :  { %v1988_v24 = vmax.f32 %v1956_v42, %v1972_v17  ;;  %v1973_v39 = vmul.f32 0.2, %v1957_v58 }
 0x3bb   :  { %2007 = vst.msk [vmem:[%s3788_s5 + $0x70] sm:$0xff] %vm1992_vm0, %v1990_v19  ;;  %v1991_v49 = vmax.f32 %v1959_v27, %v1975_v21 }
 0x3bc   :  { %2005 = vst.msk [vmem:[%s3788_s5 + $0x60] sm:$0xff] %vm1992_vm0, %v1988_v24  ;;  %v1989_v9 = vmax.f32 %v1957_v58, %v1973_v39 }
 0x3bd   :  { %2008 = vst.msk [vmem:[%s3788_s5 + $0x78] sm:$0xff] %vm1992_vm0, %v1991_v49 }
 0x3be   :  { %2006 = vst.msk [vmem:[%s3788_s5 + $0x68] sm:$0xff] %vm1992_vm0, %v1989_v9 }

</bundles_post_ra>
